<compile_context>
chip_gen: v7x
topology: tpu7x:2x2x1
jax: 0.10.0
libtpu: 0.0.40
codegen_flags: <defaults>
</compile_context>

<pallas_src>
import functools

import jax
import jax.numpy as jnp
from jax import lax
from jax.experimental import pallas as pl
from jax.experimental.pallas import tpu as pltpu


# ----------------------------------------------------------------------------- kernel
def _basic_block_kernel(H, W, C, LEAD,
                        x_ref, w1_ref, b1_ref, w2_ref, b2_ref,
                        out_ref, xbf_ref, col_ref, y1p_ref):
    """Fully fused BasicBlock on one image tile held in VMEM.

    x_ref   : (1, P, C)  f32   zero-padded image, spatial dims flattened row-major, with
                               LEAD leading zero rows so the interior starts at a
                               sublane-aligned offset (P = LEAD + (H+2)*(W+2) + trail).
    w*_ref  : (9*C, C)   bf16  conv weights, BN scale folded, rows ordered (kh, kw, cin).
    b*_ref  : (1, C)     f32   folded BN bias.
    out_ref : (1, M, C)  f32   output slab, M = H*(W+2) (wrapper drops 2 halo cols/row).
    xbf_ref : (P, C)     bf16  scratch: image cast to bf16 once.
    col_ref : (M, 9*C)   bf16  scratch: im2col LHS, reused for both convs.
    y1p_ref : (P, C)     bf16  scratch: zero-padded conv1 activation.
    """
    W2 = W + 2
    M = H * W2
    OFF0 = LEAD + W2 + 1            # interior start; wrapper picks LEAD so OFF0 % 8 == 0
    P = y1p_ref.shape[0]

    # ---- halo-column validity mask, built in-kernel (no HBM input) ---------------------
    # col(m) = m - W2*floor(m/W2); done in f32 with mul+floor only (no vector int rem).
    m_f = lax.broadcasted_iota(jnp.int32, (M, 1), 0).astype(jnp.float32)
    row_f = jnp.floor((m_f + 0.5) * (1.0 / W2))        # exact for m < 2^20
    col_ok = (m_f - row_f * W2) < (W - 0.5)            # (M, 1) bool

    # ---- cast the padded image to bf16 once ---------------------------------------------
    xbf_ref[...] = x_ref[0].astype(jnp.bfloat16)

    # ---- conv1 (BN1 folded): pack 9 taps into one im2col LHS -> ONE MXU matmul ----------
    for kh in range(3):
        for kw in range(3):
            t = kh * 3 + kw
            col_ref[:, t * C:(t + 1) * C] = xbf_ref[pl.ds(LEAD + kh * W2 + kw, M), :]
    acc1 = jnp.dot(col_ref[...], w1_ref[...], preferred_element_type=jnp.float32)
    y1 = jnp.maximum(acc1 + b1_ref[...], 0.0)
    y1 = jnp.where(col_ok, y1, 0.0).astype(jnp.bfloat16)   # zero the 2 halo cols per row

    # ---- stage conv1 activation as a zero-padded bf16 flat image ------------------------
    # only the halo rows need zeroing; the interior [OFF0, OFF0+M) is fully rewritten
    y1p_ref[pl.ds(0, OFF0), :] = jnp.zeros((OFF0, C), jnp.bfloat16)
    y1p_ref[pl.ds(OFF0 + M, P - OFF0 - M), :] = jnp.zeros((P - OFF0 - M, C), jnp.bfloat16)
    y1p_ref[pl.ds(OFF0, M), :] = y1

    # ---- conv2 (BN2 folded): im2col pack -> ONE MXU matmul ------------------------------
    for kh in range(3):
        for kw in range(3):
            t = kh * 3 + kw
            col_ref[:, t * C:(t + 1) * C] = y1p_ref[pl.ds(LEAD + kh * W2 + kw, M), :]
    acc2 = jnp.dot(col_ref[...], w2_ref[...], preferred_element_type=jnp.float32)

    # ---- bias + residual (f32, one aligned load, no extra HBM read) + ReLU --------------
    residual = x_ref[0, pl.ds(OFF0, M), :]
    out_ref[0] = jnp.maximum(acc2 + b2_ref[...] + residual, 0.0).astype(out_ref.dtype)


# ----------------------------------------------------------------------------- wrapper
def prepare_params(raw):
    """Fold BN scale into the conv weights once; reshape to (9*Cin, Cout) bf16 for the MXU."""
    cin, cmid = raw["w1"].shape[2], raw["w1"].shape[3]
    cout = raw["w2"].shape[3]
    w1 = (raw["w1"] * raw["s1"]).astype(jnp.bfloat16).reshape(9 * cin, cmid)
    w2 = (raw["w2"] * raw["s2"]).astype(jnp.bfloat16).reshape(9 * cmid, cout)
    return {"w1": w1, "b1": raw["b1"].reshape(1, cmid).astype(jnp.float32),
            "w2": w2, "b2": raw["b2"].reshape(1, cout).astype(jnp.float32)}


def basic_block_forward(x_nchw, prep):
    """BasicBlock forward.  x_nchw: (N, C, H, W) float32 -> (N, C, H, W) float32."""
    n, c, h, w = x_nchw.shape
    cout = prep["w1"].shape[-1]
    assert c == cout, "stride=1 / downsample=None BasicBlock requires inplanes == planes"
    w2p = w + 2
    m = h * w2p
    lead = (-(w2p + 1)) % 8                     # make the interior offset a multiple of 8
    p_rows = lead + (h + 2) * w2p + 2           # +2 so the last tap's slice stays in range
    p_rows = ((p_rows + 7) // 8) * 8

    # NCHW -> NHWC once, zero-pad the 3x3 halo, flatten spatial dims (contiguous reshape),
    # then add `lead` aligned leading zero rows + trailing zero rows.
    x = jnp.transpose(x_nchw, (0, 2, 3, 1)).astype(jnp.float32)
    xpad = jnp.pad(x, ((0, 0), (1, 1), (1, 1), (0, 0)))
    xflat = jnp.pad(xpad.reshape(n, (h + 2) * w2p, c),
                    ((0, 0), (lead, p_rows - lead - (h + 2) * w2p), (0, 0)))

    kernel = functools.partial(_basic_block_kernel, h, w, c, lead)

    flops = int(n * 2 * 2 * m * (9 * c) * cout)                    # two (M,9C)x(9C,C) GEMMs
    bytes_accessed = int(n * p_rows * c * 4 + n * m * cout * 4
                         + 2 * 9 * c * cout * 2 + 2 * cout * 4)

    out_flat = pl.pallas_call(
        kernel,
        out_shape=jax.ShapeDtypeStruct((n, m, cout), jnp.float32),
        grid=(n,),
        in_specs=[
            pl.BlockSpec((1, p_rows, c), lambda i: (i, 0, 0)),     # padded flattened image
            pl.BlockSpec((9 * c, cout), lambda i: (0, 0)),         # conv1 weights (bf16)
            pl.BlockSpec((1, cout), lambda i: (0, 0)),             # bn1 bias (f32)
            pl.BlockSpec((9 * cout, cout), lambda i: (0, 0)),      # conv2 weights (bf16)
            pl.BlockSpec((1, cout), lambda i: (0, 0)),             # bn2 bias (f32)
        ],
        out_specs=pl.BlockSpec((1, m, cout), lambda i: (i, 0, 0)),
        scratch_shapes=[pltpu.VMEM((p_rows, c), jnp.bfloat16),     # bf16 image
                        pltpu.VMEM((m, 9 * c), jnp.bfloat16),      # im2col LHS (reused)
                        pltpu.VMEM((p_rows, cout), jnp.bfloat16)], # padded conv1 activation
        compiler_params=pltpu.CompilerParams(
            dimension_semantics=("parallel",),
            vmem_limit_bytes=32 * 1024 * 1024),
        cost_estimate=pl.CostEstimate(flops=flops, transcendentals=0,
                                      bytes_accessed=bytes_accessed),
    )(xflat, prep["w1"], prep["b1"], prep["w2"], prep["b2"])

    out = out_flat.reshape(n, h, w2p, cout)[:, :, :w, :]   # drop the 2 halo columns per row
    return jnp.transpose(out, (0, 3, 1, 2))                # NHWC -> NCHW


# ----------------------------------------------------------------------------- reference
def _ref_forward(x_nchw, prep):
    """Pure-JAX reference with matching numerics (bf16 conv inputs, f32 accum/residual)."""
    c = x_nchw.shape[1]
    x = jnp.transpose(x_nchw, (0, 2, 3, 1))
    w1 = prep["w1"].reshape(3, 3, c, c)
    w2 = prep["w2"].reshape(3, 3, c, c)
    conv = functools.partial(
        lax.conv_general_dilated, window_strides=(1, 1), padding="SAME",
        dimension_numbers=("NHWC", "HWIO", "NHWC"),
        preferred_element_type=jnp.float32)
    y1 = jnp.maximum(conv(x.astype(jnp.bfloat16), w1) + prep["b1"][0], 0.0)
    y2 = conv(y1.astype(jnp.bfloat16), w2) + prep["b2"][0] + x
    return jnp.transpose(jnp.maximum(y2, 0.0), (0, 3, 1, 2))


# ----------------------------------------------------------------------------- param init
def _make_params(key, planes):
    ks = jax.random.split(key, 10)
    eps = 1e-5

    def fold_bn(gamma, beta, mean, var):
        scale = gamma / jnp.sqrt(var + eps)
        return scale, beta - mean * scale

    w1 = jax.random.normal(ks[0], (3, 3, planes, planes), jnp.float32) * 0.1
    w2 = jax.random.normal(ks[1], (3, 3, planes, planes), jnp.float32) * 0.1
    g1 = 1.0 + 0.1 * jax.random.normal(ks[2], (planes,), jnp.float32)
    b1 = 0.1 * jax.random.normal(ks[3], (planes,), jnp.float32)
    m1 = 0.1 * jax.random.normal(ks[4], (planes,), jnp.float32)
    v1 = 0.5 + jnp.abs(jax.random.normal(ks[5], (planes,), jnp.float32))
    g2 = 1.0 + 0.1 * jax.random.normal(ks[6], (planes,), jnp.float32)
    b2 = 0.1 * jax.random.normal(ks[7], (planes,), jnp.float32)
    m2 = 0.1 * jax.random.normal(ks[8], (planes,), jnp.float32)
    v2 = 0.5 + jnp.abs(jax.random.normal(ks[9], (planes,), jnp.float32))

    s1, bb1 = fold_bn(g1, b1, m1, v1)
    s2, bb2 = fold_bn(g2, b2, m2, v2)
    return {"w1": w1, "s1": s1, "b1": bb1, "w2": w2, "s2": s2, "b2": bb2}


# ----------------------------------------------------------------------------- main
if __name__ == "__main__":
    key = jax.random.PRNGKey(0)
    kx, kp = jax.random.split(key)

    # inplanes = planes = 8, stride = 1, downsample = None, is_octconv = False.
    # batch=4 so a megacore (v7x) gets >=2 pipelined grid steps per TensorCore.
    N, C, H, W = 4, 8, 16, 16
    x = jax.random.normal(kx, (N, C, H, W), jnp.float32)
    raw = _make_params(kp, C)
    prep = prepare_params(raw)

    fwd = jax.jit(basic_block_forward)
    out = jax.block_until_ready(fwd(x, prep))
    ref = jax.block_until_ready(_ref_forward(x, prep))

    assert out.shape == (N, C, H, W)
    assert jnp.allclose(out, ref, atol=1e-2, rtol=1e-2), "mismatch vs. JAX reference"
    print("KERNEL_OK")
</pallas_src>

<mosaic_0001>
module attributes {stable_mosaic.version = 11 : i64} {
  func.func @_basic_block_kernel(%arg0: i32, %arg1: memref<1x336x8xf32, #tpu.memory_space<vmem>>, %arg2: memref<72x8xbf16, #tpu.memory_space<vmem>>, %arg3: memref<1x8xf32, #tpu.memory_space<vmem>>, %arg4: memref<72x8xbf16, #tpu.memory_space<vmem>>, %arg5: memref<1x8xf32, #tpu.memory_space<vmem>>, %arg6: memref<1x288x8xf32, #tpu.memory_space<vmem>>, %arg7: memref<336x8xbf16, #tpu.memory_space<vmem>>, %arg8: memref<288x72xbf16, #tpu.memory_space<vmem>>, %arg9: memref<336x8xbf16, #tpu.memory_space<vmem>>) attributes {dimension_semantics = [#tpu.dimension_semantics<parallel>], iteration_bounds = array<i64: 4>, scalar_prefetch = 0 : i64, scratch_operands = 3 : i64, tpu.core_type = #tpu.core_type<tc>, window_params = [{transform_indices = @transform_0, window_bounds = array<i64: 1, 336, 8>}, {pipeline_mode = #tpu.pipeline_mode<synchronous>, transform_indices = @transform_1, window_bounds = array<i64: 72, 8>}, {pipeline_mode = #tpu.pipeline_mode<synchronous>, transform_indices = @transform_2, window_bounds = array<i64: 1, 8>}, {pipeline_mode = #tpu.pipeline_mode<synchronous>, transform_indices = @transform_3, window_bounds = array<i64: 72, 8>}, {pipeline_mode = #tpu.pipeline_mode<synchronous>, transform_indices = @transform_4, window_bounds = array<i64: 1, 8>}, {transform_indices = @transform_5, window_bounds = array<i64: 1, 288, 8>}]} {
    %0 = tpu.iota {dimensions = array<i32: 0>} : vector<288x1xi32>
    %1 = arith.sitofp %0 : vector<288x1xi32> to vector<288x1xf32>
    %cst = arith.constant 5.000000e-01 : f32
    %2 = vector.broadcast %cst : f32 to vector<288x1xf32>
    %3 = arith.addf %1, %2 : vector<288x1xf32>
    %cst_0 = arith.constant 0.055555556 : f32
    %4 = vector.broadcast %cst_0 : f32 to vector<288x1xf32>
    %5 = arith.mulf %3, %4 : vector<288x1xf32>
    %6 = math.floor %5 : vector<288x1xf32>
    %cst_1 = arith.constant 1.800000e+01 : f32
    %7 = vector.broadcast %cst_1 : f32 to vector<288x1xf32>
    %8 = arith.mulf %6, %7 : vector<288x1xf32>
    %9 = arith.subf %1, %8 : vector<288x1xf32>
    %cst_2 = arith.constant 1.550000e+01 : f32
    %10 = vector.broadcast %cst_2 : f32 to vector<288x1xf32>
    %11 = arith.cmpf olt, %9, %10 : vector<288x1xf32>
    %c0 = arith.constant 0 : index
    %c0_3 = arith.constant 0 : index
    %c0_4 = arith.constant 0 : index
    %12 = vector.load %arg1[%c0, %c0_3, %c0_4] : memref<1x336x8xf32, #tpu.memory_space<vmem>>, vector<1x336x8xf32>
    %13 = vector.shape_cast %12 : vector<1x336x8xf32> to vector<336x8xf32>
    %14 = arith.truncf %13 : vector<336x8xf32> to vector<336x8xbf16>
    %c0_5 = arith.constant 0 : index
    %c0_6 = arith.constant 0 : index
    %15 = vector.load %arg7[%c0_5, %c0_6] : memref<336x8xbf16, #tpu.memory_space<vmem>>, vector<336x8xbf16>
    tpu.vector_store %arg7[%c0_5, %c0_6], %14 {strides = array<i32>} : memref<336x8xbf16, #tpu.memory_space<vmem>>, vector<336x8xbf16>,
    %c5 = arith.constant 5 : index
    %c0_7 = arith.constant 0 : index
    %16 = vector.load %arg7[%c5, %c0_7] : memref<336x8xbf16, #tpu.memory_space<vmem>>, vector<288x8xbf16>
    %c0_8 = arith.constant 0 : index
    %c0_9 = arith.constant 0 : index
    %17 = vector.load %arg8[%c0_8, %c0_9] : memref<288x72xbf16, #tpu.memory_space<vmem>>, vector<288x8xbf16>
    tpu.vector_store %arg8[%c0_8, %c0_9], %16 {strides = array<i32>} : memref<288x72xbf16, #tpu.memory_space<vmem>>, vector<288x8xbf16>,
    %c6 = arith.constant 6 : index
    %c0_10 = arith.constant 0 : index
    %18 = vector.load %arg7[%c6, %c0_10] : memref<336x8xbf16, #tpu.memory_space<vmem>>, vector<288x8xbf16>
    %c0_11 = arith.constant 0 : index
    %c8 = arith.constant 8 : index
    %19 = vector.load %arg8[%c0_11, %c8] : memref<288x72xbf16, #tpu.memory_space<vmem>>, vector<288x8xbf16>
    tpu.vector_store %arg8[%c0_11, %c8], %18 {strides = array<i32>} : memref<288x72xbf16, #tpu.memory_space<vmem>>, vector<288x8xbf16>,
    %c7 = arith.constant 7 : index
    %c0_12 = arith.constant 0 : index
    %20 = vector.load %arg7[%c7, %c0_12] : memref<336x8xbf16, #tpu.memory_space<vmem>>, vector<288x8xbf16>
    %c0_13 = arith.constant 0 : index
    %c16 = arith.constant 16 : index
    %21 = vector.load %arg8[%c0_13, %c16] : memref<288x72xbf16, #tpu.memory_space<vmem>>, vector<288x8xbf16>
    tpu.vector_store %arg8[%c0_13, %c16], %20 {strides = array<i32>} : memref<288x72xbf16, #tpu.memory_space<vmem>>, vector<288x8xbf16>,
    %c23 = arith.constant 23 : index
    %c0_14 = arith.constant 0 : index
    %22 = vector.load %arg7[%c23, %c0_14] : memref<336x8xbf16, #tpu.memory_space<vmem>>, vector<288x8xbf16>
    %c0_15 = arith.constant 0 : index
    %c24 = arith.constant 24 : index
    %23 = vector.load %arg8[%c0_15, %c24] : memref<288x72xbf16, #tpu.memory_space<vmem>>, vector<288x8xbf16>
    tpu.vector_store %arg8[%c0_15, %c24], %22 {strides = array<i32>} : memref<288x72xbf16, #tpu.memory_space<vmem>>, vector<288x8xbf16>,
    %c24_16 = arith.constant 24 : index
    %c0_17 = arith.constant 0 : index
    %24 = vector.load %arg7[%c24_16, %c0_17] : memref<336x8xbf16, #tpu.memory_space<vmem>>, vector<288x8xbf16>
    %c0_18 = arith.constant 0 : index
    %c32 = arith.constant 32 : index
    %25 = vector.load %arg8[%c0_18, %c32] : memref<288x72xbf16, #tpu.memory_space<vmem>>, vector<288x8xbf16>
    tpu.vector_store %arg8[%c0_18, %c32], %24 {strides = array<i32>} : memref<288x72xbf16, #tpu.memory_space<vmem>>, vector<288x8xbf16>,
    %c25 = arith.constant 25 : index
    %c0_19 = arith.constant 0 : index
    %26 = vector.load %arg7[%c25, %c0_19] : memref<336x8xbf16, #tpu.memory_space<vmem>>, vector<288x8xbf16>
    %c0_20 = arith.constant 0 : index
    %c40 = arith.constant 40 : index
    %27 = vector.load %arg8[%c0_20, %c40] : memref<288x72xbf16, #tpu.memory_space<vmem>>, vector<288x8xbf16>
    tpu.vector_store %arg8[%c0_20, %c40], %26 {strides = array<i32>} : memref<288x72xbf16, #tpu.memory_space<vmem>>, vector<288x8xbf16>,
    %c41 = arith.constant 41 : index
    %c0_21 = arith.constant 0 : index
    %28 = vector.load %arg7[%c41, %c0_21] : memref<336x8xbf16, #tpu.memory_space<vmem>>, vector<288x8xbf16>
    %c0_22 = arith.constant 0 : index
    %c48 = arith.constant 48 : index
    %29 = vector.load %arg8[%c0_22, %c48] : memref<288x72xbf16, #tpu.memory_space<vmem>>, vector<288x8xbf16>
    tpu.vector_store %arg8[%c0_22, %c48], %28 {strides = array<i32>} : memref<288x72xbf16, #tpu.memory_space<vmem>>, vector<288x8xbf16>,
    %c42 = arith.constant 42 : index
    %c0_23 = arith.constant 0 : index
    %30 = vector.load %arg7[%c42, %c0_23] : memref<336x8xbf16, #tpu.memory_space<vmem>>, vector<288x8xbf16>
    %c0_24 = arith.constant 0 : index
    %c56 = arith.constant 56 : index
    %31 = vector.load %arg8[%c0_24, %c56] : memref<288x72xbf16, #tpu.memory_space<vmem>>, vector<288x8xbf16>
    tpu.vector_store %arg8[%c0_24, %c56], %30 {strides = array<i32>} : memref<288x72xbf16, #tpu.memory_space<vmem>>, vector<288x8xbf16>,
    %c43 = arith.constant 43 : index
    %c0_25 = arith.constant 0 : index
    %32 = vector.load %arg7[%c43, %c0_25] : memref<336x8xbf16, #tpu.memory_space<vmem>>, vector<288x8xbf16>
    %c0_26 = arith.constant 0 : index
    %c64 = arith.constant 64 : index
    %33 = vector.load %arg8[%c0_26, %c64] : memref<288x72xbf16, #tpu.memory_space<vmem>>, vector<288x8xbf16>
    tpu.vector_store %arg8[%c0_26, %c64], %32 {strides = array<i32>} : memref<288x72xbf16, #tpu.memory_space<vmem>>, vector<288x8xbf16>,
    %c0_27 = arith.constant 0 : index
    %c0_28 = arith.constant 0 : index
    %34 = vector.load %arg8[%c0_27, %c0_28] : memref<288x72xbf16, #tpu.memory_space<vmem>>, vector<288x72xbf16>
    %c0_29 = arith.constant 0 : index
    %c0_30 = arith.constant 0 : index
    %35 = vector.load %arg2[%c0_29, %c0_30] : memref<72x8xbf16, #tpu.memory_space<vmem>>, vector<72x8xbf16>
    %cst_31 = arith.constant dense<0.000000e+00> : vector<288x8xf32>
    %36 = tpu.matmul %34, %35, %cst_31 {dimension_numbers = #tpu.dot_dimension_numbers<[1], [0], [0], [1], [0, 0, 1, 1], [], []>} : vector<288x72xbf16>, vector<72x8xbf16>, vector<288x8xf32> -> vector<288x8xf32>
    %c0_32 = arith.constant 0 : index
    %c0_33 = arith.constant 0 : index
    %37 = vector.load %arg3[%c0_32, %c0_33] : memref<1x8xf32, #tpu.memory_space<vmem>>, vector<1x8xf32>
    %38 = vector.broadcast %37 : vector<1x8xf32> to vector<288x8xf32>
    %39 = arith.addf %36, %38 : vector<288x8xf32>
    %cst_34 = arith.constant 0.000000e+00 : f32
    %40 = vector.broadcast %cst_34 : f32 to vector<288x8xf32>
    %41 = arith.maximumf %39, %40 : vector<288x8xf32>
    %cst_35 = arith.constant 0.000000e+00 : f32
    %42 = vector.shape_cast %11 : vector<288x1xi1> to vector<288x1xi1>
    %43 = vector.broadcast %42 : vector<288x1xi1> to vector<288x8xi1>
    %44 = vector.broadcast %cst_35 : f32 to vector<288x8xf32>
    %45 = arith.select %43, %41, %44 : vector<288x8xi1>, vector<288x8xf32>
    %46 = arith.truncf %45 : vector<288x8xf32> to vector<288x8xbf16>
    %cst_36 = arith.constant 0.000000e+00 : bf16
    %47 = vector.broadcast %cst_36 : bf16 to vector<24x8xbf16>
    %c0_37 = arith.constant 0 : index
    %c0_38 = arith.constant 0 : index
    %48 = vector.load %arg9[%c0_37, %c0_38] : memref<336x8xbf16, #tpu.memory_space<vmem>>, vector<24x8xbf16>
    tpu.vector_store %arg9[%c0_37, %c0_38], %47 {strides = array<i32>} : memref<336x8xbf16, #tpu.memory_space<vmem>>, vector<24x8xbf16>,
    %cst_39 = arith.constant 0.000000e+00 : bf16
    %49 = vector.broadcast %cst_39 : bf16 to vector<24x8xbf16>
    %c312 = arith.constant 312 : index
    %c0_40 = arith.constant 0 : index
    %50 = vector.load %arg9[%c312, %c0_40] : memref<336x8xbf16, #tpu.memory_space<vmem>>, vector<24x8xbf16>
    tpu.vector_store %arg9[%c312, %c0_40], %49 {strides = array<i32>} : memref<336x8xbf16, #tpu.memory_space<vmem>>, vector<24x8xbf16>,
    %c24_41 = arith.constant 24 : index
    %c0_42 = arith.constant 0 : index
    %51 = vector.load %arg9[%c24_41, %c0_42] : memref<336x8xbf16, #tpu.memory_space<vmem>>, vector<288x8xbf16>
    tpu.vector_store %arg9[%c24_41, %c0_42], %46 {strides = array<i32>} : memref<336x8xbf16, #tpu.memory_space<vmem>>, vector<288x8xbf16>,
    %c5_43 = arith.constant 5 : index
    %c0_44 = arith.constant 0 : index
    %52 = vector.load %arg9[%c5_43, %c0_44] : memref<336x8xbf16, #tpu.memory_space<vmem>>, vector<288x8xbf16>
    %c0_45 = arith.constant 0 : index
    %c0_46 = arith.constant 0 : index
    %53 = vector.load %arg8[%c0_45, %c0_46] : memref<288x72xbf16, #tpu.memory_space<vmem>>, vector<288x8xbf16>
    tpu.vector_store %arg8[%c0_45, %c0_46], %52 {strides = array<i32>} : memref<288x72xbf16, #tpu.memory_space<vmem>>, vector<288x8xbf16>,
    %c6_47 = arith.constant 6 : index
    %c0_48 = arith.constant 0 : index
    %54 = vector.load %arg9[%c6_47, %c0_48] : memref<336x8xbf16, #tpu.memory_space<vmem>>, vector<288x8xbf16>
    %c0_49 = arith.constant 0 : index
    %c8_50 = arith.constant 8 : index
    %55 = vector.load %arg8[%c0_49, %c8_50] : memref<288x72xbf16, #tpu.memory_space<vmem>>, vector<288x8xbf16>
    tpu.vector_store %arg8[%c0_49, %c8_50], %54 {strides = array<i32>} : memref<288x72xbf16, #tpu.memory_space<vmem>>, vector<288x8xbf16>,
    %c7_51 = arith.constant 7 : index
    %c0_52 = arith.constant 0 : index
    %56 = vector.load %arg9[%c7_51, %c0_52] : memref<336x8xbf16, #tpu.memory_space<vmem>>, vector<288x8xbf16>
    %c0_53 = arith.constant 0 : index
    %c16_54 = arith.constant 16 : index
    %57 = vector.load %arg8[%c0_53, %c16_54] : memref<288x72xbf16, #tpu.memory_space<vmem>>, vector<288x8xbf16>
    tpu.vector_store %arg8[%c0_53, %c16_54], %56 {strides = array<i32>} : memref<288x72xbf16, #tpu.memory_space<vmem>>, vector<288x8xbf16>,
    %c23_55 = arith.constant 23 : index
    %c0_56 = arith.constant 0 : index
    %58 = vector.load %arg9[%c23_55, %c0_56] : memref<336x8xbf16, #tpu.memory_space<vmem>>, vector<288x8xbf16>
    %c0_57 = arith.constant 0 : index
    %c24_58 = arith.constant 24 : index
    %59 = vector.load %arg8[%c0_57, %c24_58] : memref<288x72xbf16, #tpu.memory_space<vmem>>, vector<288x8xbf16>
    tpu.vector_store %arg8[%c0_57, %c24_58], %58 {strides = array<i32>} : memref<288x72xbf16, #tpu.memory_space<vmem>>, vector<288x8xbf16>,
    %c24_59 = arith.constant 24 : index
    %c0_60 = arith.constant 0 : index
    %60 = vector.load %arg9[%c24_59, %c0_60] : memref<336x8xbf16, #tpu.memory_space<vmem>>, vector<288x8xbf16>
    %c0_61 = arith.constant 0 : index
    %c32_62 = arith.constant 32 : index
    %61 = vector.load %arg8[%c0_61, %c32_62] : memref<288x72xbf16, #tpu.memory_space<vmem>>, vector<288x8xbf16>
    tpu.vector_store %arg8[%c0_61, %c32_62], %60 {strides = array<i32>} : memref<288x72xbf16, #tpu.memory_space<vmem>>, vector<288x8xbf16>,
    %c25_63 = arith.constant 25 : index
    %c0_64 = arith.constant 0 : index
    %62 = vector.load %arg9[%c25_63, %c0_64] : memref<336x8xbf16, #tpu.memory_space<vmem>>, vector<288x8xbf16>
    %c0_65 = arith.constant 0 : index
    %c40_66 = arith.constant 40 : index
    %63 = vector.load %arg8[%c0_65, %c40_66] : memref<288x72xbf16, #tpu.memory_space<vmem>>, vector<288x8xbf16>
    tpu.vector_store %arg8[%c0_65, %c40_66], %62 {strides = array<i32>} : memref<288x72xbf16, #tpu.memory_space<vmem>>, vector<288x8xbf16>,
    %c41_67 = arith.constant 41 : index
    %c0_68 = arith.constant 0 : index
    %64 = vector.load %arg9[%c41_67, %c0_68] : memref<336x8xbf16, #tpu.memory_space<vmem>>, vector<288x8xbf16>
    %c0_69 = arith.constant 0 : index
    %c48_70 = arith.constant 48 : index
    %65 = vector.load %arg8[%c0_69, %c48_70] : memref<288x72xbf16, #tpu.memory_space<vmem>>, vector<288x8xbf16>
    tpu.vector_store %arg8[%c0_69, %c48_70], %64 {strides = array<i32>} : memref<288x72xbf16, #tpu.memory_space<vmem>>, vector<288x8xbf16>,
    %c42_71 = arith.constant 42 : index
    %c0_72 = arith.constant 0 : index
    %66 = vector.load %arg9[%c42_71, %c0_72] : memref<336x8xbf16, #tpu.memory_space<vmem>>, vector<288x8xbf16>
    %c0_73 = arith.constant 0 : index
    %c56_74 = arith.constant 56 : index
    %67 = vector.load %arg8[%c0_73, %c56_74] : memref<288x72xbf16, #tpu.memory_space<vmem>>, vector<288x8xbf16>
    tpu.vector_store %arg8[%c0_73, %c56_74], %66 {strides = array<i32>} : memref<288x72xbf16, #tpu.memory_space<vmem>>, vector<288x8xbf16>,
    %c43_75 = arith.constant 43 : index
    %c0_76 = arith.constant 0 : index
    %68 = vector.load %arg9[%c43_75, %c0_76] : memref<336x8xbf16, #tpu.memory_space<vmem>>, vector<288x8xbf16>
    %c0_77 = arith.constant 0 : index
    %c64_78 = arith.constant 64 : index
    %69 = vector.load %arg8[%c0_77, %c64_78] : memref<288x72xbf16, #tpu.memory_space<vmem>>, vector<288x8xbf16>
    tpu.vector_store %arg8[%c0_77, %c64_78], %68 {strides = array<i32>} : memref<288x72xbf16, #tpu.memory_space<vmem>>, vector<288x8xbf16>,
    %c0_79 = arith.constant 0 : index
    %c0_80 = arith.constant 0 : index
    %70 = vector.load %arg8[%c0_79, %c0_80] : memref<288x72xbf16, #tpu.memory_space<vmem>>, vector<288x72xbf16>
    %c0_81 = arith.constant 0 : index
    %c0_82 = arith.constant 0 : index
    %71 = vector.load %arg4[%c0_81, %c0_82] : memref<72x8xbf16, #tpu.memory_space<vmem>>, vector<72x8xbf16>
    %cst_83 = arith.constant dense<0.000000e+00> : vector<288x8xf32>
    %72 = tpu.matmul %70, %71, %cst_83 {dimension_numbers = #tpu.dot_dimension_numbers<[1], [0], [0], [1], [0, 0, 1, 1], [], []>} : vector<288x72xbf16>, vector<72x8xbf16>, vector<288x8xf32> -> vector<288x8xf32>
    %c0_84 = arith.constant 0 : index
    %c24_85 = arith.constant 24 : index
    %c0_86 = arith.constant 0 : index
    %73 = vector.load %arg1[%c0_84, %c24_85, %c0_86] : memref<1x336x8xf32, #tpu.memory_space<vmem>>, vector<1x288x8xf32>
    %74 = vector.shape_cast %73 : vector<1x288x8xf32> to vector<288x8xf32>
    %c0_87 = arith.constant 0 : index
    %c0_88 = arith.constant 0 : index
    %75 = vector.load %arg5[%c0_87, %c0_88] : memref<1x8xf32, #tpu.memory_space<vmem>>, vector<1x8xf32>
    %76 = vector.broadcast %75 : vector<1x8xf32> to vector<288x8xf32>
    %77 = arith.addf %72, %76 : vector<288x8xf32>
    %78 = arith.addf %77, %74 : vector<288x8xf32>
    %cst_89 = arith.constant 0.000000e+00 : f32
    %79 = vector.broadcast %cst_89 : f32 to vector<288x8xf32>
    %80 = arith.maximumf %78, %79 : vector<288x8xf32>
    %c0_90 = arith.constant 0 : index
    %c0_91 = arith.constant 0 : index
    %c0_92 = arith.constant 0 : index
    %81 = vector.load %arg6[%c0_90, %c0_91, %c0_92] : memref<1x288x8xf32, #tpu.memory_space<vmem>>, vector<1x288x8xf32>
    %82 = vector.shape_cast %81 : vector<1x288x8xf32> to vector<288x8xf32>
    %83 = vector.shape_cast %80 : vector<288x8xf32> to vector<1x288x8xf32>
    tpu.vector_store %arg6[%c0_90, %c0_91, %c0_92], %83 {strides = array<i32>} : memref<1x288x8xf32, #tpu.memory_space<vmem>>, vector<1x288x8xf32>,
    return
  }
  func.func @transform_0(%arg0: i32) -> (i32, i32, i32) {
    %c0_i32 = arith.constant 0 : i32
    %c0_i32_0 = arith.constant 0 : i32
    %c0_i32_1 = arith.constant 0 : i32
    return %arg0, %c0_i32, %c0_i32_0 : i32, i32, i32
  }
  func.func @transform_1(%arg0: i32) -> (i32, i32) {
    %c0_i32 = arith.constant 0 : i32
    %c0_i32_0 = arith.constant 0 : i32
    %c0_i32_1 = arith.constant 0 : i32
    return %c0_i32, %c0_i32_0 : i32, i32
  }
  func.func @transform_2(%arg0: i32) -> (i32, i32) {
    %c0_i32 = arith.constant 0 : i32
    %c0_i32_0 = arith.constant 0 : i32
    %c0_i32_1 = arith.constant 0 : i32
    return %c0_i32, %c0_i32_0 : i32, i32
  }
  func.func @transform_3(%arg0: i32) -> (i32, i32) {
    %c0_i32 = arith.constant 0 : i32
    %c0_i32_0 = arith.constant 0 : i32
    %c0_i32_1 = arith.constant 0 : i32
    return %c0_i32, %c0_i32_0 : i32, i32
  }
  func.func @transform_4(%arg0: i32) -> (i32, i32) {
    %c0_i32 = arith.constant 0 : i32
    %c0_i32_0 = arith.constant 0 : i32
    %c0_i32_1 = arith.constant 0 : i32
    return %c0_i32, %c0_i32_0 : i32, i32
  }
  func.func @transform_5(%arg0: i32) -> (i32, i32, i32) {
    %c0_i32 = arith.constant 0 : i32
    %c0_i32_0 = arith.constant 0 : i32
    %c0_i32_1 = arith.constant 0 : i32
    return %arg0, %c0_i32, %c0_i32_0 : i32, i32, i32
  }
}

</mosaic_0001>

<bundles_post_ra>
// kernel: basic_block_forward.1
= control target key start
LH: loop header
LB: loop body
LE: loop exit
PB: predicated region body
PF: predicated region fallthrough
CT: control target
= control target key end

     0   :  { %s5882_s18 = smov 0   ;;  %s8850_s0 = inlined_call_operand.vmem [shape: f32[4,336,8], index: 0, kind: input, shape index: {}]   ;;  %s8851_s1 = inlined_call_operand.vmem [shape: bf16[72,8], index: 1, kind: input, shape index: {}]   ;;  %s8852_s2 = inlined_call_operand.vmem [shape: f32[1,8], index: 2, kind: input, shape index: {}]   ;;  %s8853_s3 = inlined_call_operand.vmem [shape: bf16[72,8], index: 3, kind: input, shape index: {}]   ;;  %s8854_s4 = inlined_call_operand.vmem [shape: f32[1,8], index: 4, kind: input, shape index: {}]   ;;  %s8855_s5 = inlined_call_operand.vmem [shape: f32[4,288,8], index: 5, kind: output, shape index: {}]  }
   0x1 LB: > { %s5607_s19 = sadd.s32 4294967295, %s5841_s18   ;;  %p5611_p0 = scmp.ge.s32.totalorder %s5841_s18, 1  ;;  %s5841_s18 = sphi %s5882_s18, %s15_s18  }
   0x2   : > { %p187_p1 = scmp.lt.s32.totalorder %s5841_s18, 5 }
   0x4   : > { %p188_p2 = pnand %p5611_p0, %p187_p1 }
   0x5   : > { %p215_p3 = scmp.lt.s32.totalorder (!%p188_p2), %s5607_s19, 3  ;;  %vm578_vm0 = vcmask (!%p188_p2), 64512   ;;  %vm1538_vm1 = vcmask (!%p188_p2), 1043456   ;;  %vm864_vm2 = vcmask (!%p188_p2), 1044480   ;;  %vm8862_vm3 = vcmask (!%p188_p2), 1042432   ;;  %s5843_s24 = smov (!%p188_p2), 32  }
   0x6   : > { %191 = sbr.rel (%p188_p2) target bundleno = 1082 (0x43a), region = 40  ;;  %vm994_vm4 = vsmask.f32 (!%p188_p2), 4352  ;;  %s5844_s25 = smov (!%p188_p2), 8   ;;  %vm8856_vm5 = vsmask.f32 (!%p188_p2), 3328 }
   0x7   : > { %s5845_s26 = smov (!%p188_p2), 56   ;;  %s5846_s29 = smov (!%p188_p2), 16   ;;  %vm8861_vm6 = vsmask.f32 (!%p188_p2), 2304  ;;  %vm8860_vm7 = vsmask.f32 (!%p188_p2), 5376 }
   0x8   : > { %s5847_s9 = smov (!%p188_p2), 24   ;;  %s5848_s12 = smov (!%p188_p2), 40   ;;  %vm956_vm8 = vcmask (!%p188_p2), 130112   ;;  %vm1219_vm9 = vcmask (!%p188_p2), 195712   ;;  %vm1481_vm10 = vcmask (!%p188_p2), 261312   ;;  %vm1630_vm11 = vcmask (!%p188_p2), 326912  }
   0x9   : > { %s5849_s15 = smov (!%p188_p2), 48   ;;  %s5850_s16 = smov (!%p188_p2), 64   ;;  %vm8858_vm12 = vcmask (!%p188_p2), 392512   ;;  %vm8857_vm13 = vcmask (!%p188_p2), 458112   ;;  %vm2304_vm14 = vcmask (!%p188_p2), 523712   ;;  %vm8863_vm15 = vcmask (!%p188_p2), 589312  }
   0xd   : > { %s9015_s19 = smov (!%p215_p3, %s5607_s19), 3 }
   0xe   : > { %s5804_s20 = smul.u32 336, %s9015_s19 }
  0x10   : > { %s5896_s23 = scalar_lea.vmem %s8850_s0, %s5804_s20 }
  0x11   : > { %v519_v0 = vld [vmem:[%s5896_s23 + $0x20] sm:$0xff]  ;;  %v520_v1 = vld [vmem:[%s5896_s23 + $0x28] sm:$0xff]  ;;  %v521_v2 = vld [vmem:[%s5896_s23 + $0x30] sm:$0xff] }
  0x12   : > { %v522_v3 = vld [vmem:[%s5896_s23 + $0x38] sm:$0xff]  ;;  %v559_v4 = vpack.c.bf16 %v520_v1, %v519_v0  ;;  %v515_v5 = vld [vmem:[%s5896_s23] sm:$0xff]  ;;  %v516_v6 = vld [vmem:[%s5896_s23 + $0x8] sm:$0xff] }
  0x13   : > { %v560_v7 = vpack.c.bf16 %v522_v3, %v521_v2  ;;  %v517_v8 = vld [vmem:[%s5896_s23 + $0x10] sm:$0xff]  ;;  %v518_v9 = vld [vmem:[%s5896_s23 + $0x18] sm:$0xff]  ;;  %v557_v10 = vpack.c.bf16 %v516_v6, %v515_v5  ;;  %v523_v11 = vld [vmem:[%s5896_s23 + $0x40] sm:$0xff] }
  0x14   : > { %581 = vst.msk [vmem:[#allocation2 + $0x10] sm:$0xff] %vm578_vm0, %v559_v4  ;;  %v558_v12 = vpack.c.bf16 %v518_v9, %v517_v8  ;;  %v524_v13 = vld [vmem:[%s5896_s23 + $0x48] sm:$0xff]  ;;  %v525_v14 = vld [vmem:[%s5896_s23 + $0x50] sm:$0xff]  ;;  %v526_v15 = vld [vmem:[%s5896_s23 + $0x58] sm:$0xff] }
  0x15   : > { %582 = vst.msk [vmem:[#allocation2 + $0x18] sm:$0xff] %vm578_vm0, %v560_v7  ;;  %579 = vst.msk [vmem:[#allocation2] sm:$0xff] %vm578_vm0, %v557_v10  ;;  %v561_v16 = vpack.c.bf16 %v524_v13, %v523_v11  ;;  %v562_v17 = vpack.c.bf16 %v526_v15, %v525_v14  ;;  %v527_v18 = vld [vmem:[%s5896_s23 + $0x60] sm:$0xff]  ;;  %v528_v19 = vld [vmem:[%s5896_s23 + $0x68] sm:$0xff] }
  0x16   : > { %v529_v20 = vld [vmem:[%s5896_s23 + $0x70] sm:$0xff]  ;;  %580 = vst.msk [vmem:[#allocation2 + $0x8] sm:$0xff] %vm578_vm0, %v558_v12  ;;  %v563_v21 = vpack.c.bf16 %v528_v19, %v527_v18  ;;  %v530_v22 = vld [vmem:[%s5896_s23 + $0x78] sm:$0xff]  ;;  %v531_v23 = vld [vmem:[%s5896_s23 + $0x80] sm:$0xff] }
  0x17   : > { %v532_v24 = vld [vmem:[%s5896_s23 + $0x88] sm:$0xff]  ;;  %583 = vst.msk [vmem:[#allocation2 + $0x20] sm:$0xff] %vm578_vm0, %v561_v16  ;;  %584 = vst.msk [vmem:[#allocation2 + $0x28] sm:$0xff] %vm578_vm0, %v562_v17  ;;  %v564_v25 = vpack.c.bf16 %v530_v22, %v529_v20  ;;  %v533_v27 = vld [vmem:[%s5896_s23 + $0x90] sm:$0xff] }
  0x18   : > { %v565_v26 = vpack.c.bf16 %v532_v24, %v531_v23  ;;  %v534_v28 = vld [vmem:[%s5896_s23 + $0x98] sm:$0xff]  ;;  %v535_v29 = vld [vmem:[%s5896_s23 + $0xa0] sm:$0xff]  ;;  %585 = vst.msk [vmem:[#allocation2 + $0x30] sm:$0xff] %vm578_vm0, %v563_v21  ;;  %v536_v31 = vld [vmem:[%s5896_s23 + $0xa8] sm:$0xff] }
  0x19   : > { %v566_v30 = vpack.c.bf16 %v534_v28, %v533_v27  ;;  %v537_v32 = vld [vmem:[%s5896_s23 + $0xb0] sm:$0xff]  ;;  %v538_v33 = vld [vmem:[%s5896_s23 + $0xb8] sm:$0xff]  ;;  %586 = vst.msk [vmem:[#allocation2 + $0x38] sm:$0xff] %vm578_vm0, %v564_v25  ;;  %v567_v34 = vpack.c.bf16 %v536_v31, %v535_v29  ;;  %v5823_v20 = vld [vmem:[%s8851_s1] sm:$0xff]  }
  0x1a   : > { %587 = vst.msk [vmem:[#allocation2 + $0x40] sm:$0xff] %vm578_vm0, %v565_v26  ;;  %v568_v35 = vpack.c.bf16 %v538_v33, %v537_v32  ;;  %5710 = vmatprep.subr.bf16.mxu0 %v5823_v20 }
  0x1b   : > { %588 = vst.msk [vmem:[#allocation2 + $0x48] sm:$0xff] %vm578_vm0, %v566_v30  ;;  %v5932_v36 = vld [vmem:[#allocation2 + $0x10] sm:$0xff]  ;;  %589 = vst.msk [vmem:[#allocation2 + $0x50] sm:$0xff] %vm578_vm0, %v567_v34  ;;  %5711 = vmatpush3.bf16.msra.mxu0 %v5823_v20 }
  0x1c   : > { %590 = vst.msk [vmem:[#allocation2 + $0x58] sm:$0xff] %vm578_vm0, %v568_v35  ;;  %v5936_v37 = vld [vmem:[#allocation2 + $0x18] sm:$0xff]  ;;  %v1540_v38 = vrot.slane %v5932_v36, 4  ;;  %v826_v39 = vld [vmem:[#allocation2] sm:$0xf8]  ;;  %v868_v40 = vrot.slane %v5932_v36, 3 }
  0x1d   : > { %v5941_v41 = vshrl.u32 %v5932_v36, 16  ;;  %v1542_v42 = vrot.slane %v5936_v37, 4  ;;  %v5944_v43 = vld [vmem:[#allocation2 + $0x8] sm:$0xff]  ;;  %v865_v44 = vrot.slane %v826_v39, 3  ;;  %v2214_v45 = vrot.slane %v5936_v37, 5 }
  0x1e   : > { %v975_v46 = vld [vmem:[#allocation2] sm:$0xf8]  ;;  %v866_v47 = vrot.slane %v5944_v43, 3  ;;  %v1004_v51 = vshrl.u32 %v5944_v43, 16  ;;  %v1007_v54 = vshll.u32 %v5944_v43, 16  ;;  %v5973_v3 = vshll.u32 %v5932_v36, 16 }
  0x1f   : > { %v5948_v48 = vld [vmem:[#allocation2 + $0x20] sm:$0xff]  ;;  %v996_v49 = vshrl.u32 %v975_v46, 16  ;;  %v999_v50 = vshll.u32 %v975_v46, 16  ;;  %v1543_v52 = vsel %vm1538_vm1, %v1540_v38, %v1542_v42  ;;  %v1500_v55 = vld [vmem:[#allocation2 + $0x8] sm:$0xf0]  ;;  %v1015_v59 = vrot.slane %v5941_v41, 3 }
  0x20   : > { %v2216_v53 = vrot.slane %v5948_v48, 5  ;;  %1578 = vrot.lane.b32.xlu1 %v1543_v52, %s5843_s24  ;;  %v867_v56 = vsel %vm864_vm2, %v865_v44, %v866_v47  ;;  %v1238_v60 = vld [vmem:[#allocation2 + $0x8] sm:$0xf8]  ;;  %v869_v62 = vsel %vm864_vm2, %v866_v47, %v868_v40  ;;  %v1006_v63 = vrot.slane %v1004_v51, 3  ;;  %v2174_v4 = vld [vmem:[#allocation2 + $0x10] sm:$0xe0] }
  0x21   : > { %v998_v57 = vrot.slane %v996_v49, 3  ;;  %v1001_v58 = vrot.slane %v999_v50, 4  ;;  %902 = vrot.lane.b32.xlu0 %v867_v56, %s5844_s25  ;;  %v1009_v0 = vrot.slane %v1007_v54, 4  ;;  %v1539_v2 = vrot.slane %v1500_v55, 4  ;;  %v1649_v12 = vld [vmem:[#allocation2 + $0x8] sm:$0xf0] }
  0x22   : > { %v2217_v61 = vsel %vm8862_vm3, %v2214_v45, %v2216_v53  ;;  %v5976_v5 = vshrl.u32 %v5936_v37, 16  ;;  %v5979_v7 = vshll.u32 %v5936_v37, 16  ;;  %v1258_v8 = vshrl.u32 %v1238_v60, 16  ;;  %v1912_v28 = vld [vmem:[#allocation2 + $0x10] sm:$0xf0]  ;;  %v5824_v39 = vld [vmem:[%s8851_s1 + $0x8] sm:$0xff]  }
  0x23   : > { %v1002_v1 = vor.u32 %v1001_v58, %v998_v57  ;;  %v1010_v6 = vor.u32 %v1009_v0, %v1006_v63  ;;  %v1018_v9 = vrot.slane %v5973_v3, 4  ;;  %v1261_v11 = vshll.u32 %v1238_v60, 16  ;;  %5712 = vmatprep.subr.bf16.mxu0 %v5824_v39 }
  0x24   : > { %2252 = vrot.lane.b32.xlu1 %v2217_v61, %s5845_s26  ;;  %v1277_v10 = vrot.slane %v5976_v5, 3  ;;  %v2213_v14 = vrot.slane %v2174_v4, 5  ;;  %v1280_v15 = vrot.slane %v5979_v7, 4  ;;  %v1541_v16 = vsel %vm1538_vm1, %v1539_v2, %v1540_v38  ;;  %v2323_v38 = vld [vmem:[#allocation2 + $0x10] sm:$0xe0]  ;;  %5713 = vmatpush3.bf16.msra.mxu0 %v5824_v39 }
  0x25   : > { %904 = vrot.lane.b32.xlu0 %v869_v62, %s5844_s25  ;;  %v1011_v13 = vsel %vm994_vm4, %v1002_v1, %v1010_v6  ;;  %v1019_v17 = vor.u32 %v1018_v9, %v1015_v59  ;;  %v1260_v18 = vrot.slane %v1258_v8, 3  ;;  %v1263_v19 = vrot.slane %v1261_v11, 4  ;;  %v5825_v61 = vld [vmem:[%s8851_s1 + $0x10] sm:$0xff]   ;;  %v5826_v9 = vld [vmem:[%s8851_s1 + $0x18] sm:$0xff]  }
  0x26   : > { %v1680_v21 = vrot.slane %v5941_v41, 4  ;;  %v1683_v22 = vrot.slane %v5973_v3, 5  ;;  %v1670_v23 = vshrl.u32 %v1649_v12, 16  ;;  %v1673_v24 = vshll.u32 %v1649_v12, 16  ;;  %5714 = vmatprep.subr.bf16.mxu0 %v5825_v61 }
  0x27   : > { %v5994_v25 = vor.u32 %v1280_v15, %v1277_v10  ;;  %v1689_v26 = vrot.slane %v5976_v5, 4  ;;  %v1692_v27 = vrot.slane %v5979_v7, 5  ;;  %v1020_v29 = vsel %vm994_vm4, %v1010_v6, %v1019_v17  ;;  %v6044_v15 = vld [vmem:[#allocation2 + $0x28] sm:$0xff] }
  0x28   : > { %1165 = vrot.lane.b32.xlu1 %v1011_v13, %s5846_s29  ;;  %v1672_v30 = vrot.slane %v1670_v23, 4  ;;  %v1675_v31 = vrot.slane %v1673_v24, 5  ;;  %v2215_v32 = vsel %vm8862_vm3, %v2213_v14, %v2214_v45  ;;  %v1264_v33 = vor.u32 %v1263_v19, %v1260_v18  ;;  %5715 = vmatpush3.bf16.msra.mxu0 %v5825_v61 }
  0x29   : > { %1576 = vrot.lane.b32.xlu0 %v1541_v16, %s5843_s24  ;;  %v6004_v34 = vshrl.u32 %v5948_v48, 16  ;;  %v6007_v35 = vshll.u32 %v5948_v48, 16  ;;  %v1684_v44 = vor.u32 %v1683_v22, %v1680_v21  ;;  %v1932_v46 = vshrl.u32 %v1912_v28, 16  ;;  %5716 = vmatprep.subr.bf16.mxu0 %v5826_v9  ;;  %v6049_v16 = vld [vmem:[%s8851_s1 + $0x20] ss:$0 sps:$4 sm:$0xff]  }
  0x2a   : > { %v1935_v47 = vshll.u32 %v1912_v28, 16  ;;  %v6015_v45 = vsel %vm994_vm4, %v1019_v17, %v5994_v25  ;;  %v1693_v49 = vor.u32 %v1692_v27, %v1689_v26  ;;  %v1676_v50 = vor.u32 %v1675_v31, %v1672_v30  ;;  %v6079_v31 = vld [vmem:[#allocation2 + $0x30] sm:$0xff] }
  0x2b   : > { %v1951_v52 = vrot.slane %v6004_v34, 4  ;;  %v1954_v55 = vrot.slane %v6007_v35, 5  ;;  %v2344_v56 = vshrl.u32 %v2323_v38, 16  ;;  %v1273_v57 = vsel %vm994_vm4, %v1264_v33, %v1019_v17 }
  0x2c   : > { %1167 = vrot.lane.b32.xlu1 %v1020_v29, %s5846_s29  ;;  %v1934_v58 = vrot.slane %v1932_v46, 4  ;;  %v1937_v59 = vrot.slane %v1935_v47, 5  ;;  %v2347_v60 = vshll.u32 %v2323_v38, 16  ;;  %v1694_v62 = vsel %vm8856_vm5, %v1684_v44, %v1693_v49  ;;  %5717 = vmatpush3.bf16.msra.mxu0 %v5826_v9 }
  0x2d   : > { %2250 = vrot.lane.b32.xlu0 %v2215_v32, %s5845_s26  ;;  %v1685_v63 = vsel %vm8856_vm5, %v1676_v50, %v1684_v44  ;;  %v6029_v0 = vor.u32 %v1954_v55, %v1951_v52  ;;  %v2346_v1 = vrot.slane %v2344_v56, 5  ;;  %v2354_v6 = vrot.slane %v5976_v5, 5  ;;  %5802 = vmatprep.subr.msk.bf16.mxu0 %vm1538_vm1, %v6049_v16  ;;  %v600_v55 = vld [vmem:[#allocation2] sm:$0xfc] }
  0x2e   : > { %v1938_v2 = vor.u32 %v1937_v59, %v1934_v58  ;;  %v2349_v4 = vrot.slane %v2347_v60, 6  ;;  %v2357_v8 = vrot.slane %v5979_v7, 6  ;;  %v870_v10 = vrot.slane %v5936_v37, 3 }
  0x2f   : > { %v1956_v11 = vsel %vm8856_vm5, %v1693_v49, %v6029_v0  ;;  %v2363_v12 = vrot.slane %v6004_v34, 5  ;;  %v2366_v14 = vrot.slane %v6007_v35, 6  ;;  %v872_v18 = vrot.slane %v5948_v48, 3 }
  0x30   : > { %1429 = vrot.lane.b32.xlu1 %v6015_v45, %s5847_s9  ;;  %v1947_v5 = vsel %vm8856_vm5, %v1938_v2, %v1693_v49  ;;  %v2350_v7 = vor.u32 %v2349_v4, %v2346_v1  ;;  %v2358_v13 = vor.u32 %v2357_v8, %v2354_v6  ;;  %v871_v17 = vsel %vm864_vm2, %v868_v40, %v870_v10 }
  0x31   : > { %1427 = vrot.lane.b32.xlu0 %v1273_v57, %s5847_s9  ;;  %v1033_v19 = vrot.slane %v6004_v34, 3  ;;  %v1036_v20 = vrot.slane %v6007_v35, 4  ;;  %v1293_v21 = vshrl.u32 %v6044_v15, 16  ;;  %v1296_v22 = vshll.u32 %v6044_v15, 16 }
  0x32   : > { %v2359_v23 = vsel %vm8861_vm6, %v2350_v7, %v2358_v13  ;;  %v6064_v36 = vor.u32 %v2366_v14, %v2363_v12  ;;  %v873_v40 = vsel %vm864_vm2, %v870_v10, %v872_v18  ;;  %v1544_v32 = vrot.slane %v5948_v48, 4 }
  0x33   : > { %v1037_v24 = vor.u32 %v1036_v20, %v1033_v19  ;;  %v1295_v26 = vrot.slane %v1293_v21, 3  ;;  %v1298_v27 = vrot.slane %v1296_v22, 4  ;;  %v1546_v33 = vrot.slane %v6044_v15, 4 }
  0x34   : > { %1841 = vrot.lane.b32.xlu1 %v1694_v62, %s5848_s12  ;;  %v2368_v28 = vsel %vm8861_vm6, %v2358_v13, %v6064_v36  ;;  %v1707_v34 = vrot.slane %v1293_v21, 4  ;;  %v1710_v38 = vrot.slane %v1296_v22, 5  ;;  %v1970_v39 = vshll.u32 %v6079_v31, 16 }
  0x35   : > { %1839 = vrot.lane.b32.xlu0 %v1685_v63, %s5848_s12  ;;  %v1038_v29 = vsel %vm994_vm4, %v5994_v25, %v1037_v24  ;;  %v6077_v30 = vor.u32 %v1298_v27, %v1295_v26  ;;  %v1967_v25 = vshrl.u32 %v6079_v31, 16  ;;  %v1547_v44 = vsel %vm1538_vm1, %v1544_v32, %v1546_v33  ;;  %v6168_v27 = vld [vmem:[#allocation2 + $0x40] sm:$0xff] }
  0x36   : > { %v1711_v46 = vor.u32 %v1710_v38, %v1707_v34  ;;  %v1545_v49 = vsel %vm1538_vm1, %v1542_v42, %v1544_v32  ;;  %v2218_v56 = vrot.slane %v6044_v15, 5  ;;  %v631_v57 = vrot.slane %v1004_v51, 2 }
  0x37   : > { %v6088_v35 = vsel %vm994_vm4, %v1037_v24, %v6077_v30  ;;  %v1969_v47 = vrot.slane %v1967_v25, 4  ;;  %v634_v37 = vrot.slane %v1007_v54, 3  ;;  %v2220_v58 = vrot.slane %v6079_v31, 5 }
  0x38   : > { %2103 = vrot.lane.b32.xlu1 %v1956_v11, %s5849_s15  ;;  %v1712_v50 = vsel %vm8856_vm5, %v6029_v0, %v1711_v46  ;;  %v621_v59 = vshrl.u32 %v600_v55, 16  ;;  %v624_v60 = vshll.u32 %v600_v55, 16  ;;  %v2372_v61 = vrot.slane %v1293_v21, 5 }
  0x39   : > { %2101 = vrot.lane.b32.xlu0 %v1947_v5, %s5849_s15  ;;  %v2375_v62 = vrot.slane %v1296_v22, 6  ;;  %v635_v63 = vor.u32 %v634_v37, %v631_v57  ;;  %v874_v43 = vrot.slane %v6044_v15, 3  ;;  %v640_v51 = vrot.slane %v5941_v41, 2 }
  0x3a   : > { %v623_v0 = vrot.slane %v621_v59, 2  ;;  %v626_v1 = vrot.slane %v624_v60, 3  ;;  %v2221_v54 = vsel %vm8862_vm3, %v2218_v56, %v2220_v58  ;;  %v643_v4 = vrot.slane %v5973_v3, 3 }
  0x3b   : > { %v2219_v6 = vsel %vm8862_vm3, %v2216_v53, %v2218_v56  ;;  %v2376_v8 = vor.u32 %v2375_v62, %v2372_v61  ;;  %v2381_v9 = vrot.slane %v1967_v25, 5  ;;  %v2384_v10 = vrot.slane %v1970_v39, 6  ;;  %v541_v61 = vld [vmem:[%s5896_s23 + $0xd0] sm:$0xff] }
  0x3c   : > { %906 = vrot.lane.b32.xlu1 %v871_v17, %s5844_s25  ;;  %v627_v2 = vor.u32 %v626_v1, %v623_v0  ;;  %v644_v12 = vor.u32 %v643_v4, %v640_v51  ;;  %v875_v5 = vsel %vm864_vm2, %v872_v18, %v874_v43  ;;  %v876_v3 = vrot.slane %v6079_v31, 3  ;;  %v605_v0 = vld [vmem:[#allocation2 + $0x28] sm:$0xff] }
  0x3d   : > { %2513 = vrot.lane.b32.xlu0 %v2359_v23, %s5850_s16  ;;  %v1051_v7 = vrot.slane %v1967_v25, 3  ;;  %v1054_v53 = vrot.slane %v1970_v39, 4  ;;  %v2377_v48 = vsel %vm8861_vm6, %v6064_v36, %v2376_v8  ;;  %v6150_v18 = vor.u32 %v2384_v10, %v2381_v9  ;;  %v603_v36 = vld [vmem:[#allocation2 + $0x18] sm:$0xff] }
  0x3e   : > { %v636_v41 = vsel %vm8860_vm7, %v627_v2, %v635_v63  ;;  %v645_v17 = vsel %vm8860_vm7, %v635_v63, %v644_v12  ;;  %v877_v19 = vsel %vm864_vm2, %v874_v43, %v876_v3  ;;  %v1548_v32 = vrot.slane %v6079_v31, 4  ;;  %v542_v63 = vld [vmem:[%s5896_s23 + $0xd8] sm:$0xff]  ;;  %v545_v2 = vld [vmem:[%s5896_s23 + $0xf0] sm:$0xff] }
  0x3f   : > { %808 = vst.msk [vmem:[#allocation3] sm:$0xff] %vm578_vm0, %v636_v41  ;;  %809 = vst.msk [vmem:[#allocation3 + $0x8] sm:$0xff] %vm578_vm0, %v645_v17  ;;  %v1055_v20 = vor.u32 %v1054_v53, %v1051_v7  ;;  %v2386_v23 = vsel %vm8861_vm6, %v2376_v8, %v6150_v18  ;;  %v2704_v60 = vsel %vm1538_vm1, %v6049_v16, 0  ;;  %v606_v16 = vld [vmem:[#allocation2 + $0x30] sm:$0xff]  ;;  %v548_v8 = vld [vmem:[%s5896_s23 + $0x108] sm:$0xff]  ;;  %v570_v41 = vpack.c.bf16 %v542_v63, %v541_v61 }
  0x40   : > { %908 = vrot.lane.b32.xlu1 %v873_v40, %s5844_s25  ;;  %v604_v40 = vld [vmem:[#allocation2 + $0x20] sm:$0xff]  ;;  %5719 = vmatpush3.bf16.msra.mxu0 %v2704_v60  ;;  %v1549_v1 = vsel %vm1538_vm1, %v1546_v33, %v1548_v32  ;;  %v546_v33 = vld [vmem:[%s5896_s23 + $0xf8] sm:$0xff]  ;;  %v674_v7 = vshrl.u32 %v606_v16, 16  ;;  %v677_v53 = vshll.u32 %v606_v16, 16 }
  0x41   : > { %2515 = vrot.lane.b32.xlu0 %v2368_v28, %s5850_s16  ;;  %v1056_v24 = vsel %vm994_vm4, %v6077_v30, %v1055_v20  ;;  %v647_v28 = vshrl.u32 %v603_v36, 16  ;;  %v656_v38 = vshrl.u32 %v604_v40, 16  ;;  %v659_v25 = vshll.u32 %v604_v40, 16  ;;  %592 = vst.msk [vmem:[#allocation2 + $0x68] sm:$0xff] %vm578_vm0, %v570_v41 }
  0x43   : > { %v649_v30 = vrot.slane %v647_v28, 2  ;;  %v658_v55 = vrot.slane %v656_v38, 2  ;;  %v661_v56 = vrot.slane %v659_v25, 3  ;;  %v2224_v25 = vrot.slane %v6168_v27, 5 }
  0x44   : > { %1171 = vrot.lane.b32.xlu1 %v1038_v29, %s5846_s29 }
  0x45   : > { %1169 = vrot.lane.b32.xlu0 %v6015_v45, %s5846_s29  ;;  %v1972_v45 = vrot.slane %v1970_v39, 5  ;;  %v539_v39 = vld [vmem:[%s5896_s23 + $0xc0] sm:$0xff]  ;;  %v662_v62 = vor.u32 %v661_v56, %v658_v55  ;;  %v607_v55 = vld [vmem:[#allocation2 + $0x38] sm:$0xff] }
  0x46   : > { %v686_v63 = vshll.u32 %v607_v55, 16 }
  0x47   : > { %v6105_v52 = vor.u32 %v1972_v45, %v1969_v47 }
  0x48   : > { %1433 = vrot.lane.b32.xlu1 %v6088_v35, %s5847_s9 }
  0x49   : > { %1431 = vrot.lane.b32.xlu0 %v1038_v29, %s5847_s9  ;;  %v6116_v42 = vsel %vm8856_vm5, %v1711_v46, %v6105_v52  ;;  %v650_v29 = vshll.u32 %v603_v36, 16 }
  0x4b   : > { %v652_v45 = vrot.slane %v650_v29, 3 }
  0x4c   : > { %1582 = vrot.lane.b32.xlu1 %v1547_v44, %s5843_s24  ;;  %v540_v44 = vld [vmem:[%s5896_s23 + $0xc8] sm:$0xff] }
  0x4d   : > { %1580 = vrot.lane.b32.xlu0 %v1545_v49, %s5843_s24  ;;  %v6178_v49 = vshrl.u32 %v6168_v27, 16  ;;  %v653_v37 = vor.u32 %v652_v45, %v649_v30  ;;  %v569_v59 = vpack.c.bf16 %v540_v44, %v539_v39  ;;  %v6252_v45 = vld [vmem:[#allocation2 + $0x48] sm:$0xff] }
  0x4e   : > { %v6263_v60 = vshrl.u32 %v6252_v45, 16  ;;  %v6266_v61 = vshll.u32 %v6252_v45, 16 }
  0x4f   : > { %v654_v51 = vsel %vm8860_vm7, %v644_v12, %v653_v37  ;;  %591 = vst.msk [vmem:[#allocation2 + $0x60] sm:$0xff] %vm578_vm0, %v569_v59  ;;  %v663_v15 = vsel %vm8860_vm7, %v653_v37, %v662_v62  ;;  %v1987_v9 = vrot.slane %v6178_v49, 4  ;;  %v665_v12 = vshrl.u32 %v605_v0, 16 }
  0x50   : > { %1845 = vrot.lane.b32.xlu1 %v1712_v50, %s5848_s12  ;;  %810 = vst.msk [vmem:[#allocation3 + $0x10] sm:$0xff] %vm578_vm0, %v654_v51  ;;  %811 = vst.msk [vmem:[#allocation3 + $0x18] sm:$0xff] %vm578_vm0, %v663_v15  ;;  %v880_v37 = vrot.slane %v6168_v27, 3  ;;  %v1552_v15 = vrot.slane %v6168_v27, 4 }
  0x51   : > { %1843 = vrot.lane.b32.xlu0 %v1956_v11, %s5848_s12  ;;  %v6131_v11 = vld [vmem:[#allocation2 + $0x38] sm:$0xff] }
  0x52   : > { %v6142_v13 = vshrl.u32 %v6131_v11, 16  ;;  %v6145_v14 = vshll.u32 %v6131_v11, 16  ;;  %v1550_v34 = vrot.slane %v6131_v11, 4  ;;  %v2222_v38 = vrot.slane %v6131_v11, 5 }
  0x54   : > { %2107 = vrot.lane.b32.xlu1 %v6116_v42, %s5849_s15  ;;  %v1313_v21 = vrot.slane %v6142_v13, 3  ;;  %v1316_v22 = vrot.slane %v6145_v14, 4  ;;  %v1725_v46 = vrot.slane %v6142_v13, 4  ;;  %v1728_v47 = vrot.slane %v6145_v14, 5 }
  0x55   : > { %2105 = vrot.lane.b32.xlu0 %v1712_v50, %s5849_s15  ;;  %v6181_v50 = vshll.u32 %v6168_v27, 16  ;;  %v1551_v43 = vsel %vm1538_vm1, %v1548_v32, %v1550_v34  ;;  %v2390_v39 = vrot.slane %v6142_v13, 5  ;;  %v2393_v44 = vrot.slane %v6145_v14, 6 }
  0x56   : > { %v6166_v26 = vor.u32 %v1316_v22, %v1313_v21  ;;  %v1729_v4 = vor.u32 %v1728_v47, %v1725_v46  ;;  %v676_v22 = vrot.slane %v674_v7, 2  ;;  %v2225_v46 = vsel %vm8862_vm3, %v2222_v38, %v2224_v25 }
  0x57   : > { %v1990_v10 = vrot.slane %v6181_v50, 5  ;;  %v2223_v47 = vsel %vm8862_vm3, %v2220_v58, %v2222_v38  ;;  %v2394_v30 = vor.u32 %v2393_v44, %v2390_v39  ;;  %v2399_v13 = vrot.slane %v6178_v49, 5  ;;  %v551_v38 = vld [vmem:[%s5896_s23 + $0x120] sm:$0xff]  ;;  %v552_v39 = vld [vmem:[%s5896_s23 + $0x128] sm:$0xff] }
  0x58   : > { %2256 = vrot.lane.b32.xlu1 %v2221_v54, %s5845_s26  ;;  %v6187_v57 = vsel %vm994_vm4, %v1055_v20, %v6166_v26  ;;  %v544_v54 = vld [vmem:[%s5896_s23 + $0xe8] sm:$0xff]  ;;  %v1730_v36 = vsel %vm8856_vm5, %v6105_v52, %v1729_v4  ;;  %v2402_v14 = vrot.slane %v6181_v50, 6  ;;  %v1069_v58 = vrot.slane %v6178_v49, 3 }
  0x59   : > { %2254 = vrot.lane.b32.xlu0 %v2219_v6, %s5845_s26  ;;  %v547_v6 = vld [vmem:[%s5896_s23 + $0x100] sm:$0xff]  ;;  %v6221_v40 = vor.u32 %v1990_v10, %v1987_v9  ;;  %v1072_v59 = vrot.slane %v6181_v50, 4 }
  0x5a   : > { %v573_v20 = vpack.c.bf16 %v548_v8, %v547_v6  ;;  %v6270_v31 = vor.u32 %v2402_v14, %v2399_v13  ;;  %v1743_v6 = vrot.slane %v6263_v60, 4  ;;  %v1746_v8 = vrot.slane %v6266_v61, 5 }
  0x5b   : > { %v6232_v52 = vsel %vm8856_vm5, %v1729_v4, %v6221_v40  ;;  %v1073_v50 = vor.u32 %v1072_v59, %v1069_v58  ;;  %v608_v4 = vld [vmem:[#allocation2 + $0x40] sm:$0xff]  ;;  %v575_v59 = vpack.c.bf16 %v552_v39, %v551_v38  ;;  %v556_v38 = vld [vmem:[%s5896_s23 + $0x148] sm:$0xff] }
  0x5c   : > { %910 = vrot.lane.b32.xlu1 %v875_v5, %s5844_s25  ;;  %v668_v5 = vshll.u32 %v605_v0, 16  ;;  %595 = vst.msk [vmem:[#allocation2 + $0x80] sm:$0xff] %vm578_vm0, %v573_v20  ;;  %v1331_v0 = vrot.slane %v6263_v60, 3 }
  0x5d   : > { %2517 = vrot.lane.b32.xlu0 %v2377_v48, %s5850_s16  ;;  %v667_v48 = vrot.slane %v665_v12, 2  ;;  %v1074_v51 = vsel %vm994_vm4, %v6166_v26, %v1073_v50  ;;  %v692_v12 = vshrl.u32 %v608_v4, 16  ;;  %597 = vst.msk [vmem:[#allocation2 + $0x90] sm:$0xff] %vm578_vm0, %v575_v59 }
  0x5e   : > { %v670_v21 = vrot.slane %v668_v5, 3  ;;  %v695_v5 = vshll.u32 %v608_v4, 16 }
  0x5f   : > { %v694_v7 = vrot.slane %v692_v12, 2 }
  0x60   : > { %912 = vrot.lane.b32.xlu1 %v877_v19, %s5844_s25  ;;  %v572_v19 = vpack.c.bf16 %v546_v33, %v545_v2  ;;  %v1554_v33 = vrot.slane %v6252_v45, 4 }
  0x61   : > { %2519 = vrot.lane.b32.xlu0 %v2386_v23, %s5850_s16  ;;  %v679_v23 = vrot.slane %v677_v53, 3  ;;  %v697_v53 = vrot.slane %v695_v5, 3 }
  0x62   : > { %594 = vst.msk [vmem:[#allocation2 + $0x78] sm:$0xff] %vm578_vm0, %v572_v19 }
  0x63   : > { %v680_v28 = vor.u32 %v679_v23, %v676_v22  ;;  %v698_v20 = vor.u32 %v697_v53, %v694_v7  ;;  %v549_v23 = vld [vmem:[%s5896_s23 + $0x110] sm:$0xff] }
  0x64   : > { %1175 = vrot.lane.b32.xlu1 %v1056_v24, %s5846_s29 }
  0x65   : > { %1173 = vrot.lane.b32.xlu0 %v6088_v35, %s5846_s29  ;;  %v543_v35 = vld [vmem:[%s5896_s23 + $0xe0] sm:$0xff] }
  0x66   : > { %v571_v17 = vpack.c.bf16 %v544_v54, %v543_v35  ;;  %v1334_v35 = vrot.slane %v6266_v61, 4  ;;  %v6287_v54 = vld [vmem:[#allocation2 + $0x50] sm:$0xff] }
  0x67   : > { %v6295_v9 = vshrl.u32 %v6287_v54, 16  ;;  %v6305_v41 = vshll.u32 %v6287_v54, 16  ;;  %v2228_v44 = vrot.slane %v6287_v54, 5 }
  0x68   : > { %1437 = vrot.lane.b32.xlu1 %v6187_v57, %s5847_s9  ;;  %593 = vst.msk [vmem:[#allocation2 + $0x70] sm:$0xff] %vm578_vm0, %v571_v17  ;;  %v6285_v16 = vor.u32 %v1334_v35, %v1331_v0  ;;  %v1747_v17 = vor.u32 %v1746_v8, %v1743_v6  ;;  %v553_v6 = vld [vmem:[%s5896_s23 + $0x130] sm:$0xff]  ;;  %v554_v8 = vld [vmem:[%s5896_s23 + $0x138] sm:$0xff] }
  0x69   : > { %1435 = vrot.lane.b32.xlu0 %v1056_v24, %s5847_s9  ;;  %v671_v24 = vor.u32 %v670_v21, %v667_v48  ;;  %v2005_v48 = vrot.slane %v6295_v9, 4  ;;  %v2008_v19 = vrot.slane %v6305_v41, 5  ;;  %v1553_v21 = vsel %vm1538_vm1, %v1550_v34, %v1552_v15 }
  0x6a   : > { %v6302_v10 = vsel %vm994_vm4, %v1073_v50, %v6285_v16  ;;  %v1090_v12 = vrot.slane %v6305_v41, 4 }
  0x6b   : > { %v672_v29 = vsel %vm8860_vm7, %v662_v62, %v671_v24  ;;  %v681_v32 = vsel %vm8860_vm7, %v671_v24, %v680_v28  ;;  %v2395_v62 = vsel %vm8861_vm6, %v6150_v18, %v2394_v30  ;;  %v2404_v18 = vsel %vm8861_vm6, %v2394_v30, %v6270_v31 }
  0x6c   : > { %1586 = vrot.lane.b32.xlu1 %v1551_v43, %s5843_s24  ;;  %812 = vst.msk [vmem:[#allocation3 + $0x20] sm:$0xff] %vm578_vm0, %v672_v29  ;;  %813 = vst.msk [vmem:[#allocation3 + $0x28] sm:$0xff] %vm578_vm0, %v681_v32  ;;  %v688_v43 = vrot.slane %v686_v63, 3  ;;  %v1748_v24 = vsel %vm8856_vm5, %v6221_v40, %v1747_v17  ;;  %v609_v29 = vld [vmem:[#allocation2 + $0x48] sm:$0xff]  ;;  %v610_v32 = vld [vmem:[#allocation2 + $0x50] sm:$0xff] }
  0x6d   : > { %1584 = vrot.lane.b32.xlu0 %v1549_v1, %s5843_s24  ;;  %v710_v30 = vshrl.u32 %v610_v32, 16  ;;  %v713_v13 = vshll.u32 %v610_v32, 16  ;;  %v555_v32 = vld [vmem:[%s5896_s23 + $0x140] sm:$0xff] }
  0x70   : > { %1849 = vrot.lane.b32.xlu1 %v1730_v36, %s5848_s12 }
  0x71   : > { %1847 = vrot.lane.b32.xlu0 %v6116_v42, %s5848_s12  ;;  %v878_v42 = vrot.slane %v6131_v11, 3  ;;  %v2226_v11 = vrot.slane %v6252_v45, 5 }
  0x73   : > { %v879_v56 = vsel %vm864_vm2, %v876_v3, %v878_v42  ;;  %v683_v3 = vshrl.u32 %v607_v55, 16  ;;  %v881_v49 = vsel %vm864_vm2, %v878_v42, %v880_v37  ;;  %v701_v42 = vshrl.u32 %v609_v29, 16 }
  0x74   : > { %2111 = vrot.lane.b32.xlu1 %v6232_v52, %s5849_s15  ;;  %v2411_v55 = vrot.slane %v6266_v61, 6  ;;  %v2227_v61 = vsel %vm8862_vm3, %v2224_v25, %v2226_v11 }
  0x75   : > { %2109 = vrot.lane.b32.xlu0 %v1730_v36, %s5849_s15  ;;  %v685_v1 = vrot.slane %v683_v3, 2  ;;  %v550_v36 = vld [vmem:[%s5896_s23 + $0x118] sm:$0xff]  ;;  %v712_v3 = vrot.slane %v710_v30, 2 }
  0x76   : > { %v574_v34 = vpack.c.bf16 %v550_v36, %v549_v23 }
  0x77   : > { %v689_v2 = vor.u32 %v688_v43, %v685_v1  ;;  %v2420_v1 = vrot.slane %v6305_v41, 6  ;;  %v6363_v43 = vld [vmem:[#allocation2 + $0x58] sm:$0xff] }
  0x78   : > { %2260 = vrot.lane.b32.xlu1 %v2225_v46, %s5845_s26  ;;  %v704_v46 = vshll.u32 %v609_v29, 16  ;;  %596 = vst.msk [vmem:[#allocation2 + $0x88] sm:$0xff] %vm578_vm0, %v574_v34  ;;  %v6382_v5 = vshrl.u32 %v6363_v43, 16  ;;  %v6385_v7 = vshll.u32 %v6363_v43, 16 }
  0x79   : > { %2258 = vrot.lane.b32.xlu0 %v2223_v47, %s5845_s26  ;;  %v690_v26 = vsel %vm8860_vm7, %v680_v28, %v689_v2  ;;  %v699_v22 = vsel %vm8860_vm7, %v689_v2, %v698_v20  ;;  %v6327_v28 = vor.u32 %v2008_v19, %v2005_v48  ;;  %v2408_v47 = vrot.slane %v6263_v60, 5 }
  0x7a   : > { %814 = vst.msk [vmem:[#allocation3 + $0x30] sm:$0xff] %vm578_vm0, %v690_v26  ;;  %815 = vst.msk [vmem:[#allocation3 + $0x38] sm:$0xff] %vm578_vm0, %v699_v22  ;;  %v706_v58 = vrot.slane %v704_v46, 3  ;;  %v882_v60 = vrot.slane %v6252_v45, 3  ;;  %v1087_v26 = vrot.slane %v6295_v9, 3  ;;  %v1349_v48 = vrot.slane %v6382_v5, 3 }
  0x7b   : > { %v6338_v40 = vsel %vm8856_vm5, %v1747_v17, %v6327_v28  ;;  %v2412_v35 = vor.u32 %v2411_v55, %v2408_v47  ;;  %v1761_v34 = vrot.slane %v6382_v5, 4 }
  0x7c   : > { %914 = vrot.lane.b32.xlu1 %v879_v56, %s5844_s25  ;;  %v703_v56 = vrot.slane %v701_v42, 2  ;;  %v883_v4 = vsel %vm864_vm2, %v880_v37, %v882_v60  ;;  %v1091_v41 = vor.u32 %v1090_v12, %v1087_v26  ;;  %v1764_v42 = vrot.slane %v6385_v7, 5 }
  0x7d   : > { %2521 = vrot.lane.b32.xlu0 %v2395_v62, %s5850_s16  ;;  %v2413_v37 = vsel %vm8861_vm6, %v6270_v31, %v2412_v35  ;;  %v1352_v31 = vrot.slane %v6385_v7, 4 }
  0x7e   : > { %v707_v63 = vor.u32 %v706_v58, %v703_v56  ;;  %v1092_v22 = vsel %vm994_vm4, %v6285_v16, %v1091_v41  ;;  %v1558_v16 = vrot.slane %v6363_v43, 4  ;;  %v1765_v55 = vor.u32 %v1764_v42, %v1761_v34 }
  0x7f   : > { %v6407_v23 = vor.u32 %v1352_v31, %v1349_v48  ;;  %v6492_v31 = vld [vmem:[#allocation2 + $0x68] sm:$0xff] }
  0x80   : > { %916 = vrot.lane.b32.xlu1 %v881_v49, %s5844_s25  ;;  %v2229_v49 = vsel %vm8862_vm3, %v2226_v11, %v2228_v44  ;;  %v1556_v11 = vrot.slane %v6287_v54, 4  ;;  %v1766_v45 = vsel %vm8856_vm5, %v6327_v28, %v1765_v55  ;;  %v6512_v34 = vshll.u32 %v6492_v31, 16 }
  0x81   : > { %2523 = vrot.lane.b32.xlu0 %v2404_v18, %s5850_s16  ;;  %v2417_v18 = vrot.slane %v6295_v9, 5  ;;  %v6426_v39 = vsel %vm994_vm4, %v1091_v41, %v6407_v23 }
  0x83   : > { %v6389_v53 = vor.u32 %v2420_v1, %v2417_v18  ;;  %v612_v1 = vld [vmem:[#allocation2 + $0x60] sm:$0xff] }
  0x84   : > { %1179 = vrot.lane.b32.xlu1 %v1074_v51, %s5846_s29 }
  0x85   : > { %1177 = vrot.lane.b32.xlu0 %v6187_v57, %s5846_s29  ;;  %v1555_v57 = vsel %vm1538_vm1, %v1552_v15, %v1554_v33  ;;  %v884_v15 = vrot.slane %v6287_v54, 3 }
  0x87   : > { %v885_v9 = vsel %vm864_vm2, %v882_v60, %v884_v15 }
  0x88   : > { %1441 = vrot.lane.b32.xlu1 %v6302_v10, %s5847_s9 }
  0x89   : > { %1439 = vrot.lane.b32.xlu0 %v1074_v51, %s5847_s9  ;;  %v708_v51 = vsel %vm8860_vm7, %v698_v20, %v707_v63  ;;  %v2422_v20 = vsel %vm8861_vm6, %v2412_v35, %v6389_v53 }
  0x8a   : > { %816 = vst.msk [vmem:[#allocation3 + $0x40] sm:$0xff] %vm578_vm0, %v708_v51 }
  0x8c   : > { %1590 = vrot.lane.b32.xlu1 %v1555_v57, %s5843_s24  ;;  %v576_v57 = vpack.c.bf16 %v554_v8, %v553_v6  ;;  %v2426_v6 = vrot.slane %v6382_v5, 5  ;;  %v2429_v8 = vrot.slane %v6385_v7, 6 }
  0x8d   : > { %1588 = vrot.lane.b32.xlu0 %v1553_v21, %s5843_s24 }
  0x8e   : > { %598 = vst.msk [vmem:[#allocation2 + $0x98] sm:$0xff] %vm578_vm0, %v576_v57 }
  0x90   : > { %1853 = vrot.lane.b32.xlu1 %v1748_v24, %s5848_s12 }
  0x91   : > { %1851 = vrot.lane.b32.xlu0 %v6232_v52, %s5848_s12  ;;  %v715_v52 = vrot.slane %v713_v13, 3  ;;  %v577_v13 = vpack.c.bf16 %v556_v38, %v555_v32 }
  0x92   : > { %v6342_v14 = vpop.permute.xlu1 %1578 }
  0x93   : > { %v903_v62 = vpop.permute.xlu0 %902  ;;  %v6357_v50 = vor.u32 %v715_v52, %v712_v3  ;;  %599 = vst.msk [vmem:[#allocation2 + $0xa0] sm:$0xff] %vm578_vm0, %v577_v13  ;;  %v611_v52 = vld [vmem:[#allocation2 + $0x58] sm:$0xff] }
  0x94   : > { %957 = vst.msk [vmem:[#allocation3] sm:$0xff] %vm956_vm8, %v903_v62  ;;  %2115 = vrot.lane.b32.xlu1 %v6338_v40, %s5849_s15  ;;  %v1557_v62 = vsel %vm1538_vm1, %v1554_v33, %v1556_v11  ;;  %v719_v60 = vshrl.u32 %v611_v52, 16 }
  0x95   : > { %2113 = vrot.lane.b32.xlu0 %v1748_v24, %s5849_s15  ;;  %v717_v2 = vsel %vm8860_vm7, %v707_v63, %v6357_v50  ;;  %v6409_v24 = vld [vmem:[#allocation2 + $0x60] sm:$0xff]  ;;  %v722_v63 = vshll.u32 %v611_v52, 16  ;;  %v1562_v52 = vrot.slane %v6492_v31, 4 }
  0x96   : > { %v6359_v0 = vpop.permute.xlu1 %2252  ;;  %817 = vst.msk [vmem:[#allocation3 + $0x48] sm:$0xff] %vm578_vm0, %v717_v2  ;;  %v6430_v46 = vshrl.u32 %v6409_v24, 16  ;;  %v6433_v47 = vshll.u32 %v6409_v24, 16  ;;  %v731_v2 = vshll.u32 %v612_v1, 16 }
  0x97   : > { %v905_v25 = vpop.permute.xlu0 %904  ;;  %v724_v35 = vrot.slane %v722_v63, 3  ;;  %v1782_v63 = vrot.slane %v6512_v34, 5 }
  0x98   : > { %958 = vst.msk [vmem:[#allocation3 + $0x8] sm:$0xff] %vm956_vm8, %v905_v25  ;;  %2264 = vrot.lane.b32.xlu1 %v2229_v49, %s5845_s26  ;;  %v2023_v56 = vrot.slane %v6430_v46, 4  ;;  %v2026_v58 = vrot.slane %v6433_v47, 5  ;;  %v721_v49 = vrot.slane %v719_v60, 2  ;;  %v728_v25 = vshrl.u32 %v612_v1, 16 }
  0x99   : > { %2262 = vrot.lane.b32.xlu0 %v2227_v61, %s5845_s26  ;;  %v2435_v41 = vrot.slane %v6430_v46, 5  ;;  %v2438_v48 = vrot.slane %v6433_v47, 6 }
  0x9a   : > { %v1166_v27 = vpop.permute.xlu1 %1165  ;;  %v6458_v33 = vor.u32 %v2026_v58, %v2023_v56  ;;  %v725_v51 = vor.u32 %v724_v35, %v721_v49 }
  0x9b   : > { %1220 = vst.msk [vmem:[#allocation3] sm:$0xff] %vm1219_vm9, %v1166_v27  ;;  %v1577_v17 = vpop.permute.xlu0 %1576  ;;  %v730_v27 = vrot.slane %v728_v25, 2  ;;  %v6516_v38 = vor.u32 %v2438_v48, %v2435_v41 }
  0x9c   : > { %918 = vrot.lane.b32.xlu1 %v883_v4, %s5844_s25  ;;  %v6468_v28 = vsel %vm8856_vm5, %v1765_v55, %v6458_v33  ;;  %v2232_v4 = vrot.slane %v6409_v24, 5  ;;  %v726_v12 = vsel %vm8860_vm7, %v6357_v50, %v725_v51  ;;  %vm2647_vm5 = vcmask 588800  }
  0x9d   : > { %2525 = vrot.lane.b32.xlu0 %v2413_v37, %s5850_s16  ;;  %v733_v37 = vrot.slane %v731_v2, 3  ;;  %818 = vst.msk [vmem:[#allocation3 + $0x50] sm:$0xff] %vm578_vm0, %v726_v12 }
  0x9e   : > { %v1168_v19 = vpop.permute.xlu1 %1167 }
  0x9f   : > { %1221 = vst.msk [vmem:[#allocation3 + $0x8] sm:$0xff] %vm1219_vm9, %v1168_v19  ;;  %v2251_v21 = vpop.permute.xlu0 %2250  ;;  %v6481_v5 = vor.u32 %v733_v37, %v730_v27 }
  0xa0   : > { %920 = vrot.lane.b32.xlu1 %v885_v9, %s5844_s25  ;;  %v2430_v9 = vor.u32 %v2429_v8, %v2426_v6  ;;  %v613_v6 = vld [vmem:[#allocation2 + $0x68] sm:$0xff] }
  0xa1   : > { %2527 = vrot.lane.b32.xlu0 %v2422_v20, %s5850_s16  ;;  %v735_v19 = vsel %vm8860_vm7, %v725_v51, %v6481_v5  ;;  %v737_v8 = vshrl.u32 %v613_v6, 16 }
  0xa2   : > { %v1430_v36 = vpop.permute.xlu1 %1429  ;;  %819 = vst.msk [vmem:[#allocation3 + $0x58] sm:$0xff] %vm578_vm0, %v735_v19  ;;  %v2431_v54 = vsel %vm8861_vm6, %v6389_v53, %v2430_v9 }
  0xa3   : > { %1483 = vst.msk [vmem:[#allocation3 + $0x8] sm:$0xff] %vm1481_vm10, %v1430_v36  ;;  %v1428_v29 = vpop.permute.xlu0 %1427  ;;  %v1105_v36 = vrot.slane %v6430_v46, 3  ;;  %v739_v37 = vrot.slane %v737_v8, 2 }
  0xa4   : > { %1482 = vst.msk [vmem:[#allocation3] sm:$0xff] %vm1481_vm10, %v1428_v29  ;;  %1183 = vrot.lane.b32.xlu1 %v1092_v22, %s5846_s29  ;;  %v1108_v29 = vrot.slane %v6433_v47, 4 }
  0xa5   : > { %1632 = vst.msk [vmem:[#allocation3 + $0x8] sm:$0xff] %vm1630_vm11, %v6342_v14  ;;  %1181 = vrot.lane.b32.xlu0 %v6302_v10, %s5846_s29  ;;  %1631 = vst.msk [vmem:[#allocation3] sm:$0xff] %vm1630_vm11, %v1577_v17  ;;  %v1559_v10 = vsel %vm1538_vm1, %v1556_v11, %v1558_v16  ;;  %v6509_v11 = vshrl.u32 %v6492_v31, 16 }
  0xa6   : > { %v1842_v30 = vpop.permute.xlu1 %1841  ;;  %v1109_v47 = vor.u32 %v1108_v29, %v1105_v36 }
  0xa7   : > { %1895 = vst.msk [vmem:[#allocation3 + $0x8] sm:$0xff] %vm8858_vm12, %v1842_v30  ;;  %v1840_v14 = vpop.permute.xlu0 %1839  ;;  %v1367_v53 = vrot.slane %v6509_v11, 3  ;;  %v1370_v30 = vrot.slane %v6512_v34, 4  ;;  %v1779_v60 = vrot.slane %v6509_v11, 4  ;;  %v2444_v48 = vrot.slane %v6509_v11, 5 }
  0xa8   : > { %1894 = vst.msk [vmem:[#allocation3] sm:$0xff] %vm8858_vm12, %v1840_v14  ;;  %1445 = vrot.lane.b32.xlu1 %v6426_v39, %s5847_s9  ;;  %v2440_v14 = vsel %vm8861_vm6, %v2430_v9, %v6516_v38  ;;  %v1110_v55 = vsel %vm994_vm4, %v6407_v23, %v1109_v47 }
  0xa9   : > { %1443 = vrot.lane.b32.xlu0 %v1092_v22, %s5847_s9  ;;  %v888_v22 = vrot.slane %v6409_v24, 3  ;;  %v6536_v56 = vor.u32 %v1370_v30, %v1367_v53 }
  0xaa   : > { %v2104_v59 = vpop.permute.xlu1 %2103 }
  0xab   : > { %2157 = vst.msk [vmem:[#allocation3 + $0x8] sm:$0xff] %vm8857_vm13, %v2104_v59  ;;  %v2102_v3 = vpop.permute.xlu0 %2101  ;;  %v6538_v59 = vld [vmem:[#allocation2 + $0x70] sm:$0xff]  ;;  %v6550_v23 = vsel %vm994_vm4, %v1109_v47, %v6536_v56 }
  0xac   : > { %2156 = vst.msk [vmem:[#allocation3] sm:$0xff] %vm8857_vm13, %v2102_v3  ;;  %1594 = vrot.lane.b32.xlu1 %v1559_v10, %s5843_s24  ;;  %v1560_v3 = vrot.slane %v6409_v24, 4  ;;  %v2236_v41 = vrot.slane %v6538_v59, 5 }
  0xad   : > { %2306 = vst.msk [vmem:[#allocation3 + $0x8] sm:$0xff] %vm2304_vm14, %v6359_v0  ;;  %1592 = vrot.lane.b32.xlu0 %v1557_v62, %s5843_s24  ;;  %2305 = vst.msk [vmem:[#allocation3] sm:$0xff] %vm2304_vm14, %v2251_v21  ;;  %v2230_v0 = vrot.slane %v6363_v43, 5 }
  0xae   : > { %v907_v61 = vpop.permute.xlu1 %906  ;;  %v1561_v25 = vsel %vm1538_vm1, %v1558_v16, %v1560_v3 }
  0xaf   : > { %v2514_v18 = vpop.permute.xlu0 %2513  ;;  %959 = vst.msk [vmem:[#allocation3 + $0x10] sm:$0xff] %vm956_vm8, %v907_v61  ;;  %v2231_v50 = vsel %vm8862_vm3, %v2228_v44, %v2230_v0  ;;  %v2233_v7 = vsel %vm8862_vm3, %v2230_v0, %v2232_v4  ;;  %v6557_v61 = vshll.u32 %v6538_v59, 16 }
  0xb0   : > { %2568 = vst.msk [vmem:[#allocation3] sm:$0xff] %vm8863_vm15, %v2514_v18  ;;  %1857 = vrot.lane.b32.xlu1 %v1766_v45, %s5848_s12  ;;  %v1783_v18 = vor.u32 %v1782_v63, %v1779_v60 }
  0xb1   : > { %1855 = vrot.lane.b32.xlu0 %v6338_v40, %s5848_s12  ;;  %v886_v40 = vrot.slane %v6363_v43, 3  ;;  %v2044_v0 = vrot.slane %v6557_v61, 5 }
  0xb2   : > { %v909_v26 = vpop.permute.xlu1 %908 }
  0xb3   : > { %v2516_v57 = vpop.permute.xlu0 %2515  ;;  %960 = vst.msk [vmem:[#allocation3 + $0x18] sm:$0xff] %vm956_vm8, %v909_v26  ;;  %v887_v44 = vsel %vm864_vm2, %v884_v15, %v886_v40  ;;  %v889_v46 = vsel %vm864_vm2, %v886_v40, %v888_v22  ;;  %v740_v26 = vshll.u32 %v613_v6, 16  ;;  %v614_v40 = vld [vmem:[#allocation2 + $0x70] sm:$0xff] }
  0xb4   : > { %2569 = vst.msk [vmem:[#allocation3 + $0x8] sm:$0xff] %vm8863_vm15, %v2516_v57  ;;  %2119 = vrot.lane.b32.xlu1 %v6468_v28, %s5849_s15  ;;  %v749_v9 = vshll.u32 %v614_v40, 16 }
  0xb5   : > { %2117 = vrot.lane.b32.xlu0 %v1766_v45, %s5849_s15  ;;  %v6554_v45 = vshrl.u32 %v6538_v59, 16  ;;  %v742_v16 = vrot.slane %v740_v26, 3 }
  0xb6   : > { %v1172_v17 = vpop.permute.xlu1 %1171  ;;  %v751_v36 = vrot.slane %v749_v9, 3 }
  0xb7   : > { %v1170_v20 = vpop.permute.xlu0 %1169  ;;  %1223 = vst.msk [vmem:[#allocation3 + $0x18] sm:$0xff] %vm1219_vm9, %v1172_v17  ;;  %v2586_v21 = vld [vmem:[#allocation3] sm:$0xff]  ;;  %v2041_v1 = vrot.slane %v6554_v45, 4  ;;  %v746_v17 = vshrl.u32 %v614_v40, 16 }
  0xb8   : > { %1222 = vst.msk [vmem:[#allocation3 + $0x10] sm:$0xff] %vm1219_vm9, %v1170_v20  ;;  %5720 = vmatprep.mubr.msk.bf16.mxu0 %vm2647_vm5, %v2586_v21  ;;  %2268 = vrot.lane.b32.xlu1 %v2233_v7, %s5845_s26  ;;  %v743_v7 = vor.u32 %v742_v16, %v739_v37  ;;  %v2447_v20 = vrot.slane %v6512_v34, 6 }
  0xb9   : > { %2266 = vrot.lane.b32.xlu0 %v2231_v50, %s5845_s26  ;;  %v6578_v27 = vor.u32 %v2044_v0, %v2041_v1  ;;  %v2234_v50 = vrot.slane %v6492_v31, 5 }
  0xba   : > { %v1434_v32 = vpop.permute.xlu1 %1433  ;;  %v744_v21 = vsel %vm8860_vm7, %v6481_v5, %v743_v7 }
  0xbb   : > { %v1432_v15 = vpop.permute.xlu0 %1431  ;;  %1485 = vst.msk [vmem:[#allocation3 + $0x18] sm:$0xff] %vm1481_vm10, %v1434_v32  ;;  %v2587_v42 = vld [vmem:[#allocation3 + $0x8] sm:$0xff]  ;;  %v2235_v5 = vsel %vm8862_vm3, %v2232_v4, %v2234_v50  ;;  %v2237_v34 = vsel %vm8862_vm3, %v2234_v50, %v2236_v41 }
  0xbc   : > { %1484 = vst.msk [vmem:[#allocation3 + $0x10] sm:$0xff] %vm1481_vm10, %v1432_v15  ;;  %5721 = vmatmul.mubr.msk.bf16.vlgmr.msra.gmra.mrb[0].mxu0 %vm2647_vm5, %v2587_v42  ;;  %922 = vrot.lane.b32.xlu1 %v887_v44, %s5844_s25  ;;  %v748_v44 = vrot.slane %v746_v17, 2  ;;  %v2453_v15 = vrot.slane %v6554_v45, 5  ;;  %v2456_v42 = vrot.slane %v6557_v61, 6 }
  0xbd   : > { %2529 = vrot.lane.b32.xlu0 %v2431_v54, %s5850_s16  ;;  %820 = vst.msk [vmem:[#allocation3 + $0x60] sm:$0xff] %vm578_vm0, %v744_v21  ;;  %v2448_v54 = vor.u32 %v2447_v20, %v2444_v48  ;;  %v615_v48 = vld [vmem:[#allocation2 + $0x78] sm:$0xff] }
  0xbe   : > { %v1583_v13 = vpop.permute.xlu1 %1582  ;;  %v6601_v11 = vor.u32 %v751_v36, %v748_v44  ;;  %v758_v20 = vshll.u32 %v615_v48, 16 }
  0xbf   : > { %v1581_v10 = vpop.permute.xlu0 %1580  ;;  %1634 = vst.msk [vmem:[#allocation3 + $0x18] sm:$0xff] %vm1630_vm11, %v1583_v13  ;;  %v892_v13 = vrot.slane %v6538_v59, 3  ;;  %v2449_v24 = vsel %vm8861_vm6, %v6516_v38, %v2448_v54 }
  0xc0   : > { %1633 = vst.msk [vmem:[#allocation3 + $0x10] sm:$0xff] %vm1630_vm11, %v1581_v10  ;;  %924 = vrot.lane.b32.xlu1 %v889_v46, %s5844_s25  ;;  %v6612_v46 = vld [vmem:[#allocation2 + $0x78] sm:$0xff]  ;;  %v753_v47 = vsel %vm8860_vm7, %v743_v7, %v6601_v11  ;;  %v1126_v10 = vrot.slane %v6557_v61, 4 }
  0xc1   : > { %2531 = vrot.lane.b32.xlu0 %v2440_v14, %s5850_s16  ;;  %821 = vst.msk [vmem:[#allocation3 + $0x68] sm:$0xff] %vm578_vm0, %v753_v47  ;;  %v1123_v14 = vrot.slane %v6554_v45, 3  ;;  %v1566_v6 = vrot.slane %v6612_v46, 4 }
  0xc2   : > { %v1846_v58 = vpop.permute.xlu1 %1845 }
  0xc3   : > { %v1844_v62 = vpop.permute.xlu0 %1843  ;;  %1897 = vst.msk [vmem:[#allocation3 + $0x18] sm:$0xff] %vm8858_vm12, %v1846_v58  ;;  %v6632_v58 = vshll.u32 %v6612_v46, 16  ;;  %v1127_v45 = vor.u32 %v1126_v10, %v1123_v14 }
  0xc4   : > { %1896 = vst.msk [vmem:[#allocation3 + $0x10] sm:$0xff] %vm8858_vm12, %v1844_v62  ;;  %1187 = vrot.lane.b32.xlu1 %v1110_v55, %s5846_s29 }
  0xc5   : > { %1185 = vrot.lane.b32.xlu0 %v6426_v39, %s5846_s29  ;;  %v1563_v39 = vsel %vm1538_vm1, %v1560_v3, %v1562_v52  ;;  %v6636_v3 = vor.u32 %v2456_v42, %v2453_v15  ;;  %v1388_v61 = vrot.slane %v6632_v58, 4  ;;  %v1800_v26 = vrot.slane %v6632_v58, 5 }
  0xc6   : > { %v2108_v49 = vpop.permute.xlu1 %2107  ;;  %v2465_v15 = vrot.slane %v6632_v58, 6 }
  0xc7   : > { %v2106_v35 = vpop.permute.xlu0 %2105  ;;  %2159 = vst.msk [vmem:[#allocation3 + $0x18] sm:$0xff] %vm8857_vm13, %v2108_v49 }
  0xc8   : > { %2158 = vst.msk [vmem:[#allocation3 + $0x10] sm:$0xff] %vm8857_vm13, %v2106_v35  ;;  %1449 = vrot.lane.b32.xlu1 %v6550_v23, %s5847_s9  ;;  %vm8864_vm13 = vsmask.f32 3328  ;;  %v2458_v35 = vsel %vm8861_vm6, %v2448_v54, %v6636_v3 }
  0xc9   : > { %1447 = vrot.lane.b32.xlu0 %v1110_v55, %s5847_s9  ;;  %v1784_v12 = vsel %vm8864_vm13, %v6458_v33, %v1783_v18  ;;  %v6588_v33 = vsel %vm8864_vm13, %v1783_v18, %v6578_v27  ;;  %v6629_v55 = vshrl.u32 %v6612_v46, 16  ;;  %v1128_v18 = vsel %vm994_vm4, %v6536_v56, %v1127_v45 }
  0xca   : > { %v2257_v51 = vpop.permute.xlu1 %2256  ;;  %vm8865_vm13 = vcmask 458112  }
  0xcb   : > { %v2255_v2 = vpop.permute.xlu0 %2254  ;;  %2308 = vst.msk [vmem:[#allocation3 + $0x18] sm:$0xff] %vm2304_vm14, %v2257_v51  ;;  %v1385_v38 = vrot.slane %v6629_v55, 3  ;;  %v6658_v51 = vld [vmem:[#allocation2 + $0x80] sm:$0xff]  ;;  %v1797_v8 = vrot.slane %v6629_v55, 4 }
  0xcc   : > { %2307 = vst.msk [vmem:[#allocation3 + $0x10] sm:$0xff] %vm2304_vm14, %v2255_v2  ;;  %1598 = vrot.lane.b32.xlu1 %v1563_v39, %s5843_s24  ;;  %v1564_v2 = vrot.slane %v6538_v59, 4 }
  0xcd   : > { %1596 = vrot.lane.b32.xlu0 %v1561_v25, %s5843_s24  ;;  %v6656_v1 = vor.u32 %v1388_v61, %v1385_v38 }
  0xce   : > { %v911_v43 = vpop.permute.xlu1 %910  ;;  %v1565_v17 = vsel %vm1538_vm1, %v1562_v52, %v1564_v2  ;;  %v760_v52 = vrot.slane %v758_v20, 3 }
  0xcf   : > { %v2518_v57 = vpop.permute.xlu0 %2517  ;;  %961 = vst.msk [vmem:[#allocation3 + $0x20] sm:$0xff] %vm956_vm8, %v911_v43  ;;  %v6670_v56 = vsel %vm994_vm4, %v1127_v45, %v6656_v1  ;;  %v6677_v43 = vshll.u32 %v6658_v51, 16  ;;  %v896_v45 = vrot.slane %v6658_v51, 3 }
  0xd0   : > { %2570 = vst.msk [vmem:[#allocation3 + $0x10] sm:$0xff] %vm8863_vm15, %v2518_v57  ;;  %1861 = vrot.lane.b32.xlu1 %v1784_v12, %s5848_s12  ;;  %v1801_v57 = vor.u32 %v1800_v26, %v1797_v8 }
  0xd1   : > { %1859 = vrot.lane.b32.xlu0 %v6468_v28, %s5848_s12  ;;  %v890_v28 = vrot.slane %v6492_v31, 3  ;;  %v2062_v50 = vrot.slane %v6677_v43, 5  ;;  %v1144_v61 = vrot.slane %v6677_v43, 4 }
  0xd2   : > { %v913_v19 = vpop.permute.xlu1 %912 }
  0xd3   : > { %v2520_v29 = vpop.permute.xlu0 %2519  ;;  %962 = vst.msk [vmem:[#allocation3 + $0x28] sm:$0xff] %vm956_vm8, %v913_v19  ;;  %v891_v4 = vsel %vm864_vm2, %v888_v22, %v890_v28  ;;  %v893_v63 = vsel %vm864_vm2, %v890_v28, %v892_v13  ;;  %v755_v19 = vshrl.u32 %v615_v48, 16  ;;  %v2238_v28 = vrot.slane %v6612_v46, 5 }
  0xd4   : > { %2571 = vst.msk [vmem:[#allocation3 + $0x18] sm:$0xff] %vm8863_vm15, %v2520_v29  ;;  %2123 = vrot.lane.b32.xlu1 %v6588_v33, %s5849_s15 }
  0xd5   : > { %2121 = vrot.lane.b32.xlu0 %v1784_v12, %s5849_s15  ;;  %v6674_v12 = vshrl.u32 %v6658_v51, 16  ;;  %v757_v36 = vrot.slane %v755_v19, 2 }
  0xd6   : > { %v1176_v32 = vpop.permute.xlu1 %1175 }
  0xd7   : > { %v1174_v53 = vpop.permute.xlu0 %1173  ;;  %1225 = vst.msk [vmem:[#allocation3 + $0x28] sm:$0xff] %vm1219_vm9, %v1176_v32  ;;  %v2588_v30 = vld [vmem:[#allocation3 + $0x10] sm:$0xff]  ;;  %v2059_v40 = vrot.slane %v6674_v12, 4  ;;  %v2462_v32 = vrot.slane %v6629_v55, 5  ;;  %v766_v47 = vrot.slane %v6674_v12, 2  ;;  %v2471_v58 = vrot.slane %v6674_v12, 5 }
  0xd8   : > { %1224 = vst.msk [vmem:[#allocation3 + $0x20] sm:$0xff] %vm1219_vm9, %v1174_v53  ;;  %5724 = vmatprep.mubr.msk.bf16.mxu0 %vm2647_vm5, %v2588_v30  ;;  %2272 = vrot.lane.b32.xlu1 %v2237_v34, %s5845_s26  ;;  %v2240_v34 = vrot.slane %v6658_v51, 5  ;;  %v769_v53 = vrot.slane %v6677_v43, 3  ;;  %v1141_v38 = vrot.slane %v6674_v12, 3 }
  0xd9   : > { %2270 = vrot.lane.b32.xlu0 %v2235_v5, %s5845_s26  ;;  %v6698_v44 = vor.u32 %v2062_v50, %v2059_v40  ;;  %v761_v5 = vor.u32 %v760_v52, %v757_v36  ;;  %v2466_v55 = vor.u32 %v2465_v15, %v2462_v32  ;;  %v1568_v50 = vrot.slane %v6658_v51, 4 }
  0xda   : > { %v1438_v62 = vpop.permute.xlu1 %1437  ;;  %v2241_v14 = vsel %vm8862_vm3, %v2238_v28, %v2240_v34 }
  0xdb   : > { %v1436_v22 = vpop.permute.xlu0 %1435  ;;  %1487 = vst.msk [vmem:[#allocation3 + $0x28] sm:$0xff] %vm1481_vm10, %v1438_v62  ;;  %v2589_v60 = vld [vmem:[#allocation3 + $0x18] sm:$0xff]  ;;  %v762_v42 = vsel %vm8860_vm7, %v6601_v11, %v761_v5  ;;  %v2239_v11 = vsel %vm8862_vm3, %v2236_v41, %v2238_v28  ;;  %v2474_v62 = vrot.slane %v6677_v43, 6  ;;  %v2467_v59 = vsel %vm8861_vm6, %v6636_v3, %v2466_v55 }
  0xdc   : > { %1486 = vst.msk [vmem:[#allocation3 + $0x20] sm:$0xff] %vm1481_vm10, %v1436_v22  ;;  %5725 = vmatmul.mubr.msk.bf16.gmra.mrb[4].mxu0 %vm2647_vm5, %v2589_v60  ;;  %926 = vrot.lane.b32.xlu1 %v891_v4, %s5844_s25  ;;  %v6723_v4 = vor.u32 %v769_v53, %v766_v47  ;;  %v1569_v28 = vsel %vm1538_vm1, %v1566_v6, %v1568_v50  ;;  %v618_v47 = vld [vmem:[#allocation2 + $0x90] sm:$0x7] }
  0xdd   : > { %2533 = vrot.lane.b32.xlu0 %v2449_v24, %s5850_s16  ;;  %822 = vst.msk [vmem:[#allocation3 + $0x70] sm:$0xff] %vm578_vm0, %v762_v42  ;;  %v6734_v24 = vld [vmem:[#allocation2 + $0x88] sm:$0xff] }
  0xde   : > { %v1587_v49 = vpop.permute.xlu1 %1586  ;;  %v771_v22 = vsel %vm8860_vm7, %v761_v5, %v6723_v4  ;;  %v2242_v53 = vrot.slane %v6734_v24, 5 }
  0xdf   : > { %v1585_v39 = vpop.permute.xlu0 %1584  ;;  %1636 = vst.msk [vmem:[#allocation3 + $0x28] sm:$0xff] %vm1630_vm11, %v1587_v49  ;;  %v6751_v49 = vshrl.u32 %v6734_v24, 16 }
  0xe0   : > { %1635 = vst.msk [vmem:[#allocation3 + $0x20] sm:$0xff] %vm1630_vm11, %v1585_v39  ;;  %928 = vrot.lane.b32.xlu1 %v893_v63, %s5844_s25 }
  0xe1   : > { %2535 = vrot.lane.b32.xlu0 %v2458_v35, %s5850_s16  ;;  %823 = vst.msk [vmem:[#allocation3 + $0x78] sm:$0xff] %vm578_vm0, %v771_v22  ;;  %v6754_v35 = vshll.u32 %v6734_v24, 16  ;;  %v1403_v3 = vrot.slane %v6751_v49, 3  ;;  %v775_v42 = vrot.slane %v6751_v49, 2 }
  0xe2   : > { %v1850_v0 = vpop.permute.xlu1 %1849 }
  0xe3   : > { %v1848_v25 = vpop.permute.xlu0 %1847  ;;  %1899 = vst.msk [vmem:[#allocation3 + $0x28] sm:$0xff] %vm8858_vm12, %v1850_v0  ;;  %v1406_v8 = vrot.slane %v6754_v35, 4 }
  0xe4   : > { %1898 = vst.msk [vmem:[#allocation3 + $0x20] sm:$0xff] %vm8858_vm12, %v1848_v25  ;;  %1191 = vrot.lane.b32.xlu1 %v1128_v18, %s5846_s29  ;;  %vm8866_vm12 = vmmov %vm8865_vm13 }
  0xe5   : > { %1189 = vrot.lane.b32.xlu0 %v6550_v23, %s5846_s29  ;;  %v1567_v23 = vsel %vm1538_vm1, %v1564_v2, %v1566_v6  ;;  %v1145_v2 = vor.u32 %v1144_v61, %v1141_v38  ;;  %v844_v38 = vld [vmem:[#allocation2 + $0x90] sm:$0x7] }
  0xe6   : > { %v2112_v37 = vpop.permute.xlu1 %2111 }
  0xe7   : > { %v2110_v16 = vpop.permute.xlu0 %2109  ;;  %2161 = vst.msk [vmem:[#allocation3 + $0x28] sm:$0xff] %vm8865_vm13, %v2112_v37  ;;  %v1146_v37 = vsel %vm994_vm4, %v6656_v1, %v1145_v2 }
  0xe8   : > { %2160 = vst.msk [vmem:[#allocation3 + $0x20] sm:$0xff] %vm8866_vm12, %v2110_v16  ;;  %1453 = vrot.lane.b32.xlu1 %v6670_v56, %s5847_s9  ;;  %vm8867_vm12 = vsmask.f32 3328  ;;  %v6778_v16 = vor.u32 %v1406_v8, %v1403_v3 }
  0xe9   : > { %1451 = vrot.lane.b32.xlu0 %v1128_v18, %s5847_s9  ;;  %v1802_v21 = vsel %vm8867_vm12, %v6578_v27, %v1801_v57  ;;  %vm8868_vm13 = vmmov %vm8867_vm12  ;;  %v6758_v18 = vor.u32 %v2474_v62, %v2471_v58  ;;  %vm8869_vm12 = vcmask 392512   ;;  %v2483_v62 = vrot.slane %v6754_v35, 6 }
  0xea   : > { %v2261_v7 = vpop.permute.xlu1 %2260  ;;  %v6708_v27 = vsel %vm8868_vm13, %v1801_v57, %v6698_v44  ;;  %v6780_v57 = vld [vmem:[#allocation2 + $0x90] sm:$0xff]  ;;  %vm8870_vm13 = vmmov %vm8869_vm12  ;;  %v6792_v1 = vsel %vm994_vm4, %v1145_v2, %v6778_v16 }
  0xeb   : > { %v2259_v9 = vpop.permute.xlu0 %2258  ;;  %2310 = vst.msk [vmem:[#allocation3 + $0x28] sm:$0xff] %vm2304_vm14, %v2261_v7  ;;  %v2476_v12 = vsel %vm8861_vm6, %v2466_v55, %v6758_v18  ;;  %v1570_v7 = vrot.slane %v6734_v24, 4  ;;  %v6796_v48 = vshrl.u32 %v6780_v57, 16  ;;  %v6799_v19 = vshll.u32 %v6780_v57, 16 }
  0xec   : > { %2309 = vst.msk [vmem:[#allocation3 + $0x20] sm:$0xff] %vm2304_vm14, %v2259_v9  ;;  %1602 = vrot.lane.b32.xlu1 %v1567_v23, %s5843_s24  ;;  %v1818_v9 = vrot.slane %v6754_v35, 5  ;;  %v785_v55 = vshll.u32 %v618_v47, 16 }
  0xed   : > { %1600 = vrot.lane.b32.xlu0 %v1565_v17, %s5843_s24  ;;  %v1815_v17 = vrot.slane %v6751_v49, 4  ;;  %v2077_v36 = vrot.slane %v6796_v48, 4  ;;  %v2080_v52 = vrot.slane %v6799_v19, 5  ;;  %v2492_v2 = vrot.slane %v6799_v19, 6 }
  0xee   : > { %v915_v31 = vpop.permute.xlu1 %914 }
  0xef   : > { %v2522_v29 = vpop.permute.xlu0 %2521  ;;  %963 = vst.msk [vmem:[#allocation3 + $0x30] sm:$0xff] %vm956_vm8, %v915_v31  ;;  %v1819_v31 = vor.u32 %v1818_v9, %v1815_v17 }
  0xf0   : > { %2572 = vst.msk [vmem:[#allocation3 + $0x20] sm:$0xff] %vm8863_vm15, %v2522_v29  ;;  %1865 = vrot.lane.b32.xlu1 %v1802_v21, %s5848_s12 }
  0xf1   : > { %1863 = vrot.lane.b32.xlu0 %v6588_v33, %s5848_s12  ;;  %v894_v33 = vrot.slane %v6612_v46, 3  ;;  %v778_v46 = vrot.slane %v6754_v35, 3  ;;  %v1256_v35 = vld [vmem:[#allocation2 + $0x98] sm:$0xf] }
  0xf2   : > { %v917_v54 = vpop.permute.xlu1 %916 }
  0xf3   : > { %v2524_v30 = vpop.permute.xlu0 %2523  ;;  %964 = vst.msk [vmem:[#allocation3 + $0x38] sm:$0xff] %vm956_vm8, %v917_v54  ;;  %v895_v41 = vsel %vm864_vm2, %v892_v13, %v894_v33  ;;  %v897_v25 = vsel %vm864_vm2, %v894_v33, %v896_v45  ;;  %v6820_v54 = vor.u32 %v2080_v52, %v2077_v36  ;;  %v782_v33 = vshrl.u32 %v618_v47, 16  ;;  %v1930_v47 = vld [vmem:[#allocation2 + $0xa0] sm:$0x1f] }
  0xf4   : > { %2573 = vst.msk [vmem:[#allocation3 + $0x28] sm:$0xff] %vm8863_vm15, %v2524_v30  ;;  %2127 = vrot.lane.b32.xlu1 %v6708_v27, %s5849_s15  ;;  %v779_v30 = vor.u32 %v778_v46, %v775_v42 }
  0xf5   : > { %2125 = vrot.lane.b32.xlu0 %v1802_v21, %s5849_s15 }
  0xf6   : > { %v1180_v10 = vpop.permute.xlu1 %1179  ;;  %v780_v22 = vsel %vm8860_vm7, %v6723_v4, %v779_v30 }
  0xf7   : > { %v1178_v60 = vpop.permute.xlu0 %1177  ;;  %1227 = vst.msk [vmem:[#allocation3 + $0x38] sm:$0xff] %vm1219_vm9, %v1180_v10  ;;  %v2590_v63 = vld [vmem:[#allocation3 + $0x20] sm:$0xff]  ;;  %v993_v10 = vld [vmem:[#allocation2 + $0x90] sm:$0xf] }
  0xf8   : > { %1226 = vst.msk [vmem:[#allocation3 + $0x30] sm:$0xff] %vm1219_vm9, %v1178_v60  ;;  %5728 = vmatprep.mubr.msk.bf16.mxu0 %vm2647_vm5, %v2590_v63  ;;  %2276 = vrot.lane.b32.xlu1 %v2241_v14, %s5845_s26  ;;  %v2480_v14 = vrot.slane %v6751_v49, 5  ;;  %v784_v60 = vrot.slane %v782_v33, 2  ;;  %v1157_v61 = vshrl.u32 %v993_v10, 16  ;;  %v1160_v49 = vshll.u32 %v993_v10, 16 }
  0xf9   : > { %2274 = vrot.lane.b32.xlu0 %v2239_v11, %s5845_s26  ;;  %v2244_v11 = vrot.slane %v6780_v57, 5  ;;  %824 = vst.msk [vmem:[#allocation3 + $0x80] sm:$0xff] %vm578_vm0, %v780_v22 }
  0xfa   : > { %v1442_v39 = vpop.permute.xlu1 %1441 }
  0xfb   : > { %v1440_v13 = vpop.permute.xlu0 %1439  ;;  %1489 = vst.msk [vmem:[#allocation3 + $0x38] sm:$0xff] %vm1481_vm10, %v1442_v39  ;;  %v2591_v0 = vld [vmem:[#allocation3 + $0x28] sm:$0xff]  ;;  %v2245_v4 = vsel %vm8862_vm3, %v2242_v53, %v2244_v11 }
  0xfc   : > { %1488 = vst.msk [vmem:[#allocation3 + $0x30] sm:$0xff] %vm1481_vm10, %v1440_v13  ;;  %5729 = vmatmul.mubr.msk.bf16.gmra.mrb[8].mxu0 %vm2647_vm5, %v2591_v0  ;;  %930 = vrot.lane.b32.xlu1 %v895_v41, %s5844_s25  ;;  %v898_v41 = vrot.slane %v6734_v24, 3  ;;  %v2243_v13 = vsel %vm8862_vm3, %v2240_v34, %v2242_v53  ;;  %v2484_v0 = vor.u32 %v2483_v62, %v2480_v14  ;;  %v1572_v14 = vrot.slane %v6780_v57, 4 }
  0xfd   : > { %2537 = vrot.lane.b32.xlu0 %v2467_v59, %s5850_s16  ;;  %v2096_v62 = vshll.u32 %v1930_v47, 16 }
  0xfe   : > { %v1591_v26 = vpop.permute.xlu1 %1590  ;;  %v899_v34 = vsel %vm864_vm2, %v896_v45, %v898_v41  ;;  %v2485_v17 = vsel %vm8861_vm6, %v6758_v18, %v2484_v0  ;;  %v1412_v18 = vrot.slane %v6796_v48, 3 }
  0xff   : > { %v1589_v43 = vpop.permute.xlu0 %1588  ;;  %1638 = vst.msk [vmem:[#allocation3 + $0x38] sm:$0xff] %vm1630_vm11, %v1591_v26  ;;  %v900_v26 = vrot.slane %v844_v38, 3 }
 0x100   : > { %1637 = vst.msk [vmem:[#allocation3 + $0x30] sm:$0xff] %vm1630_vm11, %v1589_v43  ;;  %932 = vrot.lane.b32.xlu1 %v897_v25, %s5844_s25  ;;  %v2489_v25 = vrot.slane %v6796_v48, 5  ;;  %v1159_v43 = vrot.slane %v1157_v61, 3 }
 0x101   : > { %2539 = vrot.lane.b32.xlu0 %v2476_v12, %s5850_s16 }
 0x102   : > { %v1854_v23 = vpop.permute.xlu1 %1853  ;;  %v6866_v9 = vor.u32 %v2492_v2, %v2489_v25 }
 0x103   : > { %v1852_v40 = vpop.permute.xlu0 %1851  ;;  %1901 = vst.msk [vmem:[#allocation3 + $0x38] sm:$0xff] %vm8869_vm12, %v1854_v23  ;;  %vm8871_vm12 = vcmask 458112   ;;  %v1419_v23 = vshrl.u32 %v1256_v35, 16 }
 0x104   : > { %1900 = vst.msk [vmem:[#allocation3 + $0x30] sm:$0xff] %vm8870_vm13, %v1852_v40  ;;  %1195 = vrot.lane.b32.xlu1 %v1146_v37, %s5846_s29  ;;  %vm8872_vm13 = vmmov %vm8871_vm12  ;;  %v1422_v40 = vshll.u32 %v1256_v35, 16 }
 0x105   : > { %1193 = vrot.lane.b32.xlu0 %v6670_v56, %s5846_s29  ;;  %v1571_v56 = vsel %vm1538_vm1, %v1568_v50, %v1570_v7  ;;  %v1421_v36 = vrot.slane %v1419_v23, 3 }
 0x106   : > { %v2116_v20 = vpop.permute.xlu1 %2115  ;;  %v1424_v52 = vrot.slane %v1422_v40, 4 }
 0x107   : > { %v2114_v21 = vpop.permute.xlu0 %2113  ;;  %2163 = vst.msk [vmem:[#allocation3 + $0x38] sm:$0xff] %vm8871_vm12, %v2116_v20  ;;  %vm8873_vm12 = vsmask.f32 3328  ;;  %v5851_v20 = vmov 0  }
 0x108   : > { %2162 = vst.msk [vmem:[#allocation3 + $0x30] sm:$0xff] %vm8872_vm13, %v2114_v21  ;;  %1457 = vrot.lane.b32.xlu1 %v6792_v1, %s5847_s9  ;;  %v1820_v32 = vsel %vm8873_vm12, %v6698_v44, %v1819_v31  ;;  %vm8874_vm13 = vmmov %vm8873_vm12  ;;  %vm8859_vm12 = vcmask 60416   ;;  %v1415_v21 = vrot.slane %v6799_v19, 4 }
 0x109   : > { %1455 = vrot.lane.b32.xlu0 %v1146_v37, %s5847_s9  ;;  %v6832_v44 = vsel %vm8874_vm13, %v1819_v31, %v6820_v54  ;;  %v1162_v37 = vrot.slane %v1160_v49, 4  ;;  %vm3048_vm13 = vcmask 64516   ;;  %3045 = vst.msk [vmem:[#allocation4] sm:$0xff] %vm578_vm0, %v5851_v20  ;;  %3050 = vst.msk [vmem:[#allocation4 + $0xa0] sm:$0xff] %vm578_vm0, %v5851_v20 }
 0x10a   : > { %v2265_v29 = vpop.permute.xlu1 %2264  ;;  %3047 = vst.msk [vmem:[#allocation4 + $0x8] sm:$0xf] %vm8859_vm12, %v5851_v20  ;;  %v1416_v48 = vor.u32 %v1415_v21, %v1412_v18  ;;  %vm8875_vm12 = vcmask 392512  }
 0x10b   : > { %v2263_v5 = vpop.permute.xlu0 %2262  ;;  %2312 = vst.msk [vmem:[#allocation3 + $0x38] sm:$0xff] %vm2304_vm14, %v2265_v29  ;;  %v1163_v31 = vor.u32 %v1162_v37, %v1159_v43 }
 0x10c   : > { %2311 = vst.msk [vmem:[#allocation3 + $0x30] sm:$0xff] %vm2304_vm14, %v2263_v5  ;;  %1606 = vrot.lane.b32.xlu1 %v1571_v56, %s5843_s24  ;;  %v901_v56 = vsel %vm864_vm2, %v898_v41, %v900_v26  ;;  %v1667_v5 = vld [vmem:[#allocation2 + $0x98] sm:$0x1f]  ;;  %v1417_v38 = vsel %vm994_vm4, %v6778_v16, %v1416_v48  ;;  %v2192_v26 = vld [vmem:[#allocation2 + $0xa0] sm:$0x1f] }
 0x10d   : > { %1604 = vrot.lane.b32.xlu0 %v1569_v28, %s5843_s24  ;;  %3049 = vst.msk [vmem:[#allocation4 + $0x98] sm:$0xf0] %vm3048_vm13, %v5851_v20  ;;  %v2494_v28 = vsel %vm8861_vm6, %v2484_v0, %v6866_v9  ;;  %v1164_v19 = vsel %vm994_vm4, %v6778_v16, %v1163_v31  ;;  %v1831_v42 = vshrl.u32 %v1667_v5, 16  ;;  %v1834_v46 = vshll.u32 %v1667_v5, 16  ;;  %v2341_v0 = vld [vmem:[#allocation2 + $0xa0] sm:$0x3f] }
 0x10e   : > { %v919_v15 = vpop.permute.xlu1 %918  ;;  %v1573_v16 = vsel %vm1538_vm1, %v1570_v7, %v1572_v14  ;;  %v2508_v24 = vshll.u32 %v2341_v0, 16  ;;  %v2248_v23 = vrot.slane %v2192_v26, 5 }
 0x10f   : > { %v2526_v6 = vpop.permute.xlu0 %2525  ;;  %965 = vst.msk [vmem:[#allocation3 + $0x40] sm:$0xff] %vm956_vm8, %v919_v15  ;;  %v1425_v15 = vor.u32 %v1424_v52, %v1421_v36 }
 0x110   : > { %2574 = vst.msk [vmem:[#allocation3 + $0x30] sm:$0xff] %vm8863_vm15, %v2526_v6  ;;  %1869 = vrot.lane.b32.xlu1 %v1820_v32, %s5848_s12  ;;  %v6888_v6 = vld [vmem:[#allocation2 + $0x98] sm:$0xff]  ;;  %v2510_v20 = vrot.slane %v2508_v24, 6 }
 0x111   : > { %1867 = vrot.lane.b32.xlu0 %v6708_v27, %s5848_s12  ;;  %v787_v27 = vrot.slane %v785_v55, 3  ;;  %v2084_v10 = vshrl.u32 %v6888_v6, 16  ;;  %v2087_v55 = vshll.u32 %v6888_v6, 16  ;;  %v1426_v22 = vsel %vm994_vm4, %v1416_v48, %v1425_v15 }
 0x112   : > { %v921_v58 = vpop.permute.xlu1 %920  ;;  %v2246_v37 = vrot.slane %v6888_v6, 5 }
 0x113   : > { %v2528_v63 = vpop.permute.xlu0 %2527  ;;  %966 = vst.msk [vmem:[#allocation3 + $0x48] sm:$0xff] %vm956_vm8, %v921_v58  ;;  %v788_v39 = vor.u32 %v787_v27, %v784_v60  ;;  %v2093_v58 = vshrl.u32 %v1930_v47, 16  ;;  %v1836_v27 = vrot.slane %v1834_v46, 5  ;;  %v2086_v49 = vrot.slane %v2084_v10, 4 }
 0x114   : > { %2575 = vst.msk [vmem:[#allocation3 + $0x38] sm:$0xff] %vm8863_vm15, %v2528_v63  ;;  %2131 = vrot.lane.b32.xlu1 %v6832_v44, %s5849_s15  ;;  %v1833_v63 = vrot.slane %v1831_v42, 4  ;;  %v2498_v40 = vrot.slane %v2084_v10, 5  ;;  %v2249_v21 = vsel %vm8862_vm3, %v2246_v37, %v2248_v23  ;;  %v2247_v36 = vsel %vm8862_vm3, %v2244_v11, %v2246_v37 }
 0x115   : > { %2129 = vrot.lane.b32.xlu0 %v1820_v32, %s5849_s15  ;;  %v789_v12 = vsel %vm8860_vm7, %v779_v30, %v788_v39  ;;  %v1518_v30 = vld [vmem:[#allocation2 + $0x98] sm:$0xf]  ;;  %vm8876_vm7 = vmmov %vm8875_vm12  ;;  %v2095_v35 = vrot.slane %v2093_v58, 4 }
 0x116   : > { %v1184_v59 = vpop.permute.xlu1 %1183  ;;  %825 = vst.msk [vmem:[#allocation3 + $0x88] sm:$0xff] %vm578_vm0, %v789_v12  ;;  %v1574_v60 = vrot.slane %v1518_v30, 4  ;;  %v2505_v12 = vshrl.u32 %v2341_v0, 16 }
 0x117   : > { %v1182_v3 = vpop.permute.xlu0 %1181  ;;  %1229 = vst.msk [vmem:[#allocation3 + $0x48] sm:$0xff] %vm1219_vm9, %v1184_v59  ;;  %v2592_v8 = vld [vmem:[#allocation3 + $0x30] sm:$0xff]  ;;  %v1837_v59 = vor.u32 %v1836_v27, %v1833_v63 }
 0x118   : > { %1228 = vst.msk [vmem:[#allocation3 + $0x40] sm:$0xff] %vm1219_vm9, %v1182_v3  ;;  %5732 = vmatprep.mubr.msk.bf16.mxu0 %vm2647_vm5, %v2592_v8  ;;  %2280 = vrot.lane.b32.xlu1 %v2245_v4, %s5845_s26  ;;  %v2089_v4 = vrot.slane %v2087_v55, 5  ;;  %v1575_v39 = vsel %vm1538_vm1, %v1572_v14, %v1574_v60 }
 0x119   : > { %2278 = vrot.lane.b32.xlu0 %v2243_v13, %s5845_s26 }
 0x11a   : > { %v1446_v50 = vpop.permute.xlu1 %1445  ;;  %v2090_v2 = vor.u32 %v2089_v4, %v2086_v49 }
 0x11b   : > { %v1444_v51 = vpop.permute.xlu0 %1443  ;;  %1491 = vst.msk [vmem:[#allocation3 + $0x48] sm:$0xff] %vm1481_vm10, %v1446_v50  ;;  %v2593_v45 = vld [vmem:[#allocation3 + $0x38] sm:$0xff]  ;;  %v2501_v50 = vrot.slane %v2087_v55, 6 }
 0x11c   : > { %1490 = vst.msk [vmem:[#allocation3 + $0x40] sm:$0xff] %vm1481_vm10, %v1444_v51  ;;  %5733 = vmatmul.mubr.msk.bf16.gmra.mrb[12].mxu0 %vm2647_vm5, %v2593_v45  ;;  %934 = vrot.lane.b32.xlu1 %v899_v34, %s5844_s25 }
 0x11d   : > { %2541 = vrot.lane.b32.xlu0 %v2485_v17, %s5850_s16  ;;  %v2507_v17 = vrot.slane %v2505_v12, 5 }
 0x11e   : > { %v1595_v29 = vpop.permute.xlu1 %1594 }
 0x11f   : > { %v1593_v32 = vpop.permute.xlu0 %1592  ;;  %1640 = vst.msk [vmem:[#allocation3 + $0x48] sm:$0xff] %vm1630_vm11, %v1595_v29 }
 0x120   : > { %1639 = vst.msk [vmem:[#allocation3 + $0x40] sm:$0xff] %vm1630_vm11, %v1593_v32  ;;  %936 = vrot.lane.b32.xlu1 %v901_v56, %s5844_s25  ;;  %v2511_v56 = vor.u32 %v2510_v20, %v2507_v17 }
 0x121   : > { %2543 = vrot.lane.b32.xlu0 %v2494_v28, %s5850_s16 }
 0x122   : > { %v1858_v53 = vpop.permute.xlu1 %1857 }
 0x123   : > { %v1856_v33 = vpop.permute.xlu0 %1855  ;;  %1903 = vst.msk [vmem:[#allocation3 + $0x48] sm:$0xff] %vm8875_vm12, %v1858_v53 }
 0x124   : > { %1902 = vst.msk [vmem:[#allocation3 + $0x40] sm:$0xff] %vm8876_vm7, %v1856_v33  ;;  %1199 = vrot.lane.b32.xlu1 %v1164_v19, %s5846_s29  ;;  %vm8877_vm7 = vcmask 458112  }
 0x125   : > { %1197 = vrot.lane.b32.xlu0 %v6792_v1, %s5846_s29  ;;  %vm8878_vm12 = vmmov %vm8877_vm7  ;;  %v2098_v1 = vrot.slane %v2096_v62, 5 }
 0x126   : > { %v2120_v41 = vpop.permute.xlu1 %2119 }
 0x127   : > { %v2118_v61 = vpop.permute.xlu0 %2117  ;;  %2165 = vst.msk [vmem:[#allocation3 + $0x48] sm:$0xff] %vm8877_vm7, %v2120_v41  ;;  %v2099_v3 = vor.u32 %v2098_v1, %v2095_v35  ;;  %vm8879_vm7 = vsmask.f32 3328  ;;  %v226_v35 = vlaneseq }
 0x128   : > { %2164 = vst.msk [vmem:[#allocation3 + $0x40] sm:$0xff] %vm8878_vm12, %v2118_v61  ;;  %1461 = vrot.lane.b32.xlu1 %v1426_v22, %s5847_s9  ;;  %v1838_v8 = vsel %vm8879_vm7, %v6820_v54, %v1837_v59  ;;  %vm8880_vm12 = vmmov %vm8879_vm7  ;;  %v2091_v45 = vsel %vm8879_vm7, %v6820_v54, %v2090_v2 }
 0x129   : > { %1459 = vrot.lane.b32.xlu0 %v1417_v38, %s5847_s9  ;;  %v2100_v43 = vsel %vm8880_vm12, %v2090_v2, %v2099_v3  ;;  %vm8881_vm12 = vcmask 392512   ;;  %v6973_v59 = vshrl.u32 %v226_v35, 7 }
 0x12a   : > { %v2269_v13 = vpop.permute.xlu1 %2268  ;;  %vm8882_vm7 = vmmov %vm8881_vm12 }
 0x12b   : > { %v2267_v25 = vpop.permute.xlu0 %2266  ;;  %2314 = vst.msk [vmem:[#allocation3 + $0x48] sm:$0xff] %vm2304_vm14, %v2269_v13  ;;  %v229_v0 = vadd.s32 16, %v6973_v59  ;;  %v228_v26 = vadd.s32 8, %v6973_v59  ;;  %v263_v37 = vcvt.s32.f32 %v6973_v59 }
 0x12c   : > { %2313 = vst.msk [vmem:[#allocation3 + $0x40] sm:$0xff] %vm2304_vm14, %v2267_v25  ;;  %1610 = vrot.lane.b32.xlu1 %v1575_v39, %s5843_s24 }
 0x12d   : > { %1608 = vrot.lane.b32.xlu0 %v1573_v16, %s5843_s24  ;;  %v265_v12 = vcvt.s32.f32 %v229_v0  ;;  %v264_v23 = vcvt.s32.f32 %v228_v26 }
 0x12e   : > { %v923_v34 = vpop.permute.xlu1 %922 }
 0x12f   : > { %v2530_v7 = vpop.permute.xlu0 %2529  ;;  %967 = vst.msk [vmem:[#allocation3 + $0x50] sm:$0xff] %vm956_vm8, %v923_v34 }
 0x130   : > { %2576 = vst.msk [vmem:[#allocation3 + $0x40] sm:$0xff] %vm8863_vm15, %v2530_v7  ;;  %1873 = vrot.lane.b32.xlu1 %v1838_v8, %s5848_s12  ;;  %v230_v8 = vadd.s32 24, %v6973_v59 }
 0x131   : > { %1871 = vrot.lane.b32.xlu0 %v6832_v44, %s5848_s12  ;;  %v2502_v44 = vor.u32 %v2501_v50, %v2498_v40  ;;  %v301_v40 = vadd.f32 0.5, %v265_v12 }
 0x132   : > { %v925_v51 = vpop.permute.xlu1 %924 }
 0x133   : > { %v2532_v18 = vpop.permute.xlu0 %2531  ;;  %968 = vst.msk [vmem:[#allocation3 + $0x58] sm:$0xff] %vm956_vm8, %v925_v51  ;;  %v2512_v29 = vsel %vm8861_vm6, %v2502_v44, %v2511_v56  ;;  %v2503_v57 = vsel %vm8861_vm6, %v6866_v9, %v2502_v44  ;;  %vm8883_vm6 = vcmask 458112   ;;  %v299_v51 = vadd.f32 0.5, %v263_v37 }
 0x134   : > { %2577 = vst.msk [vmem:[#allocation3 + $0x48] sm:$0xff] %vm8863_vm15, %v2532_v18  ;;  %2135 = vrot.lane.b32.xlu1 %v2100_v43, %s5849_s15  ;;  %vm8884_vm3 = vmmov %vm8883_vm6  ;;  %v266_v43 = vcvt.s32.f32 %v230_v8  ;;  %v337_v18 = vmul.f32 0.055555556, %v301_v40  ;;  %v3514_v8 = vld [vmem:[#allocation4] sm:$0xf8] }
 0x135   : > { %2133 = vrot.lane.b32.xlu0 %v2091_v45, %s5849_s15  ;;  %v300_v45 = vadd.f32 0.5, %v264_v23 }
 0x136   : > { %v1188_v31 = vpop.permute.xlu1 %1187  ;;  %v302_v20 = vadd.f32 0.5, %v266_v43 }
 0x137   : > { %v1186_v52 = vpop.permute.xlu0 %1185  ;;  %1231 = vst.msk [vmem:[#allocation3 + $0x58] sm:$0xff] %vm1219_vm9, %v1188_v31  ;;  %v2594_v54 = vld [vmem:[#allocation3 + $0x40] sm:$0xff]  ;;  %v335_v31 = vmul.f32 0.055555556, %v299_v51 }
 0x138   : > { %1230 = vst.msk [vmem:[#allocation3 + $0x50] sm:$0xff] %vm1219_vm9, %v1186_v52  ;;  %5736 = vmatprep.mubr.msk.bf16.mxu0 %vm2647_vm5, %v2594_v54  ;;  %2284 = vrot.lane.b32.xlu1 %v2249_v21, %s5845_s26  ;;  %v338_v56 = vmul.f32 0.055555556, %v302_v20  ;;  %v373_v52 = vfloor.f32 %v337_v18 }
 0x139   : > { %2282 = vrot.lane.b32.xlu0 %v2247_v36, %s5845_s26  ;;  %v336_v36 = vmul.f32 0.055555556, %v300_v45  ;;  %v3142_v45 = vld [vmem:[#allocation4] sm:$0xfc] }
 0x13a   : > { %v1450_v28 = vpop.permute.xlu1 %1449 }
 0x13b   : > { %v1448_v5 = vpop.permute.xlu0 %1447  ;;  %1493 = vst.msk [vmem:[#allocation3 + $0x58] sm:$0xff] %vm1481_vm10, %v1450_v28  ;;  %v2595_v11 = vld [vmem:[#allocation3 + $0x48] sm:$0xff]  ;;  %v374_v28 = vfloor.f32 %v338_v56 }
 0x13c   : > { %1492 = vst.msk [vmem:[#allocation3 + $0x50] sm:$0xff] %vm1481_vm10, %v1448_v5  ;;  %5737 = vmatmul.mubr.msk.bf16.gmra.mrb[16].mxu0 %vm2647_vm5, %v2595_v11  ;;  %2547 = vrot.lane.b32.xlu1 %v2512_v29, %s5850_s16  ;;  %v372_v5 = vfloor.f32 %v336_v36  ;;  %v409_v11 = vmul.f32 18.0, %v373_v52 }
 0x13d   : > { %2545 = vrot.lane.b32.xlu0 %v2503_v57, %s5850_s16  ;;  %v371_v57 = vfloor.f32 %v335_v31  ;;  %v3537_v31 = vshll.u32 %v3514_v8, 16 }
 0x13e   : > { %v1599_v32 = vpop.permute.xlu1 %1598 }
 0x13f   : > { %v1597_v48 = vpop.permute.xlu0 %1596  ;;  %1642 = vst.msk [vmem:[#allocation3 + $0x58] sm:$0xff] %vm1630_vm11, %v1599_v32 }
 0x140   : > { %1641 = vst.msk [vmem:[#allocation3 + $0x50] sm:$0xff] %vm1630_vm11, %v1597_v48  ;;  %v6994_v48 = vadd.s32 48, %v6973_v59 }
 0x142   : > { %v1862_v19 = vpop.permute.xlu1 %1861 }
 0x143   : > { %v1860_v9 = vpop.permute.xlu0 %1859  ;;  %1905 = vst.msk [vmem:[#allocation3 + $0x58] sm:$0xff] %vm8881_vm12, %v1862_v19  ;;  %vm8887_vm12 = vcmask 458112  }
 0x144   : > { %1904 = vst.msk [vmem:[#allocation3 + $0x50] sm:$0xff] %vm8882_vm7, %v1860_v9  ;;  %v410_v9 = vmul.f32 18.0, %v374_v28 }
 0x146   : > { %v2124_v15 = vpop.permute.xlu1 %2123 }
 0x147   : > { %v2122_v42 = vpop.permute.xlu0 %2121  ;;  %2167 = vst.msk [vmem:[#allocation3 + $0x58] sm:$0xff] %vm8883_vm6, %v2124_v15  ;;  %v6998_v15 = vadd.s32 32, %v6973_v59 }
 0x148   : > { %2166 = vst.msk [vmem:[#allocation3 + $0x50] sm:$0xff] %vm8884_vm3, %v2122_v42  ;;  %vm8885_vm3 = vmmov %vm8882_vm7  ;;  %v407_v42 = vmul.f32 18.0, %v371_v57 }
 0x149   : > { %vm8886_vm6 = vmmov %vm8885_vm3 }
 0x14a   : > { %v2273_v46 = vpop.permute.xlu1 %2272  ;;  %vm8888_vm7 = vmmov %vm8887_vm12 }
 0x14b   : > { %v2271_v6 = vpop.permute.xlu0 %2270  ;;  %2316 = vst.msk [vmem:[#allocation3 + $0x58] sm:$0xff] %vm2304_vm14, %v2273_v46  ;;  %v408_v46 = vmul.f32 18.0, %v372_v5  ;;  %v3162_v5 = vshrl.u32 %v3142_v45, 16 }
 0x14c   : > { %2315 = vst.msk [vmem:[#allocation3 + $0x50] sm:$0xff] %vm2304_vm14, %v2271_v6  ;;  %v445_v6 = vsub.f32 %v265_v12, %v409_v11  ;;  %v3165_v11 = vshll.u32 %v3142_v45, 16 }
 0x14e   : > { %v927_v47 = vpop.permute.xlu1 %926 }
 0x14f   : > { %v2534_v53 = vpop.permute.xlu0 %2533  ;;  %969 = vst.msk [vmem:[#allocation3 + $0x60] sm:$0xff] %vm956_vm8, %v927_v47  ;;  %v7004_v47 = vld [vmem:[%s8852_s2] ss:$0 sm:$0xff] }
 0x150   : > { %2578 = vst.msk [vmem:[#allocation3 + $0x50] sm:$0xff] %vm8863_vm15, %v2534_v53 }
 0x152   : > { %v929_v30 = vpop.permute.xlu1 %928 }
 0x153   : > { %v2536_v33 = vpop.permute.xlu0 %2535  ;;  %970 = vst.msk [vmem:[#allocation3 + $0x68] sm:$0xff] %vm956_vm8, %v929_v30  ;;  %v269_v30 = vcvt.s32.f32 %v6994_v48 }
 0x154   : > { %2579 = vst.msk [vmem:[#allocation3 + $0x58] sm:$0xff] %vm8863_vm15, %v2536_v33  ;;  %v7008_v33 = vadd.s32 56, %v6973_v59 }
 0x156   : > { %v1192_v14 = vpop.permute.xlu1 %1191 }
 0x157   : > { %v1190_v10 = vpop.permute.xlu0 %1189  ;;  %1233 = vst.msk [vmem:[#allocation3 + $0x68] sm:$0xff] %vm1219_vm9, %v1192_v14  ;;  %v2596_v55 = vld [vmem:[#allocation3 + $0x50] sm:$0xff] }
 0x158   : > { %1232 = vst.msk [vmem:[#allocation3 + $0x60] sm:$0xff] %vm1219_vm9, %v1190_v10  ;;  %5740 = vmatprep.mubr.msk.bf16.mxu0 %vm2647_vm5, %v2596_v55  ;;  %v446_v55 = vsub.f32 %v266_v43, %v410_v9  ;;  %v3367_v9 = vld [vmem:[#allocation4] sm:$0xf8] }
 0x15a   : > { %v1454_v58 = vpop.permute.xlu1 %1453 }
 0x15b   : > { %v1452_v62 = vpop.permute.xlu0 %1451  ;;  %1495 = vst.msk [vmem:[#allocation3 + $0x68] sm:$0xff] %vm1481_vm10, %v1454_v58  ;;  %v2597_v22 = vld [vmem:[#allocation3 + $0x58] sm:$0xff]  ;;  %v267_v58 = vcvt.s32.f32 %v6998_v15 }
 0x15c   : > { %1494 = vst.msk [vmem:[#allocation3 + $0x60] sm:$0xff] %vm1481_vm10, %v1452_v62  ;;  %5741 = vmatmul.mubr.msk.bf16.gmra.mrb[20].mxu0 %vm2647_vm5, %v2597_v22  ;;  %v443_v22 = vsub.f32 %v263_v37, %v407_v42 }
 0x15e   : > { %v1603_v60 = vpop.permute.xlu1 %1602 }
 0x15f   : > { %v1601_v63 = vpop.permute.xlu0 %1600  ;;  %1644 = vst.msk [vmem:[#allocation3 + $0x68] sm:$0xff] %vm1630_vm11, %v1603_v60 }
 0x160   : > { %1643 = vst.msk [vmem:[#allocation3 + $0x60] sm:$0xff] %vm1630_vm11, %v1601_v63  ;;  %v444_v63 = vsub.f32 %v264_v23, %v408_v46  ;;  %v7047_v46 = vrot.slane %v3537_v31, 4 }
 0x162   : > { %v1866_v27 = vpop.permute.xlu1 %1865 }
 0x163   : > { %v1864_v41 = vpop.permute.xlu0 %1863  ;;  %1907 = vst.msk [vmem:[#allocation3 + $0x68] sm:$0xff] %vm8885_vm3, %v1866_v27 }
 0x164   : > { %1906 = vst.msk [vmem:[#allocation3 + $0x60] sm:$0xff] %vm8886_vm6, %v1864_v41  ;;  %vm8889_vm6 = vmmov %vm8885_vm3 }
 0x166   : > { %v2128_v38 = vpop.permute.xlu1 %2127 }
 0x167   : > { %v2126_v61 = vpop.permute.xlu0 %2125  ;;  %2169 = vst.msk [vmem:[#allocation3 + $0x68] sm:$0xff] %vm8887_vm12, %v2128_v38  ;;  %vm8890_vm12 = vmmov %vm8888_vm7  ;;  %v7016_v38 = vadd.s32 40, %v6973_v59 }
 0x168   : > { %2168 = vst.msk [vmem:[#allocation3 + $0x60] sm:$0xff] %vm8888_vm7, %v2126_v61 }
 0x169   : > { %v268_v26 = vcvt.s32.f32 %v7016_v38 }
 0x16a   : > { %v2277_v49 = vpop.permute.xlu1 %2276 }
 0x16b   : > { %v2275_v4 = vpop.permute.xlu0 %2274  ;;  %2318 = vst.msk [vmem:[#allocation3 + $0x68] sm:$0xff] %vm2304_vm14, %v2277_v49  ;;  %v304_v52 = vadd.f32 0.5, %v268_v26 }
 0x16c   : > { %2317 = vst.msk [vmem:[#allocation3 + $0x60] sm:$0xff] %vm2304_vm14, %v2275_v4 }
 0x16e   : > { %v931_v1 = vpop.permute.xlu1 %930 }
 0x16f   : > { %v2538_v39 = vpop.permute.xlu0 %2537  ;;  %971 = vst.msk [vmem:[#allocation3 + $0x70] sm:$0xff] %vm956_vm8, %v931_v1  ;;  %v305_v1 = vadd.f32 0.5, %v269_v30 }
 0x170   : > { %2580 = vst.msk [vmem:[#allocation3 + $0x60] sm:$0xff] %vm8863_vm15, %v2538_v39  ;;  %v270_v39 = vcvt.s32.f32 %v7008_v33 }
 0x172   : > { %v933_v13 = vpop.permute.xlu1 %932  ;;  %v306_v43 = vadd.f32 0.5, %v270_v39 }
 0x173   : > { %v2540_v16 = vpop.permute.xlu0 %2539  ;;  %972 = vst.msk [vmem:[#allocation3 + $0x78] sm:$0xff] %vm956_vm8, %v933_v13 }
 0x174   : > { %2581 = vst.msk [vmem:[#allocation3 + $0x68] sm:$0xff] %vm8863_vm15, %v2540_v16  ;;  %v342_v36 = vmul.f32 0.055555556, %v306_v43 }
 0x176   : > { %v1196_v25 = vpop.permute.xlu1 %1195 }
 0x177   : > { %v1194_v2 = vpop.permute.xlu0 %1193  ;;  %1235 = vst.msk [vmem:[#allocation3 + $0x78] sm:$0xff] %vm1219_vm9, %v1196_v25  ;;  %v2598_v3 = vld [vmem:[#allocation3 + $0x60] sm:$0xff]  ;;  %v303_v25 = vadd.f32 0.5, %v267_v58 }
 0x178   : > { %1234 = vst.msk [vmem:[#allocation3 + $0x70] sm:$0xff] %vm1219_vm9, %v1194_v2  ;;  %5744 = vmatprep.mubr.msk.bf16.mxu0 %vm2647_vm5, %v2598_v3 }
 0x179   : > { %v339_v20 = vmul.f32 0.055555556, %v303_v25  ;;  %v7070_v25 = vadd.s32 64, %v6973_v59 }
 0x17a   : > { %v1458_v24 = vpop.permute.xlu1 %1457 }
 0x17b   : > { %v1456_v34 = vpop.permute.xlu0 %1455  ;;  %1497 = vst.msk [vmem:[#allocation3 + $0x78] sm:$0xff] %vm1481_vm10, %v1458_v24  ;;  %v2599_v7 = vld [vmem:[#allocation3 + $0x68] sm:$0xff]  ;;  %v375_v57 = vfloor.f32 %v339_v20  ;;  %v271_v33 = vcvt.s32.f32 %v7070_v25 }
 0x17c   : > { %1496 = vst.msk [vmem:[#allocation3 + $0x70] sm:$0xff] %vm1481_vm10, %v1456_v34  ;;  %5745 = vmatmul.mubr.msk.bf16.gmra.mrb[24].mxu0 %vm2647_vm5, %v2599_v7  ;;  %v341_v7 = vmul.f32 0.055555556, %v305_v1 }
 0x17e   : > { %v1607_v50 = vpop.permute.xlu1 %1606  ;;  %v377_v28 = vfloor.f32 %v341_v7 }
 0x17f   : > { %v1605_v17 = vpop.permute.xlu0 %1604  ;;  %1646 = vst.msk [vmem:[#allocation3 + $0x78] sm:$0xff] %vm1630_vm11, %v1607_v50 }
 0x180   : > { %1645 = vst.msk [vmem:[#allocation3 + $0x70] sm:$0xff] %vm1630_vm11, %v1605_v17 }
 0x182   : > { %v1870_v21 = vpop.permute.xlu1 %1869 }
 0x183   : > { %v1868_v44 = vpop.permute.xlu0 %1867  ;;  %1909 = vst.msk [vmem:[#allocation3 + $0x78] sm:$0xff] %vm8885_vm3, %v1870_v21  ;;  %vm481_vm3 = vcmp.lt.f32.partialorder %v445_v6, 15.5  ;;  %v3534_v21 = vshrl.u32 %v3514_v8, 16  ;;  %v378_v6 = vfloor.f32 %v342_v36  ;;  %v7094_v36 = vadd.s32 88, %v6973_v59 }
 0x184   : > { %1908 = vst.msk [vmem:[#allocation3 + $0x70] sm:$0xff] %vm8889_vm6, %v1868_v44  ;;  %vm482_vm6 = vcmp.lt.f32.partialorder %v446_v55, 15.5  ;;  %v411_v55 = vmul.f32 18.0, %v375_v57 }
 0x185   : > { %v7045_v42 = vrot.slane %v3534_v21, 3 }
 0x186   : > { %v2132_v54 = vpop.permute.xlu1 %2131 }
 0x187   : > { %v2130_v29 = vpop.permute.xlu0 %2129  ;;  %2171 = vst.msk [vmem:[#allocation3 + $0x78] sm:$0xff] %vm8890_vm12, %v2132_v54  ;;  %vm479_vm12 = vcmp.lt.f32.partialorder %v443_v22, 15.5  ;;  %v7052_v22 = vrot.slane %v3165_v11, 3 }
 0x188   : > { %2170 = vst.msk [vmem:[#allocation3 + $0x70] sm:$0xff] %vm8888_vm7, %v2130_v29  ;;  %vm480_vm7 = vcmp.lt.f32.partialorder %v444_v63, 15.5 }
 0x18a   : > { %v2281_v32 = vpop.permute.xlu1 %2280 }
 0x18b   : > { %v2279_v19 = vpop.permute.xlu0 %2278  ;;  %2320 = vst.msk [vmem:[#allocation3 + $0x78] sm:$0xff] %vm2304_vm14, %v2281_v32 }
 0x18c   : > { %2319 = vst.msk [vmem:[#allocation3 + $0x70] sm:$0xff] %vm2304_vm14, %v2279_v19 }
 0x18e   : > { %v935_v53 = vpop.permute.xlu1 %934 }
 0x18f   : > { %v2542_v14 = vpop.permute.xlu0 %2541  ;;  %v5722_v10 = vpop.f32.mrb[0].mxu0  ;;  %973 = vst.msk [vmem:[#allocation3 + $0x80] sm:$0xff] %vm956_vm8, %v935_v53  ;;  %v340_v53 = vmul.f32 0.055555556, %v304_v52 }
 0x190   : > { %2582 = vst.msk [vmem:[#allocation3 + $0x70] sm:$0xff] %vm8863_vm15, %v2542_v14  ;;  %v2749_v62 = vadd.f32 %v5722_v10, %v7004_v47  ;;  %v2740_v60 = vpop.f32.mrb[1].mxu0  ;;  %v413_v10 = vmul.f32 18.0, %v377_v28 }
 0x191   : > { %v2741_v27 = vadd.f32 %v7004_v47, %v2740_v60  ;;  %v5723_v41 = vpop.f32.mrb[2].mxu0  ;;  %v3405_v60 = vrot.slane %v3367_v9, 3 }
 0x192   : > { %v2885_v61 = vmax.f32 %v2749_v62, 0.0  ;;  %v2752_v49 = vadd.f32 %v5723_v41, %v7004_v47  ;;  %v2743_v4 = vpop.f32.mrb[3].mxu0  ;;  %v937_v35 = vpop.permute.xlu1 %936  ;;  %v7050_v62 = vrot.slane %v3162_v5, 2  ;;  %v414_v41 = vmul.f32 18.0, %v378_v6 }
 0x193   : > { %v2883_v13 = vmax.f32 %v2741_v27, 0.0  ;;  %v2744_v16 = vadd.f32 %v7004_v47, %v2743_v4  ;;  %v2544_v0 = vpop.permute.xlu0 %2543  ;;  %974 = vst.msk [vmem:[#allocation3 + $0x88] sm:$0xff] %vm956_vm8, %v937_v35  ;;  %v3540_v27 = vor.u32 %v7047_v46, %v7045_v42 }
 0x194   : > { %v2886_v2 = vmax.f32 %v2752_v49, 0.0  ;;  %2583 = vst.msk [vmem:[#allocation3 + $0x78] sm:$0xff] %vm8863_vm15, %v2544_v0  ;;  %v2993_v12 = vsel %vm481_vm3, %v2885_v61, 0.0  ;;  %v376_v61 = vfloor.f32 %v340_v53  ;;  %v7058_v49 = vadd.s32 80, %v6973_v59 }
 0x195   : > { %v2884_v3 = vmax.f32 %v2744_v16, 0.0  ;;  %v2991_v37 = vsel %vm479_vm12, %v2883_v13, 0.0  ;;  %v7063_v13 = vsub.f32 %v269_v30, %v413_v10  ;;  %v7067_v16 = vsub.f32 %v267_v58, %v411_v55 }
 0x196   : > { %v2994_v24 = vsel %vm482_vm6, %v2886_v2, 0.0  ;;  %v1200_v34 = vpop.permute.xlu1 %1199  ;;  %v3168_v2 = vor.u32 %v7052_v22, %v7050_v62  ;;  %vm8893_vm6 = vcmask 458112   ;;  %v412_v21 = vmul.f32 18.0, %v376_v61 }
 0x197   : > { %v3028_v23 = vpack.c.bf16 %v2994_v24, %v2993_v12  ;;  %v2992_v40 = vsel %vm480_vm7, %v2884_v3, 0.0  ;;  %v1198_v50 = vpop.permute.xlu0 %1197  ;;  %1237 = vst.msk [vmem:[#allocation3 + $0x88] sm:$0xff] %vm1219_vm9, %v1200_v34  ;;  %v2600_v17 = vld [vmem:[#allocation3 + $0x70] sm:$0xff]  ;;  %vm8894_vm12 = vmmov %vm8893_vm6  ;;  %v273_v28 = vcvt.s32.f32 %v7058_v49  ;;  %vm485_vm7 = vcmp.lt.f32.partialorder %v7063_v13, 15.5 }
 0x198   : > { %v3027_v51 = vpack.c.bf16 %v2992_v40, %v2991_v37  ;;  %1236 = vst.msk [vmem:[#allocation3 + $0x80] sm:$0xff] %vm1219_vm9, %v1198_v50  ;;  %5748 = vmatprep.mubr.msk.bf16.mxu0 %vm2647_vm5, %v2600_v17  ;;  %v7110_v6 = vsub.f32 %v268_v26, %v412_v21  ;;  %v7113_v53 = vadd.s32 72, %v6973_v59  ;;  %v274_v55 = vcvt.s32.f32 %v7094_v36 }
 0x199   : > { %v7034_v18 = vrot.slane %v3028_v23, 4  ;;  %v7205_v49 = vadd.s32 104, %v6973_v59 }
 0x19a   : > { %v3069_v44 = vrot.slane %v3027_v51, 4  ;;  %v1462_v56 = vpop.permute.xlu1 %1461 }
 0x19b   : > { %v1460_v54 = vpop.permute.xlu0 %1459  ;;  %1499 = vst.msk [vmem:[#allocation3 + $0x88] sm:$0xff] %vm1481_vm10, %v1462_v56  ;;  %v2601_v29 = vld [vmem:[#allocation3 + $0x78] sm:$0xff]  ;;  %v7091_v56 = vsub.f32 %v270_v39, %v414_v41 }
 0x19c   : > { %v3071_v32 = vsel %vm1538_vm1, %v3069_v44, %v7034_v18  ;;  %3123 = vst.msk [vmem:[#allocation4 + $0x8] sm:$0xf0] %vm3048_vm13, %v3069_v44  ;;  %5749 = vmatmul.mubr.msk.bf16.gmra.mrb[28].mxu0 %vm2647_vm5, %v2601_v29  ;;  %vm8891_vm13 = vcmask 392512  }
 0x19d   : > { %1498 = vst.msk [vmem:[#allocation3 + $0x80] sm:$0xff] %vm1481_vm10, %v1460_v54  ;;  %vm8892_vm3 = vmmov %vm8891_vm13 }
 0x19e   : > { %3124 = vst.msk [vmem:[#allocation4 + $0x10] sm:$0xff] %vm578_vm0, %v3071_v32  ;;  %v1611_v19 = vpop.permute.xlu1 %1610 }
 0x19f   : > { %v1609_v14 = vpop.permute.xlu0 %1608  ;;  %1648 = vst.msk [vmem:[#allocation3 + $0x88] sm:$0xff] %vm1630_vm11, %v1611_v19 }
 0x1a0   : > { %1647 = vst.msk [vmem:[#allocation3 + $0x80] sm:$0xff] %vm1630_vm11, %v1609_v14 }
 0x1a2   : > { %v1874_v63 = vpop.permute.xlu1 %1873 }
 0x1a3   : > { %v1872_v4 = vpop.permute.xlu0 %1871  ;;  %1911 = vst.msk [vmem:[#allocation3 + $0x88] sm:$0xff] %vm8891_vm13, %v1874_v63  ;;  %v3368_v35 = vld [vmem:[#allocation4 + $0x8] sm:$0xff]  ;;  %vm483_vm13 = vcmp.lt.f32.partialorder %v7067_v16, 15.5 }
 0x1a4   : > { %v4036_v1 = vld [vmem:[#allocation4 + $0x8] sm:$0xf0]  ;;  %1910 = vst.msk [vmem:[#allocation3 + $0x80] sm:$0xff] %vm8892_vm3, %v1872_v4  ;;  %v3406_v3 = vrot.slane %v3368_v35, 3  ;;  %v3542_v48 = vshrl.u32 %v3368_v35, 16  ;;  %v3545_v30 = vshll.u32 %v3368_v35, 16 }
 0x1a5   : > { %v3775_v0 = vld [vmem:[#allocation4 + $0x8] sm:$0xf8]  ;;  %v7075_v8 = vld [vmem:[#allocation4 + $0x10] sm:$0xff]  ;;  %v4074_v12 = vrot.slane %v4036_v1, 4  ;;  %vm486_vm3 = vcmp.lt.f32.partialorder %v7091_v56, 15.5  ;;  %v309_v1 = vadd.f32 0.5, %v273_v28 }
 0x1a6   : > { %v3408_v24 = vrot.slane %v7075_v8, 3  ;;  %v4075_v15 = vrot.slane %v7075_v8, 4  ;;  %v3551_v58 = vshrl.u32 %v7075_v8, 16  ;;  %v3554_v34 = vshll.u32 %v7075_v8, 16  ;;  %v2136_v43 = vpop.permute.xlu1 %2135  ;;  %v4183_v50 = vld [vmem:[#allocation4 + $0x8] sm:$0xf0] }
 0x1a7   : > { %v3407_v7 = vsel %vm864_vm2, %v3405_v60, %v3406_v3  ;;  %v3544_v37 = vrot.slane %v3542_v48, 3  ;;  %v3547_v23 = vrot.slane %v3545_v30, 4  ;;  %v3795_v40 = vshrl.u32 %v3775_v0, 16  ;;  %v2134_v17 = vpop.permute.xlu0 %2133  ;;  %2173 = vst.msk [vmem:[#allocation3 + $0x88] sm:$0xff] %vm8893_vm6, %v2136_v43  ;;  %v3143_v39 = vld [vmem:[#allocation4 + $0x8] sm:$0xff]  ;;  %v3144_v60 = vld [vmem:[#allocation4 + $0x10] sm:$0xff] }
 0x1a8   : > { %3442 = vrot.lane.b32.xlu0 %v3407_v7, %s5844_s25  ;;  %v3409_v20 = vsel %vm864_vm2, %v3406_v3, %v3408_v24  ;;  %v3553_v51 = vrot.slane %v3551_v58, 3  ;;  %v3556_v45 = vrot.slane %v3554_v34, 4  ;;  %2172 = vst.msk [vmem:[#allocation3 + $0x80] sm:$0xff] %vm8894_vm12, %v2134_v17  ;;  %v3798_v31 = vshll.u32 %v3775_v0, 16 }
 0x1a9   : > { %3444 = vrot.lane.b32.xlu1 %v3409_v20, %s5844_s25  ;;  %v3548_v44 = vor.u32 %v3547_v23, %v3544_v37  ;;  %v4203_v54 = vshrl.u32 %v4183_v50, 16  ;;  %v4206_v29 = vshll.u32 %v4183_v50, 16  ;;  %v4076_v57 = vsel %vm1538_vm1, %v4074_v12, %v4075_v15 }
 0x1aa   : > { %v7096_v52 = vor.u32 %v3556_v45, %v3553_v51  ;;  %v2285_v5 = vpop.permute.xlu1 %2284  ;;  %v3797_v11 = vrot.slane %v3795_v40, 3  ;;  %v3800_v32 = vrot.slane %v3798_v31, 4  ;;  %v4213_v14 = vrot.slane %v3551_v58, 4 }
 0x1ab   : > { %v2283_v19 = vpop.permute.xlu0 %2282  ;;  %2322 = vst.msk [vmem:[#allocation3 + $0x88] sm:$0xff] %vm2304_vm14, %v2285_v5  ;;  %v4216_v10 = vrot.slane %v3554_v34, 5  ;;  %v4205_v63 = vrot.slane %v4203_v54, 4  ;;  %v4208_v38 = vrot.slane %v4206_v29, 5  ;;  %v3170_v26 = vshrl.u32 %v3143_v39, 16 }
 0x1ac   : > { %4111 = vrot.lane.b32.xlu0 %v4076_v57, %s5843_s24  ;;  %v3558_v9 = vsel %vm994_vm4, %v3548_v44, %v7096_v52  ;;  %2321 = vst.msk [vmem:[#allocation3 + $0x80] sm:$0xff] %vm2304_vm14, %v2283_v19  ;;  %v3173_v41 = vshll.u32 %v3143_v39, 16  ;;  %v3549_v61 = vsel %vm994_vm4, %v3540_v27, %v3548_v44  ;;  %v3801_v35 = vor.u32 %v3800_v32, %v3797_v11 }
 0x1ad   : > { %3705 = vrot.lane.b32.xlu1 %v3558_v9, %s5846_s29  ;;  %v307_v0 = vadd.f32 0.5, %v271_v33  ;;  %v272_v48 = vcvt.s32.f32 %v7113_v53  ;;  %v3172_v30 = vrot.slane %v3170_v26, 2  ;;  %v3179_v46 = vshrl.u32 %v3144_v60, 16 }
 0x1ae   : > { %v2548_v4 = vpop.permute.xlu1 %2547  ;;  %v3175_v42 = vrot.slane %v3173_v41, 3  ;;  %v7133_v34 = vor.u32 %v4216_v10, %v4213_v14  ;;  %v310_v7 = vadd.f32 0.5, %v274_v55  ;;  %v3182_v43 = vshll.u32 %v3144_v60, 16 }
 0x1af   : > { %v2546_v3 = vpop.permute.xlu0 %2545  ;;  %v5726_v12 = vpop.f32.mrb[4].mxu0  ;;  %2585 = vst.msk [vmem:[#allocation3 + $0x88] sm:$0xff] %vm8863_vm15, %v2548_v4  ;;  %v4209_v40 = vor.u32 %v4208_v38, %v4205_v63  ;;  %v3181_v17 = vrot.slane %v3179_v46, 2  ;;  %v3810_v21 = vsel %vm994_vm4, %v3801_v35, %v7096_v52  ;;  %v308_v29 = vadd.f32 0.5, %v272_v48 }
 0x1b0   : > { %3703 = vrot.lane.b32.xlu0 %v3549_v61, %s5846_s29  ;;  %2584 = vst.msk [vmem:[#allocation3 + $0x80] sm:$0xff] %vm8863_vm15, %v2546_v3  ;;  %v2765_v27 = vadd.f32 %v5726_v12, %v7004_v47  ;;  %v2756_v58 = vpop.f32.mrb[5].mxu0  ;;  %v3176_v50 = vor.u32 %v3175_v42, %v3172_v30  ;;  %v3184_v44 = vrot.slane %v3182_v43, 3  ;;  %vm8895_vm6 = vsmask.f32 5376 }
 0x1b1   : > { %v2757_v37 = vadd.f32 %v7004_v47, %v2756_v58  ;;  %v5727_v23 = vpop.f32.mrb[6].mxu0  ;;  %vm484_vm12 = vcmp.lt.f32.partialorder %v7110_v6, 15.5  ;;  %v345_v11 = vmul.f32 0.055555556, %v309_v1  ;;  %v343_v19 = vmul.f32 0.055555556, %v307_v0 }
 0x1b2   : > { %v2889_v20 = vmax.f32 %v2765_v27, 0.0  ;;  %v2768_v51 = vadd.f32 %v5727_v23, %v7004_v47  ;;  %v2759_v45 = vpop.f32.mrb[7].mxu0  ;;  %v3177_v57 = vsel %vm8895_vm6, %v3168_v2, %v3176_v50  ;;  %v7151_v32 = vor.u32 %v3184_v44, %v3181_v17  ;;  %v4444_v43 = vld [vmem:[#allocation4 + $0x10] sm:$0xf0] }
 0x1b3   : > { %v2887_v31 = vmax.f32 %v2757_v37, 0.0  ;;  %v2760_v54 = vadd.f32 %v7004_v47, %v2759_v45  ;;  %3349 = vst.msk [vmem:[#allocation3] sm:$0xff] %vm578_vm0, %v3177_v57  ;;  %v346_v9 = vmul.f32 0.055555556, %v310_v7  ;;  %vm8896_vm15 = vsmask.f32 3328 }
 0x1b4   : > { %3964 = vrot.lane.b32.xlu0 %v3810_v21, %s5847_s9  ;;  %v2890_v5 = vmax.f32 %v2768_v51, 0.0  ;;  %v2997_v14 = vsel %vm485_vm7, %v2889_v20, 0.0  ;;  %v4218_v62 = vsel %vm8896_vm15, %v4209_v40, %v7133_v34  ;;  %v3186_v2 = vsel %vm8895_vm6, %v3176_v50, %v7151_v32  ;;  %v4705_v37 = vld [vmem:[#allocation4 + $0x10] sm:$0xe0] }
 0x1b5   : > { %v2888_v39 = vmax.f32 %v2760_v54, 0.0  ;;  %v2995_v6 = vsel %vm483_vm13, %v2887_v31, 0.0  ;;  %v344_v13 = vmul.f32 0.055555556, %v308_v29  ;;  %3350 = vst.msk [vmem:[#allocation3 + $0x8] sm:$0xff] %vm578_vm0, %v3186_v2  ;;  %v381_v61 = vfloor.f32 %v345_v11 }
 0x1b6   : > { %v2998_v10 = vsel %vm486_vm3, %v2890_v5, 0.0  ;;  %v2603_v22 = vld [vmem:[#allocation3 + $0x88] sm:$0xff]  ;;  %v379_v4 = vfloor.f32 %v343_v19  ;;  %v382_v16 = vfloor.f32 %v346_v9  ;;  %v7170_v1 = vadd.s32 112, %v6973_v59  ;;  %v4852_v50 = vld [vmem:[#allocation4 + $0x10] sm:$0xe0] }
 0x1b7   : > { %v3030_v60 = vpack.c.bf16 %v2998_v10, %v2997_v14  ;;  %v2996_v63 = vsel %vm484_vm12, %v2888_v39, 0.0  ;;  %v2602_v38 = vld [vmem:[#allocation3 + $0x80] sm:$0xff]  ;;  %v380_v35 = vfloor.f32 %v344_v13  ;;  %v7177_v12 = vadd.s32 96, %v6973_v59 }
 0x1b8   : > { %4372 = vrot.lane.b32.xlu0 %v4218_v62, %s5848_s12  ;;  %v3029_v56 = vpack.c.bf16 %v2996_v63, %v2995_v6  ;;  %5752 = vmatprep.mubr.msk.bf16.mxu0 %vm2647_vm5, %v2602_v38  ;;  %v417_v30 = vmul.f32 18.0, %v381_v61  ;;  %v415_v42 = vmul.f32 18.0, %v379_v4  ;;  %v418_v46 = vmul.f32 18.0, %v382_v16 }
 0x1b9   : > { %v7166_v26 = vrot.slane %v3030_v60, 4  ;;  %5753 = vmatmul.mubr.msk.bf16.gmra.mrb[32].mxu0 %vm2647_vm5, %v2603_v22  ;;  %v416_v27 = vmul.f32 18.0, %v380_v35  ;;  %v277_v58 = vcvt.s32.f32 %v7170_v1  ;;  %v275_v7 = vcvt.s32.f32 %v7177_v12  ;;  %v5828_v22 = vld [vmem:[%s8853_s3] sm:$0xff]  }
 0x1ba   : > { %v3072_v41 = vrot.slane %v3029_v56, 4  ;;  %v7188_v23 = vsub.f32 %v273_v28, %v417_v30  ;;  %v7192_v40 = vsub.f32 %v271_v33, %v415_v42  ;;  %v7196_v17 = vsub.f32 %v274_v55, %v418_v46  ;;  %5756 = vmatprep.subr.bf16.mxu1 %v5828_v22 }
 0x1bb   : > { %v7200_v20 = vsub.f32 %v272_v48, %v416_v27  ;;  %v313_v51 = vadd.f32 0.5, %v277_v58  ;;  %v4464_v33 = vshrl.u32 %v4444_v43, 16  ;;  %v4467_v45 = vshll.u32 %v4444_v43, 16  ;;  %5757 = vmatpush3.bf16.msra.mxu1 %v5828_v22  ;;  %v5829_v43 = vld [vmem:[%s8853_s3 + $0x8] sm:$0xff]  }
 0x1bc   : > { %v3073_v0 = vsel %vm1538_vm1, %v7034_v18, %v3072_v41  ;;  %v3075_v3 = vsel %vm1538_vm1, %v3072_v41, %v7166_v26  ;;  %v7184_v18 = vadd.s32 120, %v6973_v59  ;;  %v311_v36 = vadd.f32 0.5, %v275_v7  ;;  %5758 = vmatprep.subr.bf16.mxu1 %v5829_v43 }
 0x1bd   : > { %3125 = vst.msk [vmem:[#allocation4 + $0x18] sm:$0xff] %vm578_vm0, %v3073_v0  ;;  %3126 = vst.msk [vmem:[#allocation4 + $0x20] sm:$0xff] %vm578_vm0, %v3075_v3  ;;  %v4743_v53 = vrot.slane %v4705_v37, 5  ;;  %v4872_v44 = vshrl.u32 %v4852_v50, 16  ;;  %v4875_v57 = vshll.u32 %v4852_v50, 16  ;;  %vm8897_vm15 = vcmask 1042432  }
 0x1be   : > { %v278_v55 = vcvt.s32.f32 %v7184_v18  ;;  %v276_v19 = vcvt.s32.f32 %v7205_v49  ;;  %v4466_v9 = vrot.slane %v4464_v33, 4  ;;  %v4469_v14 = vrot.slane %v4467_v45, 5  ;;  %vm8898_vm7 = vmmov %vm8897_vm15 }
 0x1bf   : > { %v4874_v13 = vrot.slane %v4872_v44, 5  ;;  %v4877_v56 = vrot.slane %v4875_v57, 6  ;;  %vm489_vm13 = vcmp.lt.f32.partialorder %v7188_v23, 15.5  ;;  %vm487_vm3 = vcmp.lt.f32.partialorder %v7192_v40, 15.5  ;;  %5759 = vmatpush3.bf16.msra.mxu1 %v5829_v43 }
 0x1c0   : > { %vm490_vm12 = vcmp.lt.f32.partialorder %v7196_v17, 15.5  ;;  %vm488_vm6 = vcmp.lt.f32.partialorder %v7200_v20, 15.5  ;;  %v7252_v0 = vmul.f32 0.055555556, %v313_v51  ;;  %v314_v3 = vadd.f32 0.5, %v278_v55  ;;  %v5830_v20 = vld [vmem:[%s8853_s3 + $0x10] sm:$0xff]  }
 0x1c1   : > { %v4470_v30 = vor.u32 %v4469_v14, %v4466_v9  ;;  %v7261_v37 = vmul.f32 0.055555556, %v311_v36  ;;  %v312_v50 = vadd.f32 0.5, %v276_v19  ;;  %5760 = vmatprep.subr.bf16.mxu1 %v5830_v20 }
 0x1c2   : > { %v7279_v8 = vmul.f32 0.055555556, %v314_v3 }
 0x1c3   : > { %v348_v40 = vmul.f32 0.055555556, %v312_v50  ;;  %5761 = vmatpush3.bf16.msra.mxu1 %v5830_v20 }
 0x1c4   : > { %v7207_v28 = vld [vmem:[#allocation4 + $0x18] sm:$0xff]  ;;  %v7209_v25 = vld [vmem:[#allocation4 + $0x20] sm:$0xff] }
 0x1c5   : > { %v4744_v48 = vrot.slane %v7207_v28, 5  ;;  %v4077_v21 = vrot.slane %v7207_v28, 4  ;;  %v4079_v31 = vrot.slane %v7209_v25, 4  ;;  %v4472_v54 = vshrl.u32 %v7207_v28, 16  ;;  %v3145_v51 = vld [vmem:[#allocation4 + $0x18] sm:$0xff]  ;;  %v3146_v22 = vld [vmem:[#allocation4 + $0x20] sm:$0xff] }
 0x1c6   : > { %v4475_v29 = vshll.u32 %v7207_v28, 16  ;;  %v4746_v39 = vrot.slane %v7209_v25, 5  ;;  %v7234_v60 = vshll.u32 %v7209_v25, 16  ;;  %v3410_v38 = vrot.slane %v7207_v28, 3 }
 0x1c7   : > { %v4745_v5 = vsel %vm8897_vm15, %v4743_v53, %v4744_v48  ;;  %v4078_v11 = vsel %vm1538_vm1, %v4075_v15, %v4077_v21  ;;  %v4474_v10 = vrot.slane %v4472_v54, 4  ;;  %v4882_v2 = vrot.slane %v4472_v54, 5 }
 0x1c8   : > { %4780 = vrot.lane.b32.xlu0 %v4745_v5, %s5845_s26  ;;  %4113 = vrot.lane.b32.xlu1 %v4078_v11, %s5843_s24  ;;  %v4477_v62 = vrot.slane %v4475_v29, 5  ;;  %v4885_v6 = vrot.slane %v4475_v29, 6  ;;  %v7231_v15 = vshrl.u32 %v7209_v25, 16  ;;  %v4080_v63 = vsel %vm1538_vm1, %v4077_v21, %v4079_v31 }
 0x1c9   : > { %v4747_v41 = vsel %vm8898_vm7, %v4744_v48, %v4746_v39  ;;  %v3814_v4 = vrot.slane %v4472_v54, 3  ;;  %v3817_v16 = vrot.slane %v4475_v29, 4  ;;  %v3412_v35 = vrot.slane %v7209_v25, 3 }
 0x1ca   : > { %v7245_v61 = vor.u32 %v4477_v62, %v4474_v10  ;;  %v4886_v42 = vor.u32 %v4885_v6, %v4882_v2  ;;  %v4891_v46 = vrot.slane %v7231_v15, 5  ;;  %v4894_v27 = vrot.slane %v7234_v60, 6 }
 0x1cb   : > { %vm8899_vm15 = vsmask.f32 3328  ;;  %v3411_v45 = vsel %vm864_vm2, %v3408_v24, %v3410_v38  ;;  %v4878_v53 = vor.u32 %v4877_v56, %v4874_v13  ;;  %v7270_v48 = vor.u32 %v3817_v16, %v3814_v4 }
 0x1cc   : > { %4115 = vrot.lane.b32.xlu0 %v4080_v63, %s5843_s24  ;;  %4782 = vrot.lane.b32.xlu1 %v4747_v41, %s5845_s26  ;;  %v4479_v33 = vsel %vm8899_vm15, %v4470_v30, %v7245_v61  ;;  %v3413_v44 = vsel %vm864_vm2, %v3410_v38, %v3412_v35  ;;  %v3823_v54 = vrot.slane %v7231_v15, 3  ;;  %vm8900_vm7 = vsmask.f32 2304 }
 0x1cd   : > { %v4887_v57 = vsel %vm8900_vm7, %v4878_v53, %v4886_v42  ;;  %v7283_v5 = vor.u32 %v4894_v27, %v4891_v46  ;;  %v3188_v11 = vshrl.u32 %v3145_v51, 16  ;;  %v3826_v62 = vrot.slane %v7234_v60, 4  ;;  %vm8901_vm15 = vmmov %vm8900_vm7 }
 0x1ce   : > { %v3819_v63 = vsel %vm994_vm4, %v7096_v52, %v7270_v48  ;;  %v4483_v38 = vrot.slane %v7231_v15, 4  ;;  %v4486_v56 = vrot.slane %v7234_v60, 5  ;;  %v3191_v4 = vshll.u32 %v3145_v51, 16 }
 0x1cf   : > { %v5730_v28 = vpop.f32.mrb[8].mxu0  ;;  %v3190_v41 = vrot.slane %v3188_v11, 2  ;;  %v4896_v3 = vsel %vm8901_vm15, %v4886_v42, %v7283_v5  ;;  %v3197_v30 = vshrl.u32 %v3146_v22, 16  ;;  %v3200_v46 = vshll.u32 %v3146_v22, 16 }
 0x1d0   : > { %v2781_v21 = vadd.f32 %v5730_v28, %v7004_v47  ;;  %v2772_v36 = vpop.f32.mrb[9].mxu0  ;;  %4633 = vrot.lane.b32.xlu0 %v4479_v33, %s5849_s15  ;;  %3446 = vrot.lane.b32.xlu1 %v3411_v45, %s5844_s25  ;;  %v3193_v43 = vrot.slane %v3191_v4, 3  ;;  %v386_v11 = vfloor.f32 %v7279_v8  ;;  %vm8906_vm7 = vcmask 1042432  }
 0x1d1   : > { %v2773_v24 = vadd.f32 %v7004_v47, %v2772_v36  ;;  %v5731_v29 = vpop.f32.mrb[10].mxu0  ;;  %v3199_v51 = vrot.slane %v3197_v30, 2  ;;  %v3202_v33 = vrot.slane %v3200_v46, 3  ;;  %v7317_v36 = vor.u32 %v3826_v62, %v3823_v54 }
 0x1d2   : > { %v2893_v9 = vmax.f32 %v2781_v21, 0.0  ;;  %v2784_v14 = vadd.f32 %v5731_v29, %v7004_v47  ;;  %v2775_v10 = vpop.f32.mrb[11].mxu0  ;;  %v3194_v42 = vor.u32 %v3193_v43, %v3190_v41  ;;  %v383_v54 = vfloor.f32 %v7261_v37 }
 0x1d3   : > { %v2891_v2 = vmax.f32 %v2773_v24, 0.0  ;;  %v2776_v6 = vadd.f32 %v7004_v47, %v2775_v10  ;;  %v7312_v53 = vor.u32 %v3202_v33, %v3199_v51  ;;  %v7321_v24 = vor.u32 %v4486_v56, %v4483_v38 }
 0x1d4   : > { %v2894_v13 = vmax.f32 %v2784_v14, 0.0  ;;  %5041 = vrot.lane.b32.xlu0 %v4887_v57, %s5850_s16  ;;  %3448 = vrot.lane.b32.xlu1 %v3413_v44, %s5844_s25  ;;  %v3001_v52 = vsel %vm489_vm13, %v2893_v9, 0.0  ;;  %vm8902_vm13 = vsmask.f32 3328  ;;  %v7338_v57 = vadd.s32 144, %v6973_v59 }
 0x1d5   : > { %v2892_v16 = vmax.f32 %v2776_v6, 0.0  ;;  %v2999_v15 = vsel %vm487_vm3, %v2891_v2, 0.0  ;;  %v4227_v23 = vsel %vm8902_vm13, %v7133_v34, %v7245_v61  ;;  %vm8903_vm3 = vsmask.f32 5376 }
 0x1d6   : > { %v3002_v27 = vsel %vm490_vm12, %v2894_v13, 0.0  ;;  %v3195_v44 = vsel %vm8903_vm3, %v7151_v32, %v3194_v42  ;;  %vm8904_vm12 = vmmov %vm8903_vm3  ;;  %v385_v32 = vfloor.f32 %v7252_v0  ;;  %v384_v9 = vfloor.f32 %v348_v40  ;;  %v5832_v0 = vld [vmem:[%s8853_s3 + $0x20] ss:$0 sps:$4 sm:$0xff]  }
 0x1d7   : > { %v3032_v28 = vpack.c.bf16 %v3002_v27, %v3001_v52  ;;  %v3000_v60 = vsel %vm488_vm6, %v2892_v16, 0.0  ;;  %3351 = vst.msk [vmem:[#allocation3 + $0x10] sm:$0xff] %vm578_vm0, %v3195_v44  ;;  %v3204_v34 = vsel %vm8904_vm12, %v3194_v42, %v7312_v53  ;;  %v3828_v37 = vsel %vm994_vm4, %v7270_v48, %v7317_v36  ;;  %vm8905_vm6 = vmmov %vm8902_vm13 }
 0x1d8   : > { %v3031_v45 = vpack.c.bf16 %v3000_v60, %v2999_v15  ;;  %5043 = vrot.lane.b32.xlu0 %v4896_v3, %s5850_s16  ;;  %3966 = vrot.lane.b32.xlu1 %v3819_v63, %s5847_s9  ;;  %3352 = vst.msk [vmem:[#allocation3 + $0x18] sm:$0xff] %vm578_vm0, %v3204_v34  ;;  %v4488_v14 = vsel %vm8905_vm6, %v7245_v61, %v7321_v24  ;;  %v421_v10 = vmul.f32 18.0, %v385_v32  ;;  %v419_v8 = vmul.f32 18.0, %v383_v54  ;;  %vm8907_vm13 = vmmov %vm8906_vm7 }
 0x1d9   : > { %v7310_v17 = vrot.slane %v3032_v28, 4  ;;  %v281_v62 = vcvt.s32.f32 %v7338_v57  ;;  %v422_v22 = vmul.f32 18.0, %v386_v11  ;;  %v5265_v2 = vsel %vm1538_vm1, %v5832_v0, 0 }
 0x1da   : > { %v3076_v21 = vrot.slane %v3031_v45, 4  ;;  %v420_v48 = vmul.f32 18.0, %v384_v9  ;;  %v7370_v38 = vsub.f32 %v275_v7, %v419_v8  ;;  %v7373_v13 = vadd.s32 128, %v6973_v59 }
 0x1db   : > { %v317_v4 = vadd.f32 0.5, %v281_v62  ;;  %v7380_v16 = vadd.s32 152, %v6973_v59  ;;  %v7387_v7 = vsub.f32 %v278_v55, %v422_v22 }
 0x1dc   : > { %v3077_v50 = vsel %vm1538_vm1, %v7166_v26, %v3076_v21  ;;  %v3079_v29 = vsel %vm1538_vm1, %v3076_v21, %v7310_v17  ;;  %3707 = vrot.lane.b32.xlu0 %v3819_v63, %s5846_s29  ;;  %4374 = vrot.lane.b32.xlu1 %v4227_v23, %s5848_s12  ;;  %v5831_v26 = vld [vmem:[%s8853_s3 + $0x18] sm:$0xff]   ;;  %v7366_v63 = vsub.f32 %v277_v58, %v421_v10  ;;  %v279_v15 = vcvt.s32.f32 %v7373_v13 }
 0x1dd   : > { %3127 = vst.msk [vmem:[#allocation4 + $0x28] sm:$0xff] %vm578_vm0, %v3077_v50  ;;  %3128 = vst.msk [vmem:[#allocation4 + $0x30] sm:$0xff] %vm578_vm0, %v3079_v29  ;;  %5762 = vmatprep.subr.bf16.mxu1 %v5831_v26  ;;  %v7398_v52 = vsub.f32 %v276_v19, %v420_v48  ;;  %v7412_v49 = vmul.f32 0.055555556, %v317_v4  ;;  %v282_v19 = vcvt.s32.f32 %v7380_v16  ;;  %vm491_vm3 = vcmp.lt.f32.partialorder %v7370_v38, 15.5 }
 0x1de   : > { %5763 = vmatpush3.bf16.msra.mxu1 %v5831_v26  ;;  %vm493_vm15 = vcmp.lt.f32.partialorder %v7366_v63, 15.5  ;;  %v315_v21 = vadd.f32 0.5, %v279_v15  ;;  %vm494_vm12 = vcmp.lt.f32.partialorder %v7387_v7, 15.5 }
 0x1df   : > { %5803 = vmatprep.subr.msk.bf16.mxu1 %vm1538_vm1, %v5832_v0  ;;  %v318_v50 = vadd.f32 0.5, %v282_v19  ;;  %vm492_vm6 = vcmp.lt.f32.partialorder %v7398_v52, 15.5  ;;  %v389_v9 = vfloor.f32 %v7412_v49 }
 0x1e0   : > { %3968 = vrot.lane.b32.xlu0 %v3828_v37, %s5847_s9  ;;  %4635 = vrot.lane.b32.xlu1 %v4488_v14, %s5849_s15  ;;  %v7452_v10 = vmul.f32 0.055555556, %v315_v21 }
 0x1e2   : > { %5765 = vmatpush3.bf16.msra.mxu1 %v5265_v2  ;;  %v7461_v2 = vmul.f32 0.055555556, %v318_v50 }
 0x1e4   : > { %4376 = vrot.lane.b32.xlu0 %v4488_v14, %s5848_s12  ;;  %3709 = vrot.lane.b32.xlu1 %v3828_v37, %s5846_s29  ;;  %v7360_v61 = vld [vmem:[#allocation4 + $0x28] sm:$0xff]  ;;  %v7362_v6 = vld [vmem:[#allocation4 + $0x30] sm:$0xff] }
 0x1e5   : > { %v4748_v56 = vrot.slane %v7360_v61, 5  ;;  %v4081_v41 = vrot.slane %v7360_v61, 4  ;;  %v4083_v1 = vrot.slane %v7362_v6, 4  ;;  %v4490_v12 = vshrl.u32 %v7360_v61, 16  ;;  %v3147_v4 = vld [vmem:[#allocation4 + $0x28] sm:$0xff] }
 0x1e6   : > { %v4493_v58 = vshll.u32 %v7360_v61, 16  ;;  %v4750_v46 = vrot.slane %v7362_v6, 5  ;;  %v7407_v27 = vshrl.u32 %v7362_v6, 16  ;;  %v3414_v28 = vrot.slane %v7360_v61, 3 }
 0x1e7   : > { %v4749_v3 = vsel %vm8906_vm7, %v4746_v39, %v4748_v56  ;;  %v4082_v30 = vsel %vm1538_vm1, %v4079_v31, %v4081_v41  ;;  %v4492_v18 = vrot.slane %v4490_v12, 4  ;;  %v7404_v39 = vadd.s32 136, %v6973_v59 }
 0x1e8   : > { %4784 = vrot.lane.b32.xlu0 %v4749_v3, %s5845_s26  ;;  %4117 = vrot.lane.b32.xlu1 %v4082_v30, %s5843_s24  ;;  %v4495_v55 = vrot.slane %v4493_v58, 5  ;;  %v7410_v31 = vshll.u32 %v7362_v6, 16  ;;  %v4084_v43 = vsel %vm1538_vm1, %v4081_v41, %v4083_v1  ;;  %v4900_v60 = vrot.slane %v4490_v12, 5 }
 0x1e9   : > { %v4903_v51 = vrot.slane %v4493_v58, 6  ;;  %v4751_v33 = vsel %vm8907_vm13, %v4748_v56, %v4750_v46  ;;  %v3832_v23 = vrot.slane %v4490_v12, 3  ;;  %v3835_v40 = vrot.slane %v4493_v58, 4 }
 0x1ea   : > { %v7423_v45 = vor.u32 %v4495_v55, %v4492_v18  ;;  %v4909_v42 = vrot.slane %v7407_v27, 5  ;;  %v4912_v20 = vrot.slane %v7410_v31, 6  ;;  %v280_v44 = vcvt.s32.f32 %v7404_v39  ;;  %v3148_v18 = vld [vmem:[#allocation4 + $0x30] sm:$0xff] }
 0x1eb   : > { %v3416_v34 = vrot.slane %v7362_v6, 3  ;;  %v4904_v29 = vor.u32 %v4903_v51, %v4900_v60  ;;  %vm8908_vm7 = vsmask.f32 3328  ;;  %v3415_v26 = vsel %vm864_vm2, %v3412_v35, %v3414_v28 }
 0x1ec   : > { %4119 = vrot.lane.b32.xlu0 %v4084_v43, %s5843_s24  ;;  %4786 = vrot.lane.b32.xlu1 %v4751_v33, %s5845_s26  ;;  %v4497_v54 = vsel %vm8908_vm7, %v7321_v24, %v7423_v45  ;;  %v7444_v11 = vor.u32 %v3835_v40, %v3832_v23  ;;  %v7450_v14 = vor.u32 %v4912_v20, %v4909_v42  ;;  %v316_v25 = vadd.f32 0.5, %v280_v44 }
 0x1ed   : > { %v3417_v8 = vsel %vm864_vm2, %v3414_v28, %v3416_v34  ;;  %v3841_v22 = vrot.slane %v7407_v27, 3  ;;  %vm8909_vm13 = vsmask.f32 2304  ;;  %v3844_v30 = vrot.slane %v7410_v31, 4 }
 0x1ee   : > { %v4905_v41 = vsel %vm8909_vm13, %v7283_v5, %v4904_v29  ;;  %v3837_v3 = vsel %vm994_vm4, %v7317_v36, %v7444_v11  ;;  %vm8910_vm7 = vmmov %vm8909_vm13  ;;  %v4501_v5 = vrot.slane %v7407_v27, 4  ;;  %v4504_v28 = vrot.slane %v7410_v31, 5 }
 0x1ef   : > { %v5734_v32 = vpop.f32.mrb[12].mxu0  ;;  %v4914_v43 = vsel %vm8910_vm7, %v4904_v29, %v7450_v14  ;;  %v3206_v36 = vshrl.u32 %v3147_v4, 16  ;;  %v3209_v51 = vshll.u32 %v3147_v4, 16  ;;  %v3215_v40 = vshrl.u32 %v3148_v18, 16 }
 0x1f0   : > { %v2797_v0 = vadd.f32 %v5734_v32, %v7004_v47  ;;  %v2788_v37 = vpop.f32.mrb[13].mxu0  ;;  %4637 = vrot.lane.b32.xlu0 %v4497_v54, %s5849_s15  ;;  %3450 = vrot.lane.b32.xlu1 %v3415_v26, %s5844_s25  ;;  %v3218_v42 = vshll.u32 %v3148_v18, 16  ;;  %v7489_v26 = vor.u32 %v3844_v30, %v3841_v22  ;;  %v7542_v30 = vadd.s32 184, %v6973_v59 }
 0x1f1   : > { %v2789_v35 = vadd.f32 %v7004_v47, %v2788_v37  ;;  %v5735_v24 = vpop.f32.mrb[14].mxu0  ;;  %v3208_v21 = vrot.slane %v3206_v36, 2  ;;  %v3211_v31 = vrot.slane %v3209_v51, 3  ;;  %v3217_v63 = vrot.slane %v3215_v40, 2 }
 0x1f2   : > { %v2897_v48 = vmax.f32 %v2797_v0, 0.0  ;;  %v2800_v61 = vadd.f32 %v5735_v24, %v7004_v47  ;;  %v2791_v56 = vpop.f32.mrb[15].mxu0  ;;  %v3220_v29 = vrot.slane %v3218_v42, 3  ;;  %v7493_v37 = vor.u32 %v4504_v28, %v4501_v5 }
 0x1f3   : > { %v2895_v12 = vmax.f32 %v2789_v35, 0.0  ;;  %v2792_v58 = vadd.f32 %v7004_v47, %v2791_v56  ;;  %v3212_v32 = vor.u32 %v3211_v31, %v3208_v21  ;;  %v7525_v56 = vadd.s32 160, %v6973_v59 }
 0x1f4   : > { %v2898_v55 = vmax.f32 %v2800_v61, 0.0  ;;  %5045 = vrot.lane.b32.xlu0 %v4905_v41, %s5850_s16  ;;  %3452 = vrot.lane.b32.xlu1 %v3417_v8, %s5844_s25  ;;  %v3005_v47 = vsel %vm493_vm15, %v2897_v48, 0.0  ;;  %v7491_v0 = vor.u32 %v3220_v29, %v3217_v63  ;;  %vm8911_vm15 = vsmask.f32 5376 }
 0x1f5   : > { %v2896_v60 = vmax.f32 %v2792_v58, 0.0  ;;  %v3003_v33 = vsel %vm491_vm3, %v2895_v12, 0.0  ;;  %v3213_v52 = vsel %vm8911_vm15, %v7312_v53, %v3212_v32  ;;  %v352_v8 = vmul.f32 0.055555556, %v316_v25  ;;  %vm8912_vm3 = vmmov %vm8911_vm15 }
 0x1f6   : > { %v3006_v23 = vsel %vm494_vm12, %v2898_v55, 0.0  ;;  %3353 = vst.msk [vmem:[#allocation3 + $0x20] sm:$0xff] %vm578_vm0, %v3213_v52  ;;  %v3222_v22 = vsel %vm8912_vm3, %v3212_v32, %v7491_v0  ;;  %v7511_v53 = vadd.s32 176, %v6973_v59  ;;  %vm8913_vm12 = vsmask.f32 3328 }
 0x1f7   : > { %v3034_v20 = vpack.c.bf16 %v3006_v23, %v3005_v47  ;;  %v3004_v27 = vsel %vm492_vm6, %v2896_v60, 0.0  ;;  %3354 = vst.msk [vmem:[#allocation3 + $0x28] sm:$0xff] %vm578_vm0, %v3222_v22  ;;  %v4506_v25 = vsel %vm8913_vm12, %v7423_v45, %v7493_v37  ;;  %v425_v48 = vmul.f32 18.0, %v389_v9 }
 0x1f8   : > { %v3033_v50 = vpack.c.bf16 %v3004_v27, %v3003_v33  ;;  %5047 = vrot.lane.b32.xlu0 %v4914_v43, %s5850_s16  ;;  %3970 = vrot.lane.b32.xlu1 %v3837_v3, %s5847_s9  ;;  %v388_v61 = vfloor.f32 %v352_v8  ;;  %v285_v41 = vcvt.s32.f32 %v7511_v53  ;;  %vm8914_vm6 = vcmask 1042432  }
 0x1f9   : > { %v7487_v38 = vrot.slane %v3034_v20, 4  ;;  %v7536_v49 = vsub.f32 %v281_v62, %v425_v48  ;;  %v7578_v33 = vadd.s32 168, %v6973_v59  ;;  %vm8915_vm13 = vmmov %vm8914_vm6 }
 0x1fa   : > { %v3080_v7 = vrot.slane %v3033_v50, 4  ;;  %v321_v57 = vadd.f32 0.5, %v285_v41 }
 0x1fb   : > { %vm497_vm7 = vcmp.lt.f32.partialorder %v7536_v49, 15.5  ;;  %v284_v29 = vcvt.s32.f32 %v7578_v33 }
 0x1fc   : > { %v3081_v35 = vsel %vm1538_vm1, %v7310_v17, %v3080_v7  ;;  %v3083_v24 = vsel %vm1538_vm1, %v3080_v7, %v7487_v38  ;;  %3711 = vrot.lane.b32.xlu0 %v3837_v3, %s5846_s29  ;;  %4378 = vrot.lane.b32.xlu1 %v4497_v54, %s5848_s12  ;;  %v387_v17 = vfloor.f32 %v7452_v10  ;;  %v3846_v54 = vsel %vm994_vm4, %v7444_v11, %v7489_v26 }
 0x1fd   : > { %3129 = vst.msk [vmem:[#allocation4 + $0x38] sm:$0xff] %vm578_vm0, %v3081_v35  ;;  %3130 = vst.msk [vmem:[#allocation4 + $0x40] sm:$0xff] %vm578_vm0, %v3083_v24  ;;  %v390_v10 = vfloor.f32 %v7461_v2  ;;  %v424_v2 = vmul.f32 18.0, %v388_v61  ;;  %v283_v3 = vcvt.s32.f32 %v7525_v56  ;;  %v7584_v39 = vmul.f32 0.055555556, %v321_v57 }
 0x1fe   : > { %v423_v11 = vmul.f32 18.0, %v387_v17  ;;  %v7617_v17 = vld [vmem:[%s8852_s2] ss:$0 sm:$0xff]  ;;  %v320_v61 = vadd.f32 0.5, %v284_v29  ;;  %v7758_v56 = vadd.s32 200, %v6973_v59 }
 0x1ff   : > { %v426_v9 = vmul.f32 18.0, %v390_v10  ;;  %v393_v22 = vfloor.f32 %v7584_v39  ;;  %v7696_v39 = vadd.s32 208, %v6973_v59 }
 0x200   : > { %3972 = vrot.lane.b32.xlu0 %v3846_v54, %s5847_s9  ;;  %4639 = vrot.lane.b32.xlu1 %v4506_v25, %s5849_s15  ;;  %v7558_v47 = vsub.f32 %v279_v15, %v423_v11  ;;  %v286_v15 = vcvt.s32.f32 %v7542_v30 }
 0x201   : > { %v7564_v51 = vsub.f32 %v282_v19, %v426_v9 }
 0x202   : > { %vm495_vm15 = vcmp.lt.f32.partialorder %v7558_v47, 15.5  ;;  %v322_v63 = vadd.f32 0.5, %v286_v15 }
 0x203   : > { %vm498_vm3 = vcmp.lt.f32.partialorder %v7564_v51, 15.5 }
 0x204   : > { %4380 = vrot.lane.b32.xlu0 %v4506_v25, %s5848_s12  ;;  %3713 = vrot.lane.b32.xlu1 %v3846_v54, %s5846_s29  ;;  %v7530_v45 = vld [vmem:[#allocation4 + $0x38] sm:$0xff]  ;;  %v7532_v4 = vld [vmem:[#allocation4 + $0x40] sm:$0xff]  ;;  %v7627_v10 = vmul.f32 0.055555556, %v322_v63 }
 0x205   : > { %v4752_v12 = vrot.slane %v7530_v45, 5  ;;  %v4085_v58 = vrot.slane %v7530_v45, 4  ;;  %v4087_v18 = vrot.slane %v7532_v4, 4  ;;  %v4508_v55 = vshrl.u32 %v7530_v45, 16  ;;  %v3149_v57 = vld [vmem:[#allocation4 + $0x38] sm:$0xff] }
 0x206   : > { %v4511_v43 = vshll.u32 %v7530_v45, 16  ;;  %v4754_v28 = vrot.slane %v7532_v4, 5  ;;  %v7574_v13 = vshll.u32 %v7532_v4, 16  ;;  %v3418_v19 = vrot.slane %v7530_v45, 3 }
 0x207   : > { %v4753_v62 = vsel %vm8914_vm6, %v4750_v46, %v4752_v12  ;;  %v4086_v5 = vsel %vm1538_vm1, %v4083_v1, %v4085_v58  ;;  %v4510_v60 = vrot.slane %v4508_v55, 4  ;;  %v7568_v46 = vsub.f32 %v280_v44, %v424_v2 }
 0x208   : > { %4788 = vrot.lane.b32.xlu0 %v4753_v62, %s5845_s26  ;;  %4121 = vrot.lane.b32.xlu1 %v4086_v5, %s5843_s24  ;;  %v4513_v36 = vrot.slane %v4511_v43, 5  ;;  %v7571_v1 = vshrl.u32 %v7532_v4, 16  ;;  %v4088_v16 = vsel %vm1538_vm1, %v4085_v58, %v4087_v18  ;;  %v319_v44 = vadd.f32 0.5, %v283_v3 }
 0x209   : > { %v4755_v23 = vsel %vm8915_vm13, %v4752_v12, %v4754_v28  ;;  %v4918_v42 = vrot.slane %v4508_v55, 5  ;;  %v4921_v20 = vrot.slane %v4511_v43, 6  ;;  %v3850_v27 = vrot.slane %v4508_v55, 3 }
 0x20a   : > { %v7591_v40 = vor.u32 %v4513_v36, %v4510_v60  ;;  %v3853_v21 = vrot.slane %v4511_v43, 4  ;;  %v4927_v31 = vrot.slane %v7571_v1, 5  ;;  %v4930_v50 = vrot.slane %v7574_v13, 6  ;;  %v3150_v36 = vld [vmem:[#allocation4 + $0x40] sm:$0xff] }
 0x20b   : > { %vm496_vm12 = vcmp.lt.f32.partialorder %v7568_v46, 15.5  ;;  %v3420_v32 = vrot.slane %v7532_v4, 3  ;;  %v7605_v7 = vmul.f32 0.055555556, %v319_v44  ;;  %vm8916_vm6 = vsmask.f32 3328 }
 0x20c   : > { %4123 = vrot.lane.b32.xlu0 %v4088_v16, %s5843_s24  ;;  %4790 = vrot.lane.b32.xlu1 %v4755_v23, %s5845_s26  ;;  %v4515_v35 = vsel %vm8916_vm6, %v7493_v37, %v7591_v40  ;;  %v3419_v24 = vsel %vm864_vm2, %v3416_v34, %v3418_v19  ;;  %v4922_v8 = vor.u32 %v4921_v20, %v4918_v42  ;;  %vm8917_vm13 = vsmask.f32 2304 }
 0x20d   : > { %v7622_v37 = vor.u32 %v3853_v21, %v3850_v27  ;;  %v7625_v48 = vor.u32 %v4930_v50, %v4927_v31  ;;  %v3421_v2 = vsel %vm864_vm2, %v3418_v19, %v3420_v32  ;;  %v3859_v43 = vrot.slane %v7571_v1, 3  ;;  %vm8918_vm6 = vmmov %vm8917_vm13 }
 0x20e   : > { %v4923_v55 = vsel %vm8917_vm13, %v7450_v14, %v4922_v8  ;;  %v3862_v60 = vrot.slane %v7574_v13, 4  ;;  %v4519_v14 = vrot.slane %v7571_v1, 4  ;;  %v4522_v44 = vrot.slane %v7574_v13, 5 }
 0x20f   : > { %v5738_v52 = vpop.f32.mrb[16].mxu0  ;;  %v3855_v5 = vsel %vm994_vm4, %v7489_v26, %v7622_v37  ;;  %v4932_v19 = vsel %vm8918_vm6, %v4922_v8, %v7625_v48  ;;  %v3224_v20 = vshrl.u32 %v3149_v57, 16  ;;  %v3227_v27 = vshll.u32 %v3149_v57, 16 }
 0x210   : > { %v2813_v54 = vadd.f32 %v7617_v17, %v5738_v52  ;;  %v2804_v25 = vpop.f32.mrb[17].mxu0  ;;  %4641 = vrot.lane.b32.xlu0 %v4515_v35, %s5849_s15  ;;  %3454 = vrot.lane.b32.xlu1 %v3419_v24, %s5844_s25  ;;  %v3233_v50 = vshrl.u32 %v3150_v36, 16  ;;  %v3236_v13 = vshll.u32 %v3150_v36, 16  ;;  %v289_v36 = vcvt.s32.f32 %v7696_v39 }
 0x211   : > { %v2805_v6 = vadd.f32 %v7617_v17, %v2804_v25  ;;  %v5739_v34 = vpop.f32.mrb[18].mxu0  ;;  %v3226_v49 = vrot.slane %v3224_v20, 2  ;;  %v3229_v1 = vrot.slane %v3227_v27, 3  ;;  %v7728_v27 = vadd.s32 216, %v6973_v59 }
 0x212   : > { %v2901_v11 = vmax.f32 %v2813_v54, 0.0  ;;  %v2816_v45 = vadd.f32 %v7617_v17, %v5739_v34  ;;  %v2807_v9 = vpop.f32.mrb[19].mxu0  ;;  %v3235_v24 = vrot.slane %v3233_v50, 2  ;;  %v7662_v54 = vor.u32 %v3862_v60, %v3859_v43 }
 0x213   : > { %v2899_v12 = vmax.f32 %v2805_v6, 0.0  ;;  %v2808_v58 = vadd.f32 %v7617_v17, %v2807_v9  ;;  %v3230_v46 = vor.u32 %v3229_v1, %v3226_v49  ;;  %v3238_v25 = vrot.slane %v3236_v13, 3 }
 0x214   : > { %v2902_v62 = vmax.f32 %v2816_v45, 0.0  ;;  %5049 = vrot.lane.b32.xlu0 %v4923_v55, %s5850_s16  ;;  %3456 = vrot.lane.b32.xlu1 %v3421_v2, %s5844_s25  ;;  %v3009_v23 = vsel %vm497_vm7, %v2901_v11, 0.0  ;;  %v7665_v6 = vor.u32 %v4522_v44, %v4519_v14  ;;  %v356_v45 = vmul.f32 0.055555556, %v320_v61 }
 0x215   : > { %v2900_v16 = vmax.f32 %v2808_v58, 0.0  ;;  %v3007_v26 = vsel %vm495_vm15, %v2899_v12, 0.0  ;;  %vm8919_vm7 = vsmask.f32 5376  ;;  %v7678_v12 = vor.u32 %v3238_v25, %v3235_v24 }
 0x216   : > { %v3010_v42 = vsel %vm498_vm3, %v2902_v62, 0.0  ;;  %v3231_v9 = vsel %vm8919_vm7, %v7491_v0, %v3230_v46  ;;  %v3864_v58 = vsel %vm994_vm4, %v7622_v37, %v7662_v54  ;;  %v391_v61 = vfloor.f32 %v7605_v7  ;;  %vm8921_vm3 = vmmov %vm8919_vm7 }
 0x217   : > { %v3036_v21 = vpack.c.bf16 %v3010_v42, %v3009_v23  ;;  %v3008_v31 = vsel %vm496_vm12, %v2900_v16, 0.0  ;;  %3355 = vst.msk [vmem:[#allocation3 + $0x30] sm:$0xff] %vm578_vm0, %v3231_v9  ;;  %vm8920_vm15 = vsmask.f32 3328  ;;  %v3240_v55 = vsel %vm8921_vm3, %v3230_v46, %v7678_v12 }
 0x218   : > { %v3035_v63 = vpack.c.bf16 %v3008_v31, %v3007_v26  ;;  %5051 = vrot.lane.b32.xlu0 %v4932_v19, %s5850_s16  ;;  %3974 = vrot.lane.b32.xlu1 %v3855_v5, %s5847_s9  ;;  %v4524_v0 = vsel %vm8920_vm15, %v7591_v40, %v7665_v6  ;;  %v394_v37 = vfloor.f32 %v7627_v10  ;;  %v392_v43 = vfloor.f32 %v356_v45  ;;  %3356 = vst.msk [vmem:[#allocation3 + $0x38] sm:$0xff] %vm578_vm0, %v3240_v55  ;;  %vm8925_vm7 = vmmov %vm8920_vm15 }
 0x219   : > { %v7659_v51 = vrot.slane %v3036_v21, 4  ;;  %v7699_v7 = vadd.s32 192, %v6973_v59  ;;  %v427_v57 = vmul.f32 18.0, %v391_v61  ;;  %vm8922_vm12 = vcmask 1042432  }
 0x21a   : > { %v3443_v52 = vpop.permute.xlu0 %3442  ;;  %v3084_v8 = vrot.slane %v3035_v63, 4  ;;  %v428_v60 = vmul.f32 18.0, %v392_v43  ;;  %v325_v24 = vadd.f32 0.5, %v289_v36  ;;  %vm8923_vm13 = vcmask 392512   ;;  %vm8924_vm6 = vmmov %vm8922_vm12 }
 0x21b   : > { %3496 = vst.msk [vmem:[#allocation3] sm:$0xff] %vm956_vm8, %v3443_v52  ;;  %v3445_v47 = vpop.permute.xlu1 %3444  ;;  %v287_v16 = vcvt.s32.f32 %v7699_v7  ;;  %v7743_v63 = vsub.f32 %v283_v3, %v427_v57  ;;  %v290_v33 = vcvt.s32.f32 %v7728_v27  ;;  %v7891_v39 = vadd.s32 240, %v6973_v59 }
 0x21c   : > { %3497 = vst.msk [vmem:[#allocation3 + $0x8] sm:$0xff] %vm956_vm8, %v3445_v47  ;;  %v3085_v34 = vsel %vm1538_vm1, %v7487_v38, %v3084_v8  ;;  %v3087_v11 = vsel %vm1538_vm1, %v3084_v8, %v7659_v51  ;;  %3715 = vrot.lane.b32.xlu0 %v3855_v5, %s5846_s29  ;;  %4382 = vrot.lane.b32.xlu1 %v4515_v35, %s5848_s12  ;;  %v429_v35 = vmul.f32 18.0, %v393_v22  ;;  %v430_v5 = vmul.f32 18.0, %v394_v37 }
 0x21d   : > { %3131 = vst.msk [vmem:[#allocation4 + $0x48] sm:$0xff] %vm578_vm0, %v3085_v34  ;;  %3132 = vst.msk [vmem:[#allocation4 + $0x50] sm:$0xff] %vm578_vm0, %v3087_v11  ;;  %vm499_vm3 = vcmp.lt.f32.partialorder %v7743_v63, 15.5  ;;  %v7780_v11 = vmul.f32 0.055555556, %v325_v24  ;;  %v326_v9 = vadd.f32 0.5, %v290_v33 }
 0x21e   : > { %v4112_v2 = vpop.permute.xlu0 %4111  ;;  %v7705_v40 = vsub.f32 %v285_v41, %v429_v35 }
 0x21f   : > { %v3706_v38 = vpop.permute.xlu1 %3705 }
 0x220   : > { %3758 = vst.msk [vmem:[#allocation3 + $0x8] sm:$0xff] %vm1219_vm9, %v3706_v38  ;;  %3976 = vrot.lane.b32.xlu0 %v3864_v58, %s5847_s9  ;;  %4643 = vrot.lane.b32.xlu1 %v4524_v0, %s5849_s15  ;;  %vm501_vm15 = vcmp.lt.f32.partialorder %v7705_v40, 15.5 }
 0x222   : > { %v3704_v22 = vpop.permute.xlu0 %3703 }
 0x223   : > { %3757 = vst.msk [vmem:[#allocation3] sm:$0xff] %vm1219_vm9, %v3704_v22 }
 0x224   : > { %4384 = vrot.lane.b32.xlu0 %v4524_v0, %s5848_s12  ;;  %3717 = vrot.lane.b32.xlu1 %v3864_v58, %s5846_s29  ;;  %v7709_v10 = vld [vmem:[#allocation4 + $0x48] sm:$0xff]  ;;  %v7711_v62 = vld [vmem:[#allocation4 + $0x50] sm:$0xff] }
 0x225   : > { %v4756_v53 = vrot.slane %v7709_v10, 5  ;;  %v4089_v41 = vrot.slane %v7709_v10, 4  ;;  %v4526_v14 = vshrl.u32 %v7709_v10, 16  ;;  %v4529_v44 = vshll.u32 %v7709_v10, 16  ;;  %v3152_v24 = vld [vmem:[#allocation4 + $0x50] sm:$0xff] }
 0x226   : > { %v3965_v19 = vpop.permute.xlu0 %3964  ;;  %v4758_v23 = vrot.slane %v7711_v62, 5  ;;  %v7722_v42 = vshrl.u32 %v7711_v62, 16  ;;  %v7725_v20 = vshll.u32 %v7711_v62, 16  ;;  %v3422_v30 = vrot.slane %v7709_v10, 3 }
 0x227   : > { %4018 = vst.msk [vmem:[#allocation3] sm:$0xff] %vm1481_vm10, %v3965_v19  ;;  %v4757_v26 = vsel %vm8922_vm12, %v4754_v28, %v4756_v53  ;;  %v4090_v21 = vsel %vm1538_vm1, %v4087_v18, %v4089_v41  ;;  %v4528_v31 = vrot.slane %v4526_v14, 4  ;;  %v4531_v50 = vrot.slane %v4529_v44, 5 }
 0x228   : > { %4165 = vst.msk [vmem:[#allocation3] sm:$0xff] %vm1630_vm11, %v4112_v2  ;;  %4792 = vrot.lane.b32.xlu0 %v4757_v26, %s5845_s26  ;;  %4125 = vrot.lane.b32.xlu1 %v4090_v21, %s5843_s24  ;;  %v4936_v49 = vrot.slane %v4526_v14, 5  ;;  %v4939_v1 = vrot.slane %v4529_v44, 6  ;;  %v7747_v28 = vsub.f32 %v286_v15, %v430_v5  ;;  %v7753_v18 = vsub.f32 %v284_v29, %v428_v60 }
 0x229   : > { %v7749_v52 = vor.u32 %v4531_v50, %v4528_v31  ;;  %v4759_v3 = vsel %vm8924_vm6, %v4756_v53, %v4758_v23  ;;  %v323_v15 = vadd.f32 0.5, %v287_v16  ;;  %v4945_v47 = vrot.slane %v7722_v42, 5  ;;  %v3151_v50 = vld [vmem:[#allocation4 + $0x48] sm:$0xff] }
 0x22a   : > { %v4373_v13 = vpop.permute.xlu0 %4372  ;;  %v4940_v8 = vor.u32 %v4939_v1, %v4936_v49  ;;  %v4948_v46 = vrot.slane %v7725_v20, 6  ;;  %v3616_v25 = vrot.slane %v4526_v14, 3  ;;  %v3619_v34 = vrot.slane %v4529_v44, 4 }
 0x22b   : > { %4426 = vst.msk [vmem:[#allocation3] sm:$0xff] %vm8923_vm13, %v4373_v13  ;;  %v7771_v29 = vsel %vm8925_vm7, %v7665_v6, %v7749_v52  ;;  %v288_v6 = vcvt.s32.f32 %v7758_v56  ;;  %vm502_vm12 = vcmp.lt.f32.partialorder %v7747_v28, 15.5  ;;  %vm500_vm13 = vcmp.lt.f32.partialorder %v7753_v18, 15.5 }
 0x22c   : > { %4645 = vrot.lane.b32.xlu0 %v7771_v29, %s5849_s15  ;;  %4794 = vrot.lane.b32.xlu1 %v4759_v3, %s5845_s26  ;;  %v7785_v45 = vmul.f32 0.055555556, %v323_v15  ;;  %vm8926_vm6 = vsmask.f32 2304  ;;  %v3423_v58 = vsel %vm864_vm2, %v3420_v32, %v3422_v30  ;;  %v7794_v35 = vor.u32 %v4948_v46, %v4945_v47 }
 0x22d   : > { %v4941_v38 = vsel %vm8926_vm6, %v7625_v48, %v4940_v8  ;;  %v3424_v61 = vrot.slane %v7711_v62, 3  ;;  %v3620_v37 = vor.u32 %v3619_v34, %v3616_v25  ;;  %v3877_v43 = vrot.slane %v7722_v42, 3  ;;  %vm8927_vm7 = vmmov %vm8926_vm6 }
 0x22e   : > { %v3880_v48 = vrot.slane %v7725_v20, 4  ;;  %v397_v32 = vfloor.f32 %v7780_v11  ;;  %v324_v57 = vadd.f32 0.5, %v288_v6  ;;  %v395_v53 = vfloor.f32 %v7785_v45 }
 0x22f   : > { %v5742_v2 = vpop.f32.mrb[20].mxu0  ;;  %v7808_v14 = vmul.f32 0.055555556, %v326_v9  ;;  %v4950_v21 = vsel %vm8927_vm7, %v4940_v8, %v7794_v35  ;;  %v3425_v31 = vsel %vm864_vm2, %v3422_v30, %v3424_v61  ;;  %v3621_v1 = vsel %vm994_vm4, %v7662_v54, %v3620_v37 }
 0x230   : > { %v2829_v0 = vadd.f32 %v7617_v17, %v5742_v2  ;;  %v2820_v55 = vpop.f32.mrb[21].mxu0  ;;  %5053 = vrot.lane.b32.xlu0 %v4941_v38, %s5850_s16  ;;  %3458 = vrot.lane.b32.xlu1 %v3423_v58, %s5844_s25  ;;  %v7820_v13 = vor.u32 %v3880_v48, %v3877_v43  ;;  %v4537_v15 = vrot.slane %v7722_v42, 4  ;;  %v4540_v8 = vrot.slane %v7725_v20, 5 }
 0x231   : > { %v2821_v4 = vadd.f32 %v7617_v17, %v2820_v55  ;;  %v5743_v22 = vpop.f32.mrb[22].mxu0  ;;  %v3242_v46 = vshrl.u32 %v3151_v50, 16  ;;  %v3245_v25 = vshll.u32 %v3151_v50, 16  ;;  %v3251_v45 = vshrl.u32 %v3152_v24, 16 }
 0x232   : > { %v2905_v5 = vmax.f32 %v2829_v0, 0.0  ;;  %v2832_v60 = vadd.f32 %v7617_v17, %v5743_v22  ;;  %v2823_v19 = vpop.f32.mrb[23].mxu0  ;;  %v4091_v40 = vrot.slane %v7711_v62, 4  ;;  %v3254_v38 = vshll.u32 %v3152_v24, 16 }
 0x233   : > { %v2903_v44 = vmax.f32 %v2821_v4, 0.0  ;;  %v2824_v26 = vadd.f32 %v7617_v17, %v2823_v19  ;;  %v3244_v42 = vrot.slane %v3242_v46, 2  ;;  %v3247_v20 = vrot.slane %v3245_v25, 3 }
 0x234   : > { %v2906_v49 = vmax.f32 %v2832_v60, 0.0  ;;  %5055 = vrot.lane.b32.xlu0 %v4950_v21, %s5850_s16  ;;  %3460 = vrot.lane.b32.xlu1 %v3425_v31, %s5844_s25  ;;  %v3013_v30 = vsel %vm501_vm15, %v2905_v5, 0.0  ;;  %v3253_v2 = vrot.slane %v3251_v45, 2  ;;  %v3882_v18 = vsel %vm994_vm4, %v3620_v37, %v7820_v13 }
 0x235   : > { %v2904_v3 = vmax.f32 %v2824_v26, 0.0  ;;  %v3011_v34 = vsel %vm499_vm3, %v2903_v44, 0.0  ;;  %v3248_v55 = vor.u32 %v3247_v20, %v3244_v42  ;;  %v7841_v43 = vor.u32 %v4540_v8, %v4537_v15 }
 0x236   : > { %v3014_v47 = vsel %vm502_vm12, %v2906_v49, 0.0  ;;  %v3256_v48 = vrot.slane %v3254_v38, 3  ;;  %v360_v5 = vmul.f32 0.055555556, %v324_v57  ;;  %vm8928_vm15 = vsmask.f32 5376 }
 0x237   : > { %v3038_v54 = vpack.c.bf16 %v3014_v47, %v3013_v30  ;;  %v3012_v11 = vsel %vm500_vm13, %v2904_v3, 0.0  ;;  %v3249_v60 = vsel %vm8928_vm15, %v7678_v12, %v3248_v55  ;;  %v433_v57 = vmul.f32 18.0, %v397_v32  ;;  %vm8930_vm12 = vmmov %vm8928_vm15 }
 0x238   : > { %v3037_v9 = vpack.c.bf16 %v3012_v11, %v3011_v34  ;;  %3719 = vrot.lane.b32.xlu0 %v3621_v1, %s5846_s29  ;;  %3978 = vrot.lane.b32.xlu1 %v3621_v1, %s5847_s9  ;;  %3357 = vst.msk [vmem:[#allocation3 + $0x40] sm:$0xff] %vm578_vm0, %v3249_v60  ;;  %v7855_v37 = vor.u32 %v3256_v48, %v3253_v2  ;;  %vm8929_vm3 = vsmask.f32 3328  ;;  %v431_v26 = vmul.f32 18.0, %v395_v53 }
 0x239   : > { %v7835_v28 = vrot.slane %v3038_v54, 4  ;;  %v4542_v12 = vsel %vm8929_vm3, %v7749_v52, %v7841_v43  ;;  %v398_v21 = vfloor.f32 %v7808_v14  ;;  %v396_v31 = vfloor.f32 %v360_v5  ;;  %vm8933_vm7 = vmmov %vm8929_vm3 }
 0x23a   : > { %v3088_v63 = vrot.slane %v3037_v9, 4  ;;  %v4781_v58 = vpop.permute.xlu0 %4780  ;;  %v7837_v0 = vpop.permute.xlu1 %4113  ;;  %v3258_v44 = vsel %vm8930_vm12, %v3248_v55, %v7855_v37  ;;  %vm8931_vm13 = vcmask 458112   ;;  %v7877_v52 = vsub.f32 %v289_v36, %v433_v57 }
 0x23b   : > { %3358 = vst.msk [vmem:[#allocation3 + $0x48] sm:$0xff] %vm578_vm0, %v3258_v44  ;;  %v7886_v53 = vsub.f32 %v287_v16, %v431_v26  ;;  %v434_v14 = vmul.f32 18.0, %v398_v21  ;;  %v432_v50 = vmul.f32 18.0, %v396_v31  ;;  %v7897_v3 = vadd.s32 224, %v6973_v59 }
 0x23c   : > { %v3089_v4 = vsel %vm1538_vm1, %v7659_v51, %v3088_v63  ;;  %v3091_v22 = vsel %vm1538_vm1, %v3088_v63, %v7835_v28  ;;  %3980 = vrot.lane.b32.xlu0 %v3882_v18, %s5847_s9  ;;  %4386 = vrot.lane.b32.xlu1 %v7771_v29, %s5848_s12  ;;  %v4092_v29 = vsel %vm1538_vm1, %v4089_v41, %v4091_v40  ;;  %v7906_v30 = vadd.s32 248, %v6973_v59 }
 0x23d   : > { %3133 = vst.msk [vmem:[#allocation4 + $0x58] sm:$0xff] %vm578_vm0, %v3089_v4  ;;  %3134 = vst.msk [vmem:[#allocation4 + $0x60] sm:$0xff] %vm578_vm0, %v3091_v22  ;;  %v7909_v47 = vadd.s32 232, %v6973_v59  ;;  %vm8932_vm6 = vcmask 589312   ;;  %v7919_v45 = vsub.f32 %v290_v33, %v434_v14  ;;  %v7925_v2 = vsub.f32 %v288_v6, %v432_v50 }
 0x23e   : > { %v7857_v51 = vpop.permute.xlu0 %4115  ;;  %v7859_v19 = vpop.permute.xlu1 %4782  ;;  %v294_v27 = vcvt.s32.f32 %v7906_v30  ;;  %vm505_vm15 = vcmp.lt.f32.partialorder %v7877_v52, 15.5  ;;  %vm503_vm3 = vcmp.lt.f32.partialorder %v7886_v53, 15.5 }
 0x23f   : > { %v292_v33 = vcvt.s32.f32 %v7909_v47  ;;  %vm506_vm12 = vcmp.lt.f32.partialorder %v7919_v45, 15.5  ;;  %v8140_v47 = vadd.s32 280, %v6973_v59 }
 0x240   : > { %4127 = vrot.lane.b32.xlu0 %v4092_v29, %s5843_s24  ;;  %4647 = vrot.lane.b32.xlu1 %v4542_v12, %s5849_s15  ;;  %v7969_v26 = vadd.f32 0.5, %v294_v27 }
 0x241   : > { %v7973_v21 = vadd.f32 0.5, %v292_v33 }
 0x242   : > { %v4634_v10 = vpop.permute.xlu0 %4633  ;;  %v3447_v41 = vpop.permute.xlu1 %3446 }
 0x243   : > { %4687 = vst.msk [vmem:[#allocation3] sm:$0xff] %vm8931_vm13, %v4634_v10  ;;  %vm504_vm13 = vcmp.lt.f32.partialorder %v7925_v2, 15.5 }
 0x244   : > { %3498 = vst.msk [vmem:[#allocation3 + $0x10] sm:$0xff] %vm956_vm8, %v3447_v41  ;;  %4388 = vrot.lane.b32.xlu0 %v4542_v12, %s5848_s12  ;;  %3721 = vrot.lane.b32.xlu1 %v3882_v18, %s5846_s29  ;;  %v7882_v32 = vld [vmem:[#allocation4 + $0x58] sm:$0xff]  ;;  %v7888_v49 = vld [vmem:[#allocation4 + $0x60] sm:$0xff]  ;;  %v291_v18 = vcvt.s32.f32 %v7897_v3 }
 0x245   : > { %4834 = vst.msk [vmem:[#allocation3] sm:$0xff] %vm2304_vm14, %v4781_v58  ;;  %v4093_v36 = vrot.slane %v7882_v32, 4  ;;  %v4544_v1 = vshrl.u32 %v7882_v32, 16  ;;  %v4547_v24 = vshll.u32 %v7882_v32, 16  ;;  %v7900_v16 = vshrl.u32 %v7888_v49, 16  ;;  %v3153_v22 = vld [vmem:[#allocation4 + $0x58] sm:$0xff] }
 0x246   : > { %v5042_v15 = vpop.permute.xlu0 %5041  ;;  %v3449_v7 = vpop.permute.xlu1 %3448  ;;  %v7903_v8 = vshll.u32 %v7888_v49, 16  ;;  %v4760_v6 = vrot.slane %v7882_v32, 5  ;;  %v4762_v12 = vrot.slane %v7888_v49, 5  ;;  %v7965_v44 = vadd.f32 0.5, %v291_v18 }
 0x247   : > { %5095 = vst.msk [vmem:[#allocation3] sm:$0xff] %vm8932_vm6, %v5042_v15  ;;  %v4094_v46 = vsel %vm1538_vm1, %v4091_v40, %v4093_v36  ;;  %v4546_v25 = vrot.slane %v4544_v1, 4  ;;  %v4549_v34 = vrot.slane %v4547_v24, 5  ;;  %v3886_v54 = vrot.slane %v4544_v1, 3 }
 0x248   : > { %3499 = vst.msk [vmem:[#allocation3 + $0x18] sm:$0xff] %vm956_vm8, %v3449_v7  ;;  %4129 = vrot.lane.b32.xlu1 %v4094_v46, %s5843_s24  ;;  %v3889_v11 = vrot.slane %v4547_v24, 4  ;;  %v4954_v9 = vrot.slane %v4544_v1, 5  ;;  %v4957_v42 = vrot.slane %v4547_v24, 6  ;;  %v293_v40 = vcvt.s32.f32 %v7891_v39  ;;  %v3154_v1 = vld [vmem:[#allocation4 + $0x60] sm:$0xff] }
 0x249   : > { %v7921_v20 = vor.u32 %v4549_v34, %v4546_v25  ;;  %v4555_v55 = vrot.slane %v7900_v16, 4  ;;  %v4558_v48 = vrot.slane %v7903_v8, 5  ;;  %v4966_v5 = vrot.slane %v7903_v8, 6 }
 0x24a   : > { %v7928_v38 = vpop.permute.xlu0 %5043  ;;  %v3967_v63 = vpop.permute.xlu1 %3966  ;;  %v7930_v58 = vor.u32 %v3889_v11, %v3886_v54  ;;  %v7960_v60 = vadd.f32 0.5, %v293_v40  ;;  %vm8934_vm6 = vcmask 392512   ;;  %v3426_v14 = vrot.slane %v7882_v32, 3 }
 0x24b   : > { %4019 = vst.msk [vmem:[#allocation3 + $0x8] sm:$0xff] %vm1481_vm10, %v3967_v63  ;;  %v4551_v56 = vsel %vm8933_vm7, %v7841_v43, %v7921_v20  ;;  %v4958_v43 = vor.u32 %v4957_v42, %v4954_v9  ;;  %vm8935_vm7 = vcmask 1042432   ;;  %v7983_v41 = vor.u32 %v4558_v48, %v4555_v55 }
 0x24c   : > { %4166 = vst.msk [vmem:[#allocation3 + $0x8] sm:$0xff] %vm1630_vm11, %v7837_v0  ;;  %4649 = vrot.lane.b32.xlu0 %v4551_v56, %s5849_s15  ;;  %v7949_v4 = vsel %vm994_vm4, %v7820_v13, %v7930_v58  ;;  %v4963_v0 = vrot.slane %v7900_v16, 5  ;;  %v4761_v10 = vsel %vm8935_vm7, %v4758_v23, %v4760_v6  ;;  %v3260_v50 = vshrl.u32 %v3153_v22, 16 }
 0x24d   : > { %3982 = vrot.lane.b32.xlu1 %v7949_v4, %s5847_s9  ;;  %v3263_v63 = vshll.u32 %v3153_v22, 16  ;;  %v3269_v55 = vshrl.u32 %v3154_v1, 16  ;;  %vm8937_vm7 = vsmask.f32 3328  ;;  %v3895_v22 = vrot.slane %v7900_v16, 3 }
 0x24e   : > { %v3708_v13 = vpop.permute.xlu0 %3707  ;;  %v4375_v29 = vpop.permute.xlu1 %4374  ;;  %v5113_v57 = vld [vmem:[#allocation3] sm:$0xff]  ;;  %v7992_v23 = vor.u32 %v4966_v5, %v4963_v0  ;;  %v3262_v34 = vrot.slane %v3260_v50, 2  ;;  %v3272_v0 = vshll.u32 %v3154_v1, 16 }
 0x24f   : > { %3759 = vst.msk [vmem:[#allocation3 + $0x10] sm:$0xff] %vm1219_vm9, %v3708_v13  ;;  %v5746_v31 = vpop.f32.mrb[24].mxu0  ;;  %5766 = vmatprep.mubr.msk.bf16.mxu1 %vm2647_vm5, %v5113_v57  ;;  %v3271_v57 = vrot.slane %v3269_v55, 2 }
 0x250   : > { %4427 = vst.msk [vmem:[#allocation3 + $0x8] sm:$0xff] %vm8934_vm6, %v4375_v29  ;;  %v2845_v24 = vadd.f32 %v7617_v17, %v5746_v31  ;;  %v2836_v15 = vpop.f32.mrb[25].mxu0  ;;  %4796 = vrot.lane.b32.xlu0 %v4761_v10, %s5845_s26  ;;  %vm8936_vm6 = vsmask.f32 2304  ;;  %v3265_v29 = vrot.slane %v3263_v63, 3  ;;  %v3274_v10 = vrot.slane %v3272_v0, 3 }
 0x251   : > { %v4959_v7 = vsel %vm8936_vm6, %v7794_v35, %v4958_v43  ;;  %v2837_v46 = vadd.f32 %v7617_v17, %v2836_v15  ;;  %4390 = vrot.lane.b32.xlu1 %v4551_v56, %s5848_s12  ;;  %v5747_v25 = vpop.f32.mrb[26].mxu0  ;;  %v8000_v56 = vsel %vm8937_vm7, %v7921_v20, %v7983_v41  ;;  %vm8938_vm6 = vcmask 458112  }
 0x252   : > { %v2909_v54 = vmax.f32 %v2845_v24, 0.0  ;;  %v2848_v11 = vadd.f32 %v7617_v17, %v5747_v25  ;;  %v2839_v9 = vpop.f32.mrb[27].mxu0  ;;  %v3969_v42 = vpop.permute.xlu0 %3968  ;;  %vm8939_vm7 = vsmask.f32 2304  ;;  %v8025_v52 = vor.u32 %v3274_v10, %v3271_v57 }
 0x253   : > { %v2907_v48 = vmax.f32 %v2837_v46, 0.0  ;;  %v2840_v13 = vadd.f32 %v7617_v17, %v2839_v9  ;;  %4020 = vst.msk [vmem:[#allocation3 + $0x10] sm:$0xff] %vm1481_vm10, %v3969_v42  ;;  %v4636_v35 = vpop.permute.xlu1 %4635  ;;  %v4968_v20 = vsel %vm8939_vm7, %v4958_v43, %v7992_v23  ;;  %vm8941_vm7 = vcmask 392512  }
 0x254   : > { %v2910_v5 = vmax.f32 %v2848_v11, 0.0  ;;  %4167 = vst.msk [vmem:[#allocation3 + $0x10] sm:$0xff] %vm1630_vm11, %v7857_v51  ;;  %5057 = vrot.lane.b32.xlu0 %v4959_v7, %s5850_s16  ;;  %v3898_v51 = vrot.slane %v7903_v8, 4  ;;  %v3017_v50 = vsel %vm505_vm15, %v2909_v54, 0.0  ;;  %vm8942_vm15 = vcmask 1042432  }
 0x255   : > { %4688 = vst.msk [vmem:[#allocation3 + $0x8] sm:$0xff] %vm8938_vm6, %v4636_v35  ;;  %v2908_v31 = vmax.f32 %v2840_v13, 0.0  ;;  %4651 = vrot.lane.b32.xlu1 %v8000_v56, %s5849_s15  ;;  %vm8940_vm6 = vcmask 589312   ;;  %v3015_v24 = vsel %vm503_vm3, %v2907_v48, 0.0  ;;  %v4763_v53 = vsel %vm8942_vm15, %v4760_v6, %v4762_v12 }
 0x256   : > { %4835 = vst.msk [vmem:[#allocation3 + $0x8] sm:$0xff] %vm2304_vm14, %v7859_v19  ;;  %v3018_v16 = vsel %vm506_vm12, %v2910_v5, 0.0  ;;  %v4377_v1 = vpop.permute.xlu0 %4376  ;;  %v3266_v19 = vor.u32 %v3265_v29, %v3262_v34  ;;  %vm8943_vm3 = vsmask.f32 5376  ;;  %v363_v46 = vmul.f32 0.055555556, %v7965_v44 }
 0x257   : > { %5096 = vst.msk [vmem:[#allocation3 + $0x8] sm:$0xff] %vm8940_vm6, %v7928_v38  ;;  %v3040_v15 = vpack.c.bf16 %v3018_v16, %v3017_v50  ;;  %v3016_v43 = vsel %vm504_vm13, %v2908_v31, 0.0  ;;  %v3710_v8 = vpop.permute.xlu1 %3709  ;;  %v365_v38 = vmul.f32 0.055555556, %v7960_v60  ;;  %vm8944_vm12 = vmmov %vm8943_vm3  ;;  %v366_v6 = vmul.f32 0.055555556, %v7969_v26 }
 0x258   : > { %4428 = vst.msk [vmem:[#allocation3 + $0x10] sm:$0xff] %vm8941_vm7, %v4377_v1  ;;  %v3039_v7 = vpack.c.bf16 %v3016_v43, %v3015_v24  ;;  %5059 = vrot.lane.b32.xlu0 %v4968_v20, %s5850_s16  ;;  %v3267_v45 = vsel %vm8943_vm3, %v7855_v37, %v3266_v19  ;;  %v3276_v25 = vsel %vm8944_vm12, %v3266_v19, %v8025_v52  ;;  %v364_v11 = vmul.f32 0.055555556, %v7973_v21 }
 0x259   : > { %3760 = vst.msk [vmem:[#allocation3 + $0x18] sm:$0xff] %vm1219_vm9, %v3710_v8  ;;  %v8036_v2 = vrot.slane %v3040_v15, 4  ;;  %4798 = vrot.lane.b32.xlu1 %v4763_v53, %s5845_s26  ;;  %v3427_v60 = vsel %vm864_vm2, %v3424_v61, %v3426_v14  ;;  %v8054_v44 = vor.u32 %v3898_v51, %v3895_v22  ;;  %v3428_v9 = vrot.slane %v7888_v49, 3 }
 0x25a   : > { %3359 = vst.msk [vmem:[#allocation3 + $0x50] sm:$0xff] %vm578_vm0, %v3267_v45  ;;  %v3092_v34 = vrot.slane %v3039_v7, 4  ;;  %v4785_v54 = vpop.permute.xlu0 %4784  ;;  %3360 = vst.msk [vmem:[#allocation3 + $0x58] sm:$0xff] %vm578_vm0, %v3276_v25  ;;  %v401_v21 = vfloor.f32 %v365_v38  ;;  %v399_v55 = vfloor.f32 %v363_v46  ;;  %v402_v13 = vfloor.f32 %v366_v6 }
 0x25b   : > { %v8047_v37 = vpop.permute.xlu1 %4117  ;;  %v3429_v48 = vsel %vm864_vm2, %v3426_v14, %v3428_v9  ;;  %v400_v35 = vfloor.f32 %v364_v11  ;;  %vm8945_vm13 = vcmask 458112   ;;  %v8109_v1 = vadd.s32 272, %v6973_v59 }
 0x25c   : > { %v3093_v42 = vsel %vm1538_vm1, %v7835_v28, %v3092_v34  ;;  %v3095_v26 = vsel %vm1538_vm1, %v3092_v34, %v8036_v2  ;;  %3723 = vrot.lane.b32.xlu0 %v7949_v4, %s5846_s29  ;;  %v3900_v28 = vsel %vm994_vm4, %v7930_v58, %v8054_v44  ;;  %v4095_v4 = vrot.slane %v7888_v49, 4 }
 0x25d   : > { %3135 = vst.msk [vmem:[#allocation4 + $0x68] sm:$0xff] %vm578_vm0, %v3093_v42  ;;  %3136 = vst.msk [vmem:[#allocation4 + $0x70] sm:$0xff] %vm578_vm0, %v3095_v26  ;;  %3462 = vrot.lane.b32.xlu1 %v3427_v60, %s5844_s25  ;;  %v437_v5 = vmul.f32 18.0, %v401_v21  ;;  %v435_v29 = vmul.f32 18.0, %v399_v55  ;;  %v438_v57 = vmul.f32 18.0, %v402_v13  ;;  %v436_v31 = vmul.f32 18.0, %v400_v35 }
 0x25e   : > { %v5114_v62 = vld [vmem:[#allocation3 + $0x8] sm:$0xff]  ;;  %v8067_v61 = vpop.permute.xlu0 %4119  ;;  %v4096_v22 = vsel %vm1538_vm1, %v4093_v36, %v4095_v4  ;;  %v8128_v53 = vadd.s32 256, %v6973_v59  ;;  %vm8946_vm7 = vsmask.f32 3328  ;;  %v8170_v21 = vadd.s32 264, %v6973_v59 }
 0x25f   : > { %5767 = vmatmul.mubr.msk.bf16.vlgmr.msra.gmra.mrb[0].mxu1 %vm2647_vm5, %v5114_v62  ;;  %v8069_v63 = vpop.permute.xlu1 %4786  ;;  %v8100_v10 = vsub.f32 %v293_v40, %v437_v5  ;;  %v8117_v39 = vsub.f32 %v291_v18, %v435_v29  ;;  %v8121_v40 = vsub.f32 %v294_v27, %v438_v57  ;;  %v8125_v7 = vsub.f32 %v292_v33, %v436_v31 }
 0x260   : > { %3984 = vrot.lane.b32.xlu0 %v3900_v28, %s5847_s9  ;;  %v297_v27 = vcvt.s32.f32 %v8109_v1  ;;  %v295_v62 = vcvt.s32.f32 %v8128_v53  ;;  %v298_v35 = vcvt.s32.f32 %v8140_v47 }
 0x261   : > { %3464 = vrot.lane.b32.xlu1 %v3429_v48, %s5844_s25  ;;  %vm509_vm15 = vcmp.lt.f32.partialorder %v8100_v10, 15.5  ;;  %vm507_vm3 = vcmp.lt.f32.partialorder %v8117_v39, 15.5  ;;  %vm510_vm12 = vcmp.lt.f32.partialorder %v8121_v40, 15.5  ;;  %v296_v40 = vcvt.s32.f32 %v8170_v21 }
 0x262   : > { %v4638_v0 = vpop.permute.xlu0 %4637  ;;  %v8166_v26 = vadd.f32 0.5, %v297_v27  ;;  %v331_v39 = vadd.f32 0.5, %v295_v62 }
 0x263   : > { %4689 = vst.msk [vmem:[#allocation3 + $0x10] sm:$0xff] %vm8945_vm13, %v4638_v0  ;;  %v3451_v58 = vpop.permute.xlu1 %3450  ;;  %vm508_vm13 = vcmp.lt.f32.partialorder %v8125_v7, 15.5 }
 0x264   : > { %4836 = vst.msk [vmem:[#allocation3 + $0x10] sm:$0xff] %vm2304_vm14, %v4785_v54  ;;  %4131 = vrot.lane.b32.xlu0 %v4096_v22, %s5843_s24  ;;  %v8091_v14 = vld [vmem:[#allocation4 + $0x68] sm:$0xff]  ;;  %v8093_v20 = vld [vmem:[#allocation4 + $0x70] sm:$0xff] }
 0x265   : > { %3500 = vst.msk [vmem:[#allocation3 + $0x20] sm:$0xff] %vm956_vm8, %v3451_v58  ;;  %3725 = vrot.lane.b32.xlu1 %v3900_v28, %s5846_s29  ;;  %v4562_v51 = vshrl.u32 %v8091_v14, 16  ;;  %v4565_v32 = vshll.u32 %v8091_v14, 16  ;;  %v8103_v50 = vshrl.u32 %v8093_v20, 16  ;;  %v8106_v16 = vshll.u32 %v8093_v20, 16 }
 0x266   : > { %v5046_v36 = vpop.permute.xlu0 %5045  ;;  %v4764_v18 = vrot.slane %v8091_v14, 5  ;;  %v4097_v30 = vrot.slane %v8091_v14, 4 }
 0x267   : > { %5097 = vst.msk [vmem:[#allocation3 + $0x10] sm:$0xff] %vm8940_vm6, %v5046_v36  ;;  %v3453_v19 = vpop.permute.xlu1 %3452  ;;  %v4564_v24 = vrot.slane %v4562_v51, 4  ;;  %v4567_v15 = vrot.slane %v4565_v32, 5  ;;  %v3904_v43 = vrot.slane %v4562_v51, 3  ;;  %v3907_v8 = vrot.slane %v4565_v32, 4 }
 0x268   : > { %3501 = vst.msk [vmem:[#allocation3 + $0x28] sm:$0xff] %vm956_vm8, %v3453_v19  ;;  %4392 = vrot.lane.b32.xlu0 %v8000_v56, %s5848_s12  ;;  %v4972_v56 = vrot.slane %v4562_v51, 5  ;;  %v4975_v46 = vrot.slane %v4565_v32, 6  ;;  %v4981_v54 = vrot.slane %v8103_v50, 5  ;;  %v4984_v6 = vrot.slane %v8106_v16, 6 }
 0x269   : > { %v8130_v45 = vor.u32 %v4567_v15, %v4564_v24  ;;  %v8132_v38 = vor.u32 %v3907_v8, %v3904_v43  ;;  %v4573_v11 = vrot.slane %v8103_v50, 4  ;;  %v4576_v60 = vrot.slane %v8106_v16, 5  ;;  %v3156_v15 = vld [vmem:[#allocation4 + $0x70] sm:$0xff] }
 0x26a   : > { %v8134_v3 = vpop.permute.xlu0 %5047  ;;  %vm8947_vm6 = vcmask 1042432   ;;  %v4098_v59 = vsel %vm1538_vm1, %v4095_v4, %v4097_v30  ;;  %v8184_v13 = vor.u32 %v4984_v6, %v4981_v54  ;;  %v3913_v19 = vrot.slane %v8103_v50, 3 }
 0x26b   : > { %v3971_v33 = vpop.permute.xlu1 %3970  ;;  %v4569_v25 = vsel %vm8946_vm7, %v7983_v41, %v8130_v45  ;;  %v8148_v34 = vsel %vm994_vm4, %v8054_v44, %v8132_v38  ;;  %v4976_v41 = vor.u32 %v4975_v46, %v4972_v56  ;;  %v4765_v48 = vsel %vm8947_vm6, %v4762_v12, %v4764_v18 }
 0x26c   : > { %4021 = vst.msk [vmem:[#allocation3 + $0x18] sm:$0xff] %vm1481_vm10, %v3971_v33  ;;  %4653 = vrot.lane.b32.xlu0 %v4569_v25, %s5849_s15  ;;  %3986 = vrot.lane.b32.xlu1 %v8148_v34, %s5847_s9  ;;  %vm8948_vm7 = vcmask 392512   ;;  %v4766_v12 = vrot.slane %v8093_v20, 5  ;;  %vm8949_vm6 = vsmask.f32 2304  ;;  %v8195_v29 = vor.u32 %v4576_v60, %v4573_v11 }
 0x26d   : > { %4168 = vst.msk [vmem:[#allocation3 + $0x18] sm:$0xff] %vm1630_vm11, %v8047_v37  ;;  %v3155_v37 = vld [vmem:[#allocation4 + $0x68] sm:$0xff]  ;;  %v4977_v4 = vsel %vm8949_vm6, %v7992_v23, %v4976_v41  ;;  %v3916_v50 = vrot.slane %v8106_v16, 4 }
 0x26e   : > { %v3712_v44 = vpop.permute.xlu0 %3711  ;;  %v5115_v42 = vld [vmem:[#allocation3 + $0x10] sm:$0xff]  ;;  %v3278_v57 = vshrl.u32 %v3155_v37, 16  ;;  %v3281_v24 = vshll.u32 %v3155_v37, 16 }
 0x26f   : > { %3761 = vst.msk [vmem:[#allocation3 + $0x20] sm:$0xff] %vm1219_vm9, %v3712_v44  ;;  %v4379_v28 = vpop.permute.xlu1 %4378  ;;  %v5750_v55 = vpop.f32.mrb[28].mxu0  ;;  %5770 = vmatprep.mubr.msk.bf16.mxu1 %vm2647_vm5, %v5115_v42 }
 0x270   : > { %4429 = vst.msk [vmem:[#allocation3 + $0x18] sm:$0xff] %vm8948_vm7, %v4379_v28  ;;  %v2861_v0 = vadd.f32 %v7617_v17, %v5750_v55  ;;  %v2852_v5 = vpop.f32.mrb[29].mxu0  ;;  %4800 = vrot.lane.b32.xlu0 %v4765_v48, %s5845_s26  ;;  %4133 = vrot.lane.b32.xlu1 %v4098_v59, %s5843_s24  ;;  %vm8950_vm7 = vmmov %vm8949_vm6  ;;  %v3280_v46 = vrot.slane %v3278_v57, 2  ;;  %vm8951_vm6 = vcmask 458112  }
 0x271   : > { %v2853_v58 = vadd.f32 %v7617_v17, %v2852_v5  ;;  %v5751_v22 = vpop.f32.mrb[30].mxu0  ;;  %v4986_v23 = vsel %vm8950_vm7, %v4976_v41, %v8184_v13  ;;  %vm8952_vm7 = vsmask.f32 3328  ;;  %v3287_v41 = vshrl.u32 %v3156_v15, 16 }
 0x272   : > { %v2913_v31 = vmax.f32 %v2861_v0, 0.0  ;;  %v2864_v51 = vadd.f32 %v7617_v17, %v5751_v22  ;;  %v2855_v32 = vpop.f32.mrb[31].mxu0  ;;  %v3973_v36 = vpop.permute.xlu0 %3972  ;;  %v8214_v6 = vsel %vm8952_vm7, %v8130_v45, %v8195_v29  ;;  %vm8954_vm7 = vcmask 392512  }
 0x273   : > { %v2911_v43 = vmax.f32 %v2853_v58, 0.0  ;;  %v2856_v8 = vadd.f32 %v7617_v17, %v2855_v32  ;;  %4022 = vst.msk [vmem:[#allocation3 + $0x20] sm:$0xff] %vm1481_vm10, %v3973_v36  ;;  %v4640_v56 = vpop.permute.xlu1 %4639  ;;  %v3283_v17 = vrot.slane %v3281_v24, 3  ;;  %v3289_v10 = vrot.slane %v3287_v41, 2 }
 0x274   : > { %v2914_v33 = vmax.f32 %v2864_v51, 0.0  ;;  %4169 = vst.msk [vmem:[#allocation3 + $0x20] sm:$0xff] %vm1630_vm11, %v8067_v61  ;;  %5061 = vrot.lane.b32.xlu0 %v4977_v4, %s5850_s16  ;;  %4394 = vrot.lane.b32.xlu1 %v4569_v25, %s5848_s12  ;;  %v3290_v61 = vshll.u32 %v3156_v15, 16  ;;  %v3021_v11 = vsel %vm509_vm15, %v2913_v31, 0.0  ;;  %vm8955_vm15 = vsmask.f32 5376 }
 0x275   : > { %4690 = vst.msk [vmem:[#allocation3 + $0x18] sm:$0xff] %vm8951_vm6, %v4640_v56  ;;  %v2912_v54 = vmax.f32 %v2856_v8, 0.0  ;;  %v3019_v25 = vsel %vm507_vm3, %v2911_v43, 0.0  ;;  %vm8953_vm6 = vcmask 589312   ;;  %v3284_v60 = vor.u32 %v3283_v17, %v3280_v46 }
 0x276   : > { %4837 = vst.msk [vmem:[#allocation3 + $0x18] sm:$0xff] %vm2304_vm14, %v8069_v63  ;;  %v3022_v16 = vsel %vm510_vm12, %v2914_v33, 0.0  ;;  %v4381_v63 = vpop.permute.xlu0 %4380  ;;  %v3292_v37 = vrot.slane %v3290_v61, 3  ;;  %v3430_v0 = vrot.slane %v8091_v14, 3  ;;  %v369_v5 = vmul.f32 0.055555556, %v8166_v26  ;;  %vm8957_vm12 = vmmov %vm8955_vm15 }
 0x277   : > { %5098 = vst.msk [vmem:[#allocation3 + $0x18] sm:$0xff] %vm8953_vm6, %v8134_v3  ;;  %v3042_v44 = vpack.c.bf16 %v3022_v16, %v3021_v11  ;;  %v3020_v45 = vsel %vm508_vm13, %v2912_v54, 0.0  ;;  %v3714_v42 = vpop.permute.xlu1 %3713  ;;  %v3285_v7 = vsel %vm8955_vm15, %v8025_v52, %v3284_v60  ;;  %v334_v58 = vadd.f32 0.5, %v298_v35 }
 0x278   : > { %4430 = vst.msk [vmem:[#allocation3 + $0x20] sm:$0xff] %vm8954_vm7, %v4381_v63  ;;  %v3041_v28 = vpack.c.bf16 %v3020_v45, %v3019_v25  ;;  %5063 = vrot.lane.b32.xlu0 %v4986_v23, %s5850_s16  ;;  %4655 = vrot.lane.b32.xlu1 %v8214_v6, %s5849_s15  ;;  %v8239_v55 = vor.u32 %v3292_v37, %v3289_v10  ;;  %vm8956_vm3 = vcmask 1042432   ;;  %v367_v51 = vmul.f32 0.055555556, %v331_v39 }
 0x279   : > { %3762 = vst.msk [vmem:[#allocation3 + $0x28] sm:$0xff] %vm1219_vm9, %v3714_v42  ;;  %v8236_v3 = vrot.slane %v3042_v44, 4  ;;  %v4767_v52 = vsel %vm8956_vm3, %v4764_v18, %v4766_v12  ;;  %v8252_v4 = vor.u32 %v3916_v50, %v3913_v19  ;;  %v332_v18 = vadd.f32 0.5, %v296_v40 }
 0x27a   : > { %3361 = vst.msk [vmem:[#allocation3 + $0x60] sm:$0xff] %vm578_vm0, %v3285_v7  ;;  %v3096_v48 = vrot.slane %v3041_v28, 4  ;;  %v4789_v59 = vpop.permute.xlu0 %4788  ;;  %v3294_v57 = vsel %vm8957_vm12, %v3284_v60, %v8239_v55  ;;  %v3431_v19 = vsel %vm864_vm2, %v3428_v9, %v3430_v0  ;;  %v4099_v24 = vrot.slane %v8093_v20, 4 }
 0x27b   : > { %v8245_v22 = vpop.permute.xlu1 %4121  ;;  %3362 = vst.msk [vmem:[#allocation3 + $0x68] sm:$0xff] %vm578_vm0, %v3294_v57  ;;  %v3432_v15 = vrot.slane %v8093_v20, 3  ;;  %v405_v43 = vfloor.f32 %v369_v5  ;;  %v403_v8 = vfloor.f32 %v367_v51  ;;  %v370_v56 = vmul.f32 0.055555556, %v334_v58 }
 0x27c   : > { %v3097_v31 = vsel %vm1538_vm1, %v8036_v2, %v3096_v48  ;;  %v3099_v26 = vsel %vm1538_vm1, %v3096_v48, %v8236_v3  ;;  %3727 = vrot.lane.b32.xlu0 %v8148_v34, %s5846_s29  ;;  %4802 = vrot.lane.b32.xlu1 %v4767_v52, %s5845_s26  ;;  %v3918_v34 = vsel %vm994_vm4, %v8132_v38, %v8252_v4  ;;  %v368_v23 = vmul.f32 0.055555556, %v332_v18 }
 0x27d   : > { %3137 = vst.msk [vmem:[#allocation4 + $0x78] sm:$0xff] %vm578_vm0, %v3097_v31  ;;  %3138 = vst.msk [vmem:[#allocation4 + $0x80] sm:$0xff] %vm578_vm0, %v3099_v26  ;;  %vm8958_vm13 = vcmask 458112   ;;  %v4100_v49 = vsel %vm1538_vm1, %v4097_v30, %v4099_v24  ;;  %v3433_v9 = vsel %vm864_vm2, %v3430_v0, %v3432_v15  ;;  %v441_v33 = vmul.f32 18.0, %v405_v43 }
 0x27e   : > { %v5116_v32 = vld [vmem:[#allocation3 + $0x18] sm:$0xff]  ;;  %v8269_v2 = vpop.permute.xlu0 %4123  ;;  %v439_v17 = vmul.f32 18.0, %v403_v8  ;;  %v406_v54 = vfloor.f32 %v370_v56  ;;  %v404_v14 = vfloor.f32 %v368_v23  ;;  %vm8959_vm7 = vsmask.f32 3328 }
 0x27f   : > { %5771 = vmatmul.mubr.msk.bf16.gmra.mrb[4].mxu1 %vm2647_vm5, %v5116_v32  ;;  %v8271_v36 = vpop.permute.xlu1 %4790  ;;  %v477_v45 = vsub.f32 %v297_v27, %v441_v33  ;;  %vm8960_vm12 = vcmask 1042432  }
 0x280   : > { %3988 = vrot.lane.b32.xlu0 %v3918_v34, %s5847_s9  ;;  %3466 = vrot.lane.b32.xlu1 %v3431_v19, %s5844_s25  ;;  %v475_v42 = vsub.f32 %v295_v62, %v439_v17  ;;  %v442_v10 = vmul.f32 18.0, %v406_v54  ;;  %v440_v37 = vmul.f32 18.0, %v404_v14 }
 0x281   : > { %vm513_vm15 = vcmp.lt.f32.partialorder %v477_v45, 15.5 }
 0x282   : > { %v4642_v46 = vpop.permute.xlu0 %4641  ;;  %vm511_vm3 = vcmp.lt.f32.partialorder %v475_v42, 15.5  ;;  %v478_v52 = vsub.f32 %v298_v35, %v442_v10  ;;  %v476_v31 = vsub.f32 %v296_v40, %v440_v37 }
 0x283   : > { %4691 = vst.msk [vmem:[#allocation3 + $0x20] sm:$0xff] %vm8958_vm13, %v4642_v46  ;;  %v3455_v38 = vpop.permute.xlu1 %3454 }
 0x284   : > { %4838 = vst.msk [vmem:[#allocation3 + $0x20] sm:$0xff] %vm2304_vm14, %v4789_v59  ;;  %4135 = vrot.lane.b32.xlu0 %v4100_v49, %s5843_s24  ;;  %3468 = vrot.lane.b32.xlu1 %v3433_v9, %s5844_s25  ;;  %v8296_v50 = vld [vmem:[#allocation4 + $0x78] sm:$0xff]  ;;  %v8309_v44 = vld [vmem:[#allocation4 + $0x80] sm:$0xff]  ;;  %vm514_vm13 = vcmp.lt.f32.partialorder %v478_v52, 15.5 }
 0x285   : > { %3502 = vst.msk [vmem:[#allocation3 + $0x30] sm:$0xff] %vm956_vm8, %v3455_v38  ;;  %v8299_v30 = vshrl.u32 %v8296_v50, 16  ;;  %v8302_v41 = vshll.u32 %v8296_v50, 16  ;;  %v4768_v7 = vrot.slane %v8296_v50, 5  ;;  %v4101_v48 = vrot.slane %v8296_v50, 4 }
 0x286   : > { %v5050_v61 = vpop.permute.xlu0 %5049  ;;  %v8330_v27 = vshrl.u32 %v8309_v44, 16  ;;  %v8333_v53 = vshll.u32 %v8309_v44, 16 }
 0x287   : > { %5099 = vst.msk [vmem:[#allocation3 + $0x20] sm:$0xff] %vm8953_vm6, %v5050_v61  ;;  %v3457_v11 = vpop.permute.xlu1 %3456  ;;  %v4582_v25 = vrot.slane %v8299_v30, 4  ;;  %v4585_v16 = vrot.slane %v8302_v41, 5  ;;  %v3922_v63 = vrot.slane %v8299_v30, 3  ;;  %v3925_v60 = vrot.slane %v8302_v41, 4 }
 0x288   : > { %3503 = vst.msk [vmem:[#allocation3 + $0x38] sm:$0xff] %vm956_vm8, %v3457_v11  ;;  %4396 = vrot.lane.b32.xlu0 %v8214_v6, %s5848_s12  ;;  %3729 = vrot.lane.b32.xlu1 %v3918_v34, %s5846_s29  ;;  %v4990_v6 = vrot.slane %v8299_v30, 5  ;;  %v4993_v1 = vrot.slane %v8302_v41, 6  ;;  %v4769_v26 = vsel %vm8960_vm12, %v4766_v12, %v4768_v7  ;;  %v4102_v47 = vsel %vm1538_vm1, %v4099_v24, %v4101_v48 }
 0x289   : > { %v8319_v28 = vor.u32 %v4585_v16, %v4582_v25  ;;  %v8321_v39 = vor.u32 %v3925_v60, %v3922_v63  ;;  %v4999_v21 = vrot.slane %v8330_v27, 5  ;;  %v5002_v40 = vrot.slane %v8333_v53, 6 }
 0x28a   : > { %v8325_v59 = vpop.permute.xlu0 %5051  ;;  %v4994_v32 = vor.u32 %v4993_v1, %v4990_v6  ;;  %v4591_v8 = vrot.slane %v8330_v27, 4  ;;  %v4594_v24 = vrot.slane %v8333_v53, 5  ;;  %vm8961_vm6 = vcmask 392512  }
 0x28b   : > { %v3975_v62 = vpop.permute.xlu1 %3974  ;;  %v4587_v0 = vsel %vm8959_vm7, %v8195_v29, %v8319_v28  ;;  %v8341_v5 = vsel %vm994_vm4, %v8252_v4, %v8321_v39  ;;  %v5834_v29 = vld [vmem:[%s8852_s2] ss:$0 sm:$0xff]  ;;  %vm512_vm7 = vcmp.lt.f32.partialorder %v476_v31, 15.5  ;;  %v8377_v17 = vor.u32 %v5002_v40, %v4999_v21 }
 0x28c   : > { %4023 = vst.msk [vmem:[#allocation3 + $0x28] sm:$0xff] %vm1481_vm10, %v3975_v62  ;;  %v5754_v58 = vpop.f32.mrb[32].mxu0  ;;  %4657 = vrot.lane.b32.xlu0 %v4587_v0, %s5849_s15  ;;  %3990 = vrot.lane.b32.xlu1 %v8341_v5, %s5847_s9  ;;  %vm8962_vm12 = vsmask.f32 2304  ;;  %v8382_v11 = vor.u32 %v4594_v24, %v4591_v8  ;;  %v3298_v63 = vrot.slane %v8299_v30, 2  ;;  %v3301_v60 = vrot.slane %v8302_v41, 3 }
 0x28d   : > { %4170 = vst.msk [vmem:[#allocation3 + $0x28] sm:$0xff] %vm1630_vm11, %v8245_v22  ;;  %v2877_v4 = vadd.f32 %v5834_v29, %v5754_v58  ;;  %v2868_v57 = vpop.f32.mrb[33].mxu0  ;;  %v4995_v61 = vsel %vm8962_vm12, %v8184_v13, %v4994_v32  ;;  %v4770_v13 = vrot.slane %v8309_v44, 5  ;;  %v3931_v42 = vrot.slane %v8330_v27, 3 }
 0x28e   : > { %v2869_v35 = vadd.f32 %v5834_v29, %v2868_v57  ;;  %v5755_v22 = vpop.f32.mrb[34].mxu0  ;;  %v3716_v51 = vpop.permute.xlu0 %3715  ;;  %v5117_v18 = vld [vmem:[#allocation3 + $0x20] sm:$0xff]  ;;  %v3934_v6 = vrot.slane %v8333_v53, 4  ;;  %v3302_v30 = vor.u32 %v3301_v60, %v3298_v63  ;;  %v3310_v41 = vrot.slane %v8333_v53, 3 }
 0x28f   : > { %v2917_v34 = vmax.f32 %v2877_v4, 0.0  ;;  %v2880_v19 = vadd.f32 %v5834_v29, %v5755_v22  ;;  %3763 = vst.msk [vmem:[#allocation3 + $0x30] sm:$0xff] %vm1219_vm9, %v3716_v51  ;;  %v4383_v12 = vpop.permute.xlu1 %4382  ;;  %v2871_v43 = vpop.f32.mrb[35].mxu0  ;;  %5774 = vmatprep.mubr.msk.bf16.mxu1 %vm2647_vm5, %v5117_v18 }
 0x290   : > { %v2915_v56 = vmax.f32 %v2869_v35, 0.0  ;;  %4431 = vst.msk [vmem:[#allocation3 + $0x28] sm:$0xff] %vm8961_vm6, %v4383_v12  ;;  %v2872_v23 = vadd.f32 %v5834_v29, %v2871_v43  ;;  %4804 = vrot.lane.b32.xlu0 %v4769_v26, %s5845_s26  ;;  %4137 = vrot.lane.b32.xlu1 %v4102_v47, %s5843_s24  ;;  %v3935_v52 = vor.u32 %v3934_v6, %v3931_v42  ;;  %v3434_v29 = vrot.slane %v8296_v50, 3 }
 0x291   : > { %v3025_v46 = vsel %vm513_vm15, %v2917_v34, 0.0  ;;  %v2918_v38 = vmax.f32 %v2880_v19, 0.0  ;;  %vm8963_vm15 = vcmask 458112   ;;  %v3436_v35 = vrot.slane %v8309_v44, 3 }
 0x292   : > { %v3023_v49 = vsel %vm511_vm3, %v2915_v56, 0.0  ;;  %v2916_v9 = vmax.f32 %v2872_v23, 0.0  ;;  %v3977_v33 = vpop.permute.xlu0 %3976  ;;  %vm8964_vm3 = vcmask 589312   ;;  %v3936_v26 = vsel %vm994_vm4, %v8321_v39, %v3935_v52 }
 0x293   : > { %v3026_v54 = vsel %vm514_vm13, %v2918_v38, 0.0  ;;  %4024 = vst.msk [vmem:[#allocation3 + $0x30] sm:$0xff] %vm1481_vm10, %v3977_v33  ;;  %v4644_v14 = vpop.permute.xlu1 %4643  ;;  %vm8965_vm13 = vmmov %vm8961_vm6  ;;  %v3435_v47 = vsel %vm864_vm2, %v3432_v15, %v3434_v29 }
 0x294   : > { %v3044_v25 = vpack.c.bf16 %v3026_v54, %v3025_v46  ;;  %v3024_v16 = vsel %vm512_vm7, %v2916_v9, 0.0  ;;  %4171 = vst.msk [vmem:[#allocation3 + $0x30] sm:$0xff] %vm1630_vm11, %v8269_v2  ;;  %5065 = vrot.lane.b32.xlu0 %v4995_v61, %s5850_s16  ;;  %4398 = vrot.lane.b32.xlu1 %v4587_v0, %s5848_s12  ;;  %v3307_v2 = vrot.slane %v8330_v27, 2  ;;  %vm8966_vm6 = vmmov %vm8962_vm12  ;;  %vm8967_vm7 = vsmask.f32 3328 }
 0x295   : > { %4692 = vst.msk [vmem:[#allocation3 + $0x28] sm:$0xff] %vm8963_vm15, %v4644_v14  ;;  %v3043_v45 = vpack.c.bf16 %v3024_v16, %v3023_v49  ;;  %v5004_v62 = vsel %vm8966_vm6, %v4994_v32, %v8377_v17  ;;  %v4596_v27 = vsel %vm8967_vm7, %v8319_v28, %v8382_v11  ;;  %vm8968_vm12 = vcmask 60416  }
 0x296   : > { %4839 = vst.msk [vmem:[#allocation3 + $0x28] sm:$0xff] %vm2304_vm14, %v8271_v36  ;;  %v3102_v10 = vrot.slane %v3044_v25, 4  ;;  %v4385_v37 = vpop.permute.xlu0 %4384  ;;  %vm8969_vm15 = vsmask.f32 5376  ;;  %v8412_v53 = vor.u32 %v3310_v41, %v3307_v2  ;;  %vm8972_vm6 = vcmask 458112  }
 0x297   : > { %5100 = vst.msk [vmem:[#allocation3 + $0x28] sm:$0xff] %vm8964_vm3, %v8325_v59  ;;  %v3100_v1 = vrot.slane %v3043_v45, 4  ;;  %v3718_v36 = vpop.permute.xlu1 %3717  ;;  %v3303_v59 = vsel %vm8969_vm15, %v8239_v55, %v3302_v30  ;;  %vm8970_vm3 = vmmov %vm8969_vm15  ;;  %vm8973_vm7 = vcmask 589312   ;;  %v3437_v32 = vsel %vm864_vm2, %v3434_v29, %v3436_v35 }
 0x298   : > { %4432 = vst.msk [vmem:[#allocation3 + $0x30] sm:$0xff] %vm8965_vm13, %v4385_v37  ;;  %5067 = vrot.lane.b32.xlu0 %v5004_v62, %s5850_s16  ;;  %4659 = vrot.lane.b32.xlu1 %v4596_v27, %s5849_s15  ;;  %v3312_v55 = vsel %vm8970_vm3, %v3302_v30, %v8412_v53  ;;  %vm8971_vm13 = vcmask 1042432   ;;  %vm8976_vm3 = vcmask 392512  }
 0x299   : > { %3141 = vst.msk [vmem:[#allocation4 + $0x98] sm:$0xf] %vm8968_vm12, %v3102_v10  ;;  %v3101_v0 = vsel %vm1538_vm1, %v8236_v3, %v3100_v1  ;;  %v3103_v58 = vsel %vm1538_vm1, %v3100_v1, %v3102_v10  ;;  %v4771_v3 = vsel %vm8971_vm13, %v4768_v7, %v4770_v13  ;;  %v4103_v7 = vrot.slane %v8309_v44, 4  ;;  %vm8975_vm15 = vmmov %vm8971_vm13 }
 0x29a   : > { %3764 = vst.msk [vmem:[#allocation3 + $0x38] sm:$0xff] %vm1219_vm9, %v3718_v36  ;;  %v4793_v28 = vpop.permute.xlu0 %4792  ;;  %vm8974_vm12 = vsmask.f32 3328  ;;  %vm8977_vm13 = vsmask.f32 2304 }
 0x29b   : > { %3363 = vst.msk [vmem:[#allocation3 + $0x70] sm:$0xff] %vm578_vm0, %v3303_v59  ;;  %3139 = vst.msk [vmem:[#allocation4 + $0x88] sm:$0xff] %vm578_vm0, %v3101_v0  ;;  %v4126_v4 = vpop.permute.xlu1 %4125  ;;  %v4104_v18 = vsel %vm1538_vm1, %v4101_v48, %v4103_v7 }
 0x29c   : > { %3140 = vst.msk [vmem:[#allocation4 + $0x90] sm:$0xff] %vm578_vm0, %v3103_v58  ;;  %3364 = vst.msk [vmem:[#allocation3 + $0x78] sm:$0xff] %vm578_vm0, %v3312_v55  ;;  %3731 = vrot.lane.b32.xlu0 %v8341_v5, %s5846_s29  ;;  %4806 = vrot.lane.b32.xlu1 %v4771_v3, %s5845_s26 }
 0x29e   : > { %v5118_v57 = vld [vmem:[#allocation3 + $0x28] sm:$0xff]  ;;  %v4646_v31 = vpop.permute.xlu0 %4645 }
 0x29f   : > { %5775 = vmatmul.mubr.msk.bf16.gmra.mrb[8].mxu1 %vm2647_vm5, %v5118_v57  ;;  %4693 = vst.msk [vmem:[#allocation3 + $0x30] sm:$0xff] %vm8972_vm6, %v4646_v31  ;;  %v8441_v5 = vpop.permute.xlu1 %4794 }
 0x2a0   : > { %4840 = vst.msk [vmem:[#allocation3 + $0x30] sm:$0xff] %vm2304_vm14, %v4793_v28  ;;  %3992 = vrot.lane.b32.xlu0 %v3936_v26, %s5847_s9  ;;  %3470 = vrot.lane.b32.xlu1 %v3435_v47, %s5844_s25 }
 0x2a2   : > { %v8446_v22 = vld [vmem:[#allocation4 + $0x88] sm:$0xff]  ;;  %v5054_v39 = vpop.permute.xlu0 %5053 }
 0x2a3   : > { %v8449_v20 = vshrl.u32 %v8446_v22, 16  ;;  %v8452_v15 = vshll.u32 %v8446_v22, 16  ;;  %5101 = vst.msk [vmem:[#allocation3 + $0x30] sm:$0xff] %vm8973_vm7, %v5054_v39  ;;  %v3459_v51 = vpop.permute.xlu1 %3458  ;;  %v8470_v8 = vld [vmem:[#allocation4 + $0x90] sm:$0xff]  ;;  %v4772_v23 = vrot.slane %v8446_v22, 5  ;;  %v4105_v46 = vrot.slane %v8446_v22, 4 }
 0x2a4   : > { %3504 = vst.msk [vmem:[#allocation3 + $0x40] sm:$0xff] %vm956_vm8, %v3459_v51  ;;  %4139 = vrot.lane.b32.xlu0 %v4104_v18, %s5843_s24  ;;  %3472 = vrot.lane.b32.xlu1 %v3437_v32, %s5844_s25  ;;  %v8478_v38 = vshrl.u32 %v8470_v8, 16  ;;  %v8481_v49 = vshll.u32 %v8470_v8, 16  ;;  %v3160_v37 = vld [vmem:[#allocation4 + $0x90] sm:$0x7]  ;;  %v8552_v39 = vld [vmem:[#allocation4 + $0x98] sm:$0xff] }
 0x2a5   : > { %v4600_v21 = vrot.slane %v8449_v20, 4  ;;  %v4603_v40 = vrot.slane %v8452_v15, 5  ;;  %v3940_v34 = vrot.slane %v8449_v20, 3  ;;  %v3943_v50 = vrot.slane %v8452_v15, 4  ;;  %v3532_v31 = vld [vmem:[#allocation4 + $0x90] sm:$0xf] }
 0x2a6   : > { %v5056_v19 = vpop.permute.xlu0 %5055  ;;  %v5008_v14 = vrot.slane %v8449_v20, 5  ;;  %v5011_v61 = vrot.slane %v8452_v15, 6  ;;  %v4106_v16 = vsel %vm1538_vm1, %v4103_v7, %v4105_v46  ;;  %v5017_v63 = vrot.slane %v8478_v38, 5 }
 0x2a7   : > { %v3461_v48 = vpop.permute.xlu1 %3460  ;;  %v4604_v12 = vor.u32 %v4603_v40, %v4600_v21  ;;  %v8468_v43 = vor.u32 %v3943_v50, %v3940_v34  ;;  %v5020_v42 = vrot.slane %v8481_v49, 6  ;;  %v4609_v2 = vrot.slane %v8478_v38, 4  ;;  %v3385_v21 = vld [vmem:[#allocation4 + $0x90] sm:$0x7] }
 0x2a8   : > { %3505 = vst.msk [vmem:[#allocation3 + $0x48] sm:$0xff] %vm956_vm8, %v3461_v48  ;;  %4400 = vrot.lane.b32.xlu0 %v4596_v27, %s5848_s12  ;;  %3733 = vrot.lane.b32.xlu1 %v3936_v26, %s5846_s29  ;;  %v5012_v45 = vor.u32 %v5011_v61, %v5008_v14  ;;  %v4612_v10 = vrot.slane %v8481_v49, 5  ;;  %v3316_v36 = vrot.slane %v8449_v20, 2  ;;  %v3319_v62 = vrot.slane %v8452_v15, 3  ;;  %v3793_v20 = vld [vmem:[#allocation4 + $0x98] sm:$0xf] }
 0x2a9   : > { %v4605_v33 = vsel %vm8974_vm12, %v8382_v11, %v4604_v12  ;;  %v8489_v54 = vsel %vm994_vm4, %v3935_v52, %v8468_v43  ;;  %v4773_v11 = vsel %vm8975_vm15, %v4770_v13, %v4772_v23  ;;  %v8517_v41 = vor.u32 %v5020_v42, %v5017_v63  ;;  %vm8978_vm12 = vmmov %vm8976_vm3 }
 0x2aa   : > { %v3720_v24 = vpop.permute.xlu0 %3719  ;;  %v5119_v56 = vld [vmem:[#allocation3 + $0x30] sm:$0xff]  ;;  %v5013_v30 = vsel %vm8977_vm13, %v8377_v17, %v5012_v45  ;;  %v8519_v1 = vor.u32 %v4612_v10, %v4609_v2  ;;  %v4774_v27 = vrot.slane %v8470_v8, 5  ;;  %v3323_v17 = vshrl.u32 %v3160_v37, 16  ;;  %vm8979_vm15 = vmmov %vm8977_vm13 }
 0x2ab   : > { %3765 = vst.msk [vmem:[#allocation3 + $0x40] sm:$0xff] %vm1219_vm9, %v3720_v24  ;;  %v3979_v9 = vpop.permute.xlu1 %3978  ;;  %5778 = vmatprep.mubr.msk.bf16.mxu1 %vm2647_vm5, %v5119_v56  ;;  %v3326_v59 = vshll.u32 %v3160_v37, 16  ;;  %v3949_v58 = vrot.slane %v8478_v38, 3  ;;  %v3952_v28 = vrot.slane %v8481_v49, 4  ;;  %v3320_v52 = vor.u32 %v3319_v62, %v3316_v36 }
 0x2ac   : > { %4025 = vst.msk [vmem:[#allocation3 + $0x38] sm:$0xff] %vm1481_vm10, %v3979_v9  ;;  %4661 = vrot.lane.b32.xlu0 %v4605_v33, %s5849_s15  ;;  %3994 = vrot.lane.b32.xlu1 %v8489_v54, %s5847_s9  ;;  %v5022_v55 = vsel %vm8979_vm15, %v5012_v45, %v8517_v41  ;;  %v3325_v3 = vrot.slane %v3323_v17, 2  ;;  %vm8981_vm13 = vsmask.f32 5376  ;;  %v3695_v18 = vshrl.u32 %v3532_v31, 16 }
 0x2ad   : > { %4172 = vst.msk [vmem:[#allocation3 + $0x38] sm:$0xff] %vm1630_vm11, %v4126_v4  ;;  %v3328_v57 = vrot.slane %v3326_v59, 3  ;;  %v3321_v26 = vsel %vm8981_vm13, %v8412_v53, %v3320_v52  ;;  %v8554_v51 = vor.u32 %v3952_v28, %v3949_v58  ;;  %v3698_v32 = vshll.u32 %v3532_v31, 16 }
 0x2ae   : > { %v3981_v25 = vpop.permute.xlu0 %3980  ;;  %3365 = vst.msk [vmem:[#allocation3 + $0x80] sm:$0xff] %vm578_vm0, %v3321_v26  ;;  %v4616_v34 = vshrl.u32 %v8552_v39, 16  ;;  %v4619_v50 = vshll.u32 %v8552_v39, 16  ;;  %v3959_v48 = vshll.u32 %v3793_v20, 16  ;;  %v4107_v56 = vrot.slane %v8470_v8, 4 }
 0x2af   : > { %4026 = vst.msk [vmem:[#allocation3 + $0x40] sm:$0xff] %vm1481_vm10, %v3981_v25  ;;  %v4387_v60 = vpop.permute.xlu1 %4386  ;;  %v3329_v47 = vor.u32 %v3328_v57, %v3325_v3  ;;  %v3954_v38 = vsel %vm994_vm4, %v8468_v43, %v8554_v51  ;;  %v3440_v49 = vrot.slane %v3385_v21, 3  ;;  %v3697_v9 = vrot.slane %v3695_v18, 3 }
 0x2b0   : > { %4433 = vst.msk [vmem:[#allocation3 + $0x38] sm:$0xff] %vm8976_vm3, %v4387_v60  ;;  %4808 = vrot.lane.b32.xlu0 %v4773_v11, %s5845_s26  ;;  %4141 = vrot.lane.b32.xlu1 %v4106_v16, %s5843_s24  ;;  %vm8980_vm3 = vsmask.f32 3328  ;;  %v4621_v14 = vrot.slane %v4619_v50, 5  ;;  %v3961_v63 = vrot.slane %v3959_v48, 4  ;;  %vm8985_vm15 = vcmask 392512  }
 0x2b1   : > { %v8537_v4 = vsel %vm8980_vm3, %v4604_v12, %v8519_v1  ;;  %v4201_v60 = vld [vmem:[#allocation4 + $0x98] sm:$0x1f]  ;;  %vm8986_vm3 = vcmask 589312   ;;  %v4776_v17 = vrot.slane %v8552_v39, 5  ;;  %v5029_v58 = vrot.slane %v4619_v50, 6 }
 0x2b2   : > { %v4128_v13 = vpop.permute.xlu0 %4127  ;;  %v4364_v37 = vshrl.u32 %v4201_v60, 16 }
 0x2b3   : > { %4173 = vst.msk [vmem:[#allocation3 + $0x40] sm:$0xff] %vm1630_vm11, %v4128_v13  ;;  %v4648_v6 = vpop.permute.xlu1 %4647  ;;  %v4054_v13 = vld [vmem:[#allocation4 + $0x98] sm:$0xf] }
 0x2b4   : > { %4694 = vst.msk [vmem:[#allocation3 + $0x38] sm:$0xff] %vm8972_vm6, %v4648_v6  ;;  %5069 = vrot.lane.b32.xlu0 %v5013_v30, %s5850_s16  ;;  %4402 = vrot.lane.b32.xlu1 %v4605_v33, %s5848_s12  ;;  %vm8982_vm6 = vcmask 1042432   ;;  %v3700_v33 = vrot.slane %v3698_v32, 4  ;;  %v4367_v6 = vshll.u32 %v4201_v60, 16  ;;  %v4109_v59 = vrot.slane %v4054_v13, 4 }
 0x2b5   : > { %4841 = vst.msk [vmem:[#allocation3 + $0x38] sm:$0xff] %vm2304_vm14, %v8441_v5  ;;  %v4775_v7 = vsel %vm8982_vm6, %v4772_v23, %v4774_v27  ;;  %v3438_v5 = vrot.slane %v8446_v22, 3  ;;  %vm8989_vm6 = vmmov %vm8986_vm3 }
 0x2b6   : > { %5102 = vst.msk [vmem:[#allocation3 + $0x38] sm:$0xff] %vm8973_vm7, %v5056_v19  ;;  %v4389_v0 = vpop.permute.xlu0 %4388  ;;  %vm8983_vm7 = vmmov %vm8981_vm13  ;;  %v3956_v19 = vshrl.u32 %v3793_v20, 16  ;;  %v3701_v11 = vor.u32 %v3700_v33, %v3697_v9  ;;  %vm8988_vm13 = vsmask.f32 3328  ;;  %v4870_v20 = vld [vmem:[#allocation4 + $0xa0] sm:$0x3f] }
 0x2b7   : > { %4434 = vst.msk [vmem:[#allocation3 + $0x40] sm:$0xff] %vm8978_vm12, %v4389_v0  ;;  %v3722_v29 = vpop.permute.xlu1 %3721  ;;  %v3330_v53 = vsel %vm8983_vm7, %v3320_v52, %v3329_v47  ;;  %v3439_v24 = vsel %vm864_vm2, %v3436_v35, %v3438_v5  ;;  %vm8984_vm12 = vcmask 458112   ;;  %v4108_v35 = vsel %vm1538_vm1, %v4105_v46, %v4107_v56  ;;  %v4462_v46 = vld [vmem:[#allocation4 + $0xa0] sm:$0x1f] }
 0x2b8   : > { %3766 = vst.msk [vmem:[#allocation3 + $0x48] sm:$0xff] %vm1219_vm9, %v3722_v29  ;;  %5071 = vrot.lane.b32.xlu0 %v5022_v55, %s5850_s16  ;;  %4663 = vrot.lane.b32.xlu1 %v8537_v4, %s5849_s15  ;;  %v3441_v25 = vsel %vm864_vm2, %v3438_v5, %v3440_v49  ;;  %v3958_v16 = vrot.slane %v3956_v19, 3  ;;  %v3702_v2 = vsel %vm994_vm4, %v8468_v43, %v3701_v11  ;;  %vm8987_vm2 = vmmov %vm8984_vm12  ;;  %v4625_v30 = vshrl.u32 %v4462_v46, 16 }
 0x2b9   : > { %3366 = vst.msk [vmem:[#allocation3 + $0x88] sm:$0xff] %vm578_vm0, %v3330_v53  ;;  %v4628_v36 = vshll.u32 %v4462_v46, 16  ;;  %v5026_v0 = vrot.slane %v4616_v34, 5  ;;  %v4366_v29 = vrot.slane %v4364_v37, 4  ;;  %v4369_v55 = vrot.slane %v4367_v6, 5 }
 0x2ba   : > { %v3962_v10 = vor.u32 %v3961_v63, %v3958_v16  ;;  %v4627_v57 = vrot.slane %v4625_v30, 4  ;;  %vm8991_vm7 = vsmask.f32 2304  ;;  %v5036_v53 = vshll.u32 %v4870_v20, 16 }
 0x2bb   : > { %v4130_v15 = vpop.permute.xlu1 %4129  ;;  %v4630_v31 = vrot.slane %v4628_v36, 5  ;;  %v5030_v5 = vor.u32 %v5029_v58, %v5026_v0  ;;  %v4370_v39 = vor.u32 %v4369_v55, %v4366_v29 }
 0x2bc   : > { %3735 = vrot.lane.b32.xlu0 %v8489_v54, %s5846_s29  ;;  %4810 = vrot.lane.b32.xlu1 %v4775_v7, %s5845_s26  ;;  %v4618_v54 = vrot.slane %v4616_v34, 4  ;;  %v3963_v52 = vsel %vm994_vm4, %v8554_v51, %v3962_v10  ;;  %vm8990_vm4 = vcmask 1042432   ;;  %v4110_v7 = vsel %vm1538_vm1, %v4107_v56, %v4109_v59  ;;  %vm8992_vm1 = vmmov %vm8988_vm13 }
 0x2bd   : > { %v5120_v40 = vld [vmem:[#allocation3 + $0x38] sm:$0xff]  ;;  %v4777_v47 = vsel %vm8990_vm4, %v4774_v27, %v4776_v17  ;;  %v5033_v51 = vshrl.u32 %v4870_v20, 16  ;;  %v5031_v27 = vsel %vm8991_vm7, %v8517_v41, %v5030_v5  ;;  %v4371_v18 = vsel %vm8992_vm1, %v8519_v1, %v4370_v39 }
 0x2be   : > { %5779 = vmatmul.mubr.msk.bf16.gmra.mrb[12].mxu1 %vm2647_vm5, %v5120_v40  ;;  %v4650_v12 = vpop.permute.xlu0 %4649  ;;  %v4622_v45 = vor.u32 %v4621_v14, %v4618_v54  ;;  %v4631_v32 = vor.u32 %v4630_v31, %v4627_v57  ;;  %v4723_v40 = vld [vmem:[#allocation4 + $0xa0] sm:$0x1f]  ;;  %v5038_v48 = vrot.slane %v5036_v53, 6 }
 0x2bf   : > { %4695 = vst.msk [vmem:[#allocation3 + $0x40] sm:$0xff] %vm8984_vm12, %v4650_v12  ;;  %v3983_v23 = vpop.permute.xlu1 %3982  ;;  %vm8993_vm12 = vmmov %vm8992_vm1  ;;  %v4778_v19 = vrot.slane %v4723_v40, 5  ;;  %v5140_v53 = vld [vmem:[%s5896_s23 + $0x18] sm:$0xff] }
 0x2c0   : > { %4027 = vst.msk [vmem:[#allocation3 + $0x48] sm:$0xff] %vm1481_vm10, %v3983_v23  ;;  %3996 = vrot.lane.b32.xlu0 %v3954_v38, %s5847_s9  ;;  %3474 = vrot.lane.b32.xlu1 %v3439_v24, %s5844_s25  ;;  %v4623_v28 = vsel %vm8988_vm13, %v8519_v1, %v4622_v45  ;;  %v4632_v41 = vsel %vm8993_vm12, %v4622_v45, %v4631_v32  ;;  %v5035_v1 = vrot.slane %v5033_v51, 5  ;;  %vm8995_vm13 = vmmov %vm8991_vm7 }
 0x2c1   : > { %4174 = vst.msk [vmem:[#allocation3 + $0x48] sm:$0xff] %vm1630_vm11, %v4130_v15  ;;  %vm8997_vm7 = vmmov %vm8987_vm2 }
 0x2c2   : > { %v4797_v44 = vpop.permute.xlu0 %4796  ;;  %v5039_v56 = vor.u32 %v5038_v48, %v5035_v1  ;;  %vm8998_vm1 = vmmov %vm8989_vm6 }
 0x2c3   : > { %4842 = vst.msk [vmem:[#allocation3 + $0x40] sm:$0xff] %vm2304_vm14, %v4797_v44  ;;  %v4391_v61 = vpop.permute.xlu1 %4390 }
 0x2c4   : > { %4435 = vst.msk [vmem:[#allocation3 + $0x48] sm:$0xff] %vm8985_vm15, %v4391_v61  ;;  %4143 = vrot.lane.b32.xlu0 %v4108_v35, %s5843_s24  ;;  %3476 = vrot.lane.b32.xlu1 %v3441_v25, %s5844_s25  ;;  %v5040_v49 = vsel %vm8995_vm13, %v5030_v5, %v5039_v56  ;;  %vm9003_vm13 = vmmov %vm8997_vm7 }
 0x2c6   : > { %v5058_v22 = vpop.permute.xlu0 %5057 }
 0x2c7   : > { %5103 = vst.msk [vmem:[#allocation3 + $0x40] sm:$0xff] %vm8986_vm3, %v5058_v22  ;;  %v4652_v42 = vpop.permute.xlu1 %4651  ;;  %vm8994_vm3 = vmmov %vm8990_vm4 }
 0x2c8   : > { %4696 = vst.msk [vmem:[#allocation3 + $0x48] sm:$0xff] %vm8987_vm2, %v4652_v42  ;;  %4404 = vrot.lane.b32.xlu0 %v8537_v4, %s5848_s12  ;;  %3737 = vrot.lane.b32.xlu1 %v3702_v2, %s5846_s29  ;;  %v4779_v24 = vsel %vm8994_vm3, %v4776_v17, %v4778_v19  ;;  %vm8996_vm4 = vmmov %vm8985_vm15 }
 0x2c9   : > { %vm8999_vm12 = vmmov %vm8996_vm4 }
 0x2ca   : > { %v5060_v62 = vpop.permute.xlu0 %5059  ;;  %vm9001_vm3 = vmmov %vm8998_vm1 }
 0x2cb   : > { %v4799_v43 = vpop.permute.xlu1 %4798 }
 0x2cc   : > { %4843 = vst.msk [vmem:[#allocation3 + $0x48] sm:$0xff] %vm2304_vm14, %v4799_v43  ;;  %4665 = vrot.lane.b32.xlu0 %v4623_v28, %s5849_s15  ;;  %3998 = vrot.lane.b32.xlu1 %v3963_v52, %s5847_s9 }
 0x2cd   : > { %5104 = vst.msk [vmem:[#allocation3 + $0x48] sm:$0xff] %vm8989_vm6, %v5060_v62 }
 0x2ce   : > { %v3724_v4 = vpop.permute.xlu0 %3723  ;;  %v5121_v3 = vld [vmem:[#allocation3 + $0x40] sm:$0xff] }
 0x2cf   : > { %v3463_v26 = vpop.permute.xlu1 %3462  ;;  %5782 = vmatprep.mubr.msk.bf16.mxu1 %vm2647_vm5, %v5121_v3 }
 0x2d0   : > { %3506 = vst.msk [vmem:[#allocation3 + $0x50] sm:$0xff] %vm956_vm8, %v3463_v26  ;;  %4812 = vrot.lane.b32.xlu0 %v4777_v47, %s5845_s26  ;;  %4145 = vrot.lane.b32.xlu1 %v4110_v7, %s5843_s24 }
 0x2d1   : > { %3767 = vst.msk [vmem:[#allocation3 + $0x50] sm:$0xff] %vm1219_vm9, %v3724_v4 }
 0x2d2   : > { %v3985_v15 = vpop.permute.xlu0 %3984 }
 0x2d3   : > { %4028 = vst.msk [vmem:[#allocation3 + $0x50] sm:$0xff] %vm1481_vm10, %v3985_v15  ;;  %v3465_v8 = vpop.permute.xlu1 %3464 }
 0x2d4   : > { %3507 = vst.msk [vmem:[#allocation3 + $0x58] sm:$0xff] %vm956_vm8, %v3465_v8  ;;  %5073 = vrot.lane.b32.xlu0 %v5031_v27, %s5850_s16  ;;  %4406 = vrot.lane.b32.xlu1 %v4371_v18, %s5848_s12  ;;  %v5122_v21 = vld [vmem:[#allocation3 + $0x48] sm:$0xff]  ;;  %v8675_v8 = vld [vmem:[%s8854_s4] ss:$0 sm:$0xff]  ;;  %v5142_v27 = vld [vmem:[%s5896_s23 + $0x28] sm:$0xff] }
 0x2d5   : > { %5783 = vmatmul.mubr.msk.bf16.gmra.mrb[16].mxu1 %vm2647_vm5, %v5122_v21 }
 0x2d6   : > { %v4132_v34 = vpop.permute.xlu0 %4131 }
 0x2d7   : > { %4175 = vst.msk [vmem:[#allocation3 + $0x50] sm:$0xff] %vm1630_vm11, %v4132_v34  ;;  %v3726_v50 = vpop.permute.xlu1 %3725 }
 0x2d8   : > { %3768 = vst.msk [vmem:[#allocation3 + $0x58] sm:$0xff] %vm1219_vm9, %v3726_v50  ;;  %4667 = vrot.lane.b32.xlu1 %v4632_v41, %s5849_s15  ;;  %v5143_v41 = vld [vmem:[%s5896_s23 + $0x30] sm:$0xff] }
 0x2da   : > { %v4393_v12 = vpop.permute.xlu0 %4392 }
 0x2db   : > { %4436 = vst.msk [vmem:[#allocation3 + $0x50] sm:$0xff] %vm8985_vm15, %v4393_v12  ;;  %vm9000_vm15 = vmmov %vm8987_vm2  ;;  %v5141_v12 = vld [vmem:[%s5896_s23 + $0x20] sm:$0xff] }
 0x2dc   : > { %4814 = vrot.lane.b32.xlu1 %v4779_v24, %s5845_s26  ;;  %s5805_s26 = smul.u32 288, %s9015_s19 }
 0x2de   : > { %v4654_v23 = vpop.permute.xlu0 %4653  ;;  %v3987_v38 = vpop.permute.xlu1 %3986  ;;  %s8690_s9 = scalar_lea.vmem %s8855_s5, %s5805_s26 }
 0x2df   : > { %4697 = vst.msk [vmem:[#allocation3 + $0x50] sm:$0xff] %vm8987_vm2, %v4654_v23  ;;  %vm9002_vm2 = vmmov %vm8996_vm4 }
 0x2e0   : > { %4029 = vst.msk [vmem:[#allocation3 + $0x58] sm:$0xff] %vm1481_vm10, %v3987_v38  ;;  %5075 = vrot.lane.b32.xlu1 %v5040_v49, %s5850_s16 }
 0x2e2   : > { %v4801_v9 = vpop.permute.xlu0 %4800  ;;  %v4134_v33 = vpop.permute.xlu1 %4133 }
 0x2e3   : > { %4844 = vst.msk [vmem:[#allocation3 + $0x50] sm:$0xff] %vm2304_vm14, %v4801_v9 }
 0x2e4   : > { %4176 = vst.msk [vmem:[#allocation3 + $0x58] sm:$0xff] %vm1630_vm11, %v4134_v33 }
 0x2e6   : > { %v5062_v44 = vpop.permute.xlu0 %5061  ;;  %v4395_v35 = vpop.permute.xlu1 %4394 }
 0x2e7   : > { %5105 = vst.msk [vmem:[#allocation3 + $0x50] sm:$0xff] %vm8989_vm6, %v5062_v44  ;;  %vm9004_vm6 = vmmov %vm8998_vm1 }
 0x2e8   : > { %4437 = vst.msk [vmem:[#allocation3 + $0x58] sm:$0xff] %vm8996_vm4, %v4395_v35  ;;  %vm9005_vm4 = vmmov %vm9002_vm2 }
 0x2ea   : > { %v5064_v54 = vpop.permute.xlu0 %5063  ;;  %v4656_v14 = vpop.permute.xlu1 %4655 }
 0x2eb   : > { %4698 = vst.msk [vmem:[#allocation3 + $0x58] sm:$0xff] %vm8997_vm7, %v4656_v14 }
 0x2ee   : > { %v3728_v61 = vpop.permute.xlu0 %3727  ;;  %v4803_v25 = vpop.permute.xlu1 %4802  ;;  %v5123_v11 = vld [vmem:[#allocation3 + $0x50] sm:$0xff] }
 0x2ef   : > { %4845 = vst.msk [vmem:[#allocation3 + $0x58] sm:$0xff] %vm2304_vm14, %v4803_v25  ;;  %5786 = vmatprep.mubr.msk.bf16.mxu1 %vm2647_vm5, %v5123_v11 }
 0x2f0   : > { %5106 = vst.msk [vmem:[#allocation3 + $0x58] sm:$0xff] %vm8998_vm1, %v5064_v54 }
 0x2f2   : > { %v3989_v16 = vpop.permute.xlu0 %3988  ;;  %v3467_v63 = vpop.permute.xlu1 %3466 }
 0x2f3   : > { %3508 = vst.msk [vmem:[#allocation3 + $0x60] sm:$0xff] %vm956_vm8, %v3467_v63 }
 0x2f4   : > { %3769 = vst.msk [vmem:[#allocation3 + $0x60] sm:$0xff] %vm1219_vm9, %v3728_v61 }
 0x2f5   : > { %4030 = vst.msk [vmem:[#allocation3 + $0x60] sm:$0xff] %vm1481_vm10, %v3989_v16 }
 0x2f6   : > { %v4136_v60 = vpop.permute.xlu0 %4135  ;;  %v3469_v22 = vpop.permute.xlu1 %3468 }
 0x2f7   : > { %4177 = vst.msk [vmem:[#allocation3 + $0x60] sm:$0xff] %vm1630_vm11, %v4136_v60  ;;  %v5124_v45 = vld [vmem:[#allocation3 + $0x58] sm:$0xff] }
 0x2f8   : > { %3509 = vst.msk [vmem:[#allocation3 + $0x68] sm:$0xff] %vm956_vm8, %v3469_v22  ;;  %5787 = vmatmul.mubr.msk.bf16.gmra.mrb[20].mxu1 %vm2647_vm5, %v5124_v45 }
 0x2fa   : > { %v4397_v46 = vpop.permute.xlu0 %4396  ;;  %v3730_v42 = vpop.permute.xlu1 %3729 }
 0x2fb   : > { %4438 = vst.msk [vmem:[#allocation3 + $0x60] sm:$0xff] %vm8999_vm12, %v4397_v46  ;;  %vm9006_vm12 = vmmov %vm9002_vm2 }
 0x2fc   : > { %3770 = vst.msk [vmem:[#allocation3 + $0x68] sm:$0xff] %vm1219_vm9, %v3730_v42 }
 0x2fe   : > { %v4658_v2 = vpop.permute.xlu0 %4657  ;;  %v3991_v10 = vpop.permute.xlu1 %3990 }
 0x2ff   : > { %4699 = vst.msk [vmem:[#allocation3 + $0x60] sm:$0xff] %vm9000_vm15, %v4658_v2  ;;  %vm9007_vm15 = vmmov %vm8997_vm7 }
 0x300   : > { %4031 = vst.msk [vmem:[#allocation3 + $0x68] sm:$0xff] %vm1481_vm10, %v3991_v10 }
 0x302   : > { %v4805_v13 = vpop.permute.xlu0 %4804  ;;  %v4138_v37 = vpop.permute.xlu1 %4137 }
 0x303   : > { %4846 = vst.msk [vmem:[#allocation3 + $0x60] sm:$0xff] %vm2304_vm14, %v4805_v13  ;;  %v5146_v13 = vld [vmem:[%s5896_s23 + $0x48] sm:$0xff] }
 0x304   : > { %4178 = vst.msk [vmem:[#allocation3 + $0x68] sm:$0xff] %vm1630_vm11, %v4138_v37 }
 0x306   : > { %v5066_v6 = vpop.permute.xlu0 %5065  ;;  %v4399_v30 = vpop.permute.xlu1 %4398 }
 0x307   : > { %5107 = vst.msk [vmem:[#allocation3 + $0x60] sm:$0xff] %vm9001_vm3, %v5066_v6  ;;  %vm9008_vm3 = vmmov %vm8998_vm1 }
 0x308   : > { %4439 = vst.msk [vmem:[#allocation3 + $0x68] sm:$0xff] %vm9002_vm2, %v4399_v30  ;;  %v5144_v30 = vld [vmem:[%s5896_s23 + $0x38] sm:$0xff] }
 0x30a   : > { %v5068_v36 = vpop.permute.xlu0 %5067  ;;  %v4660_v62 = vpop.permute.xlu1 %4659 }
 0x30b   : > { %4700 = vst.msk [vmem:[#allocation3 + $0x68] sm:$0xff] %vm9003_vm13, %v4660_v62  ;;  %vm9009_vm13 = vmmov %vm8997_vm7 }
 0x30e   : > { %v3732_v17 = vpop.permute.xlu0 %3731  ;;  %v4807_v59 = vpop.permute.xlu1 %4806  ;;  %v5125_v0 = vld [vmem:[#allocation3 + $0x60] sm:$0xff] }
 0x30f   : > { %4847 = vst.msk [vmem:[#allocation3 + $0x68] sm:$0xff] %vm2304_vm14, %v4807_v59  ;;  %5790 = vmatprep.mubr.msk.bf16.mxu1 %vm2647_vm5, %v5125_v0  ;;  %v5147_v59 = vld [vmem:[%s5896_s23 + $0x50] sm:$0xff] }
 0x310   : > { %5108 = vst.msk [vmem:[#allocation3 + $0x68] sm:$0xff] %vm9004_vm6, %v5068_v36  ;;  %vm9012_vm6 = vmmov %vm8997_vm7 }
 0x312   : > { %v3993_v58 = vpop.permute.xlu0 %3992  ;;  %v3471_v43 = vpop.permute.xlu1 %3470 }
 0x313   : > { %3510 = vst.msk [vmem:[#allocation3 + $0x70] sm:$0xff] %vm956_vm8, %v3471_v43 }
 0x314   : > { %3771 = vst.msk [vmem:[#allocation3 + $0x70] sm:$0xff] %vm1219_vm9, %v3732_v17 }
 0x315   : > { %4032 = vst.msk [vmem:[#allocation3 + $0x70] sm:$0xff] %vm1481_vm10, %v3993_v58 }
 0x316   : > { %v4140_v28 = vpop.permute.xlu0 %4139  ;;  %v3473_v52 = vpop.permute.xlu1 %3472 }
 0x317   : > { %4179 = vst.msk [vmem:[#allocation3 + $0x70] sm:$0xff] %vm1630_vm11, %v4140_v28  ;;  %v5126_v29 = vld [vmem:[#allocation3 + $0x68] sm:$0xff]  ;;  %v5145_v28 = vld [vmem:[%s5896_s23 + $0x40] sm:$0xff] }
 0x318   : > { %3511 = vst.msk [vmem:[#allocation3 + $0x78] sm:$0xff] %vm956_vm8, %v3473_v52  ;;  %5791 = vmatmul.mubr.msk.bf16.gmra.mrb[24].mxu1 %vm2647_vm5, %v5126_v29 }
 0x31a   : > { %v4401_v55 = vpop.permute.xlu0 %4400  ;;  %v3734_v4 = vpop.permute.xlu1 %3733 }
 0x31b   : > { %4440 = vst.msk [vmem:[#allocation3 + $0x70] sm:$0xff] %vm9005_vm4, %v4401_v55 }
 0x31c   : > { %3772 = vst.msk [vmem:[#allocation3 + $0x78] sm:$0xff] %vm1219_vm9, %v3734_v4 }
 0x31e   : > { %v4662_v3 = vpop.permute.xlu0 %4661  ;;  %v3995_v57 = vpop.permute.xlu1 %3994 }
 0x31f   : > { %4701 = vst.msk [vmem:[#allocation3 + $0x70] sm:$0xff] %vm8997_vm7, %v4662_v3 }
 0x320   : > { %4033 = vst.msk [vmem:[#allocation3 + $0x78] sm:$0xff] %vm1481_vm10, %v3995_v57 }
 0x322   : > { %v4809_v31 = vpop.permute.xlu0 %4808  ;;  %v4142_v26 = vpop.permute.xlu1 %4141 }
 0x323   : > { %4848 = vst.msk [vmem:[#allocation3 + $0x70] sm:$0xff] %vm2304_vm14, %v4809_v31 }
 0x324   : > { %4180 = vst.msk [vmem:[#allocation3 + $0x78] sm:$0xff] %vm1630_vm11, %v4142_v26 }
 0x326   : > { %v5070_v47 = vpop.permute.xlu0 %5069  ;;  %v4403_v7 = vpop.permute.xlu1 %4402 }
 0x327   : > { %5109 = vst.msk [vmem:[#allocation3 + $0x70] sm:$0xff] %vm8998_vm1, %v5070_v47 }
 0x328   : > { %4441 = vst.msk [vmem:[#allocation3 + $0x78] sm:$0xff] %vm9006_vm12, %v4403_v7 }
 0x32a   : > { %v5072_v5 = vpop.permute.xlu0 %5071  ;;  %v4664_v39 = vpop.permute.xlu1 %4663 }
 0x32b   : > { %4702 = vst.msk [vmem:[#allocation3 + $0x78] sm:$0xff] %vm9007_vm15, %v4664_v39 }
 0x32e   : > { %v3736_v20 = vpop.permute.xlu0 %3735  ;;  %v4811_v15 = vpop.permute.xlu1 %4810  ;;  %v5127_v51 = vld [vmem:[#allocation3 + $0x70] sm:$0xff] }
 0x32f   : > { %4849 = vst.msk [vmem:[#allocation3 + $0x78] sm:$0xff] %vm2304_vm14, %v4811_v15  ;;  %5794 = vmatprep.mubr.msk.bf16.mxu1 %vm2647_vm5, %v5127_v51  ;;  %v5148_v15 = vld [vmem:[%s5896_s23 + $0x58] sm:$0xff] }
 0x330   : > { %5110 = vst.msk [vmem:[#allocation3 + $0x78] sm:$0xff] %vm9008_vm3, %v5072_v5  ;;  %v5150_v5 = vld [vmem:[%s5896_s23 + $0x68] sm:$0xff] }
 0x332   : > { %v5768_v18 = vpop.f32.mrb[0].mxu1  ;;  %v3997_v40 = vpop.permute.xlu0 %3996 }
 0x333   : > { %v5310_v32 = vadd.f32 %v5768_v18, %v8675_v8  ;;  %v5301_v21 = vpop.f32.mrb[1].mxu1  ;;  %v3475_v50 = vpop.permute.xlu1 %3474  ;;  %v5151_v18 = vld [vmem:[%s5896_s23 + $0x70] sm:$0xff] }
 0x334   : > { %v5302_v34 = vadd.f32 %v8675_v8, %v5301_v21  ;;  %v5769_v19 = vpop.f32.mrb[2].mxu1  ;;  %3512 = vst.msk [vmem:[#allocation3 + $0x80] sm:$0xff] %vm956_vm8, %v3475_v50 }
 0x335   : > { %v5446_v1 = vadd.f32 %v5310_v32, %v5142_v27  ;;  %v5313_v48 = vadd.f32 %v5769_v19, %v8675_v8  ;;  %v5304_v24 = vpop.f32.mrb[3].mxu1  ;;  %3773 = vst.msk [vmem:[#allocation3 + $0x80] sm:$0xff] %vm1219_vm9, %v3736_v20 }
 0x336   : > { %v5444_v56 = vadd.f32 %v5302_v34, %v5140_v53  ;;  %v5305_v23 = vadd.f32 %v8675_v8, %v5304_v24  ;;  %4034 = vst.msk [vmem:[#allocation3 + $0x80] sm:$0xff] %vm1481_vm10, %v3997_v40  ;;  %v4144_v9 = vpop.permute.xlu0 %4143  ;;  %v5149_v40 = vld [vmem:[%s5896_s23 + $0x60] sm:$0xff] }
 0x337   : > { %v5482_v38 = vmax.f32 %v5446_v1, 0.0  ;;  %v5447_v49 = vadd.f32 %v5313_v48, %v5143_v41  ;;  %4181 = vst.msk [vmem:[#allocation3 + $0x80] sm:$0xff] %vm1630_vm11, %v4144_v9  ;;  %v3477_v35 = vpop.permute.xlu1 %3476  ;;  %v5128_v54 = vld [vmem:[#allocation3 + $0x78] sm:$0xff]  ;;  %v5152_v9 = vld [vmem:[%s5896_s23 + $0x78] sm:$0xff] }
 0x338   : > { %v5480_v33 = vmax.f32 %v5444_v56, 0.0  ;;  %v5445_v44 = vadd.f32 %v5305_v23, %v5141_v12  ;;  %3513 = vst.msk [vmem:[#allocation3 + $0x88] sm:$0xff] %vm956_vm8, %v3477_v35  ;;  %5795 = vmatmul.mubr.msk.bf16.gmra.mrb[28].mxu1 %vm2647_vm5, %v5128_v54  ;;  %vm9010_vm8 = vmmov %vm8998_vm1  ;;  %v5154_v23 = vld [vmem:[%s5896_s23 + $0x88] sm:$0xff]  ;;  %v5155_v35 = vld [vmem:[%s5896_s23 + $0x90] sm:$0xff] }
 0x339   : > { %5518 = vst.msk [vmem:[%s8690_s9 + $0x10] sm:$0xff] %vm578_vm0, %v5482_v38  ;;  %v5483_v14 = vmax.f32 %v5447_v49, 0.0 }
 0x33a   : > { %5516 = vst.msk [vmem:[%s8690_s9] sm:$0xff] %vm578_vm0, %v5480_v33  ;;  %v5481_v61 = vmax.f32 %v5445_v44, 0.0  ;;  %v4405_v25 = vpop.permute.xlu0 %4404 }
 0x33b   : > { %5519 = vst.msk [vmem:[%s8690_s9 + $0x18] sm:$0xff] %vm578_vm0, %v5483_v14  ;;  %v3738_v11 = vpop.permute.xlu1 %3737 }
 0x33c   : > { %5517 = vst.msk [vmem:[%s8690_s9 + $0x8] sm:$0xff] %vm578_vm0, %v5481_v61 }
 0x33d   : > { %4442 = vst.msk [vmem:[#allocation3 + $0x80] sm:$0xff] %vm9002_vm2, %v4405_v25  ;;  %v5153_v25 = vld [vmem:[%s5896_s23 + $0x80] sm:$0xff] }
 0x33e   : > { %3774 = vst.msk [vmem:[#allocation3 + $0x88] sm:$0xff] %vm1219_vm9, %v3738_v11  ;;  %v4666_v16 = vpop.permute.xlu0 %4665  ;;  %vm9011_vm9 = vmmov %vm9002_vm2 }
 0x33f   : > { %4703 = vst.msk [vmem:[#allocation3 + $0x80] sm:$0xff] %vm9009_vm13, %v4666_v16  ;;  %v3999_v63 = vpop.permute.xlu1 %3998 }
 0x340   : > { %4035 = vst.msk [vmem:[#allocation3 + $0x88] sm:$0xff] %vm1481_vm10, %v3999_v63  ;;  %vm9013_vm10 = vmmov %vm8998_vm1 }
 0x342   : > { %v4813_v60 = vpop.permute.xlu0 %4812 }
 0x343   : > { %4850 = vst.msk [vmem:[#allocation3 + $0x80] sm:$0xff] %vm2304_vm14, %v4813_v60  ;;  %v4146_v22 = vpop.permute.xlu1 %4145 }
 0x344   : > { %4182 = vst.msk [vmem:[#allocation3 + $0x88] sm:$0xff] %vm1630_vm11, %v4146_v22 }
 0x346   : > { %v5074_v45 = vpop.permute.xlu0 %5073 }
 0x347   : > { %5111 = vst.msk [vmem:[#allocation3 + $0x80] sm:$0xff] %vm9010_vm8, %v5074_v45  ;;  %v4407_v46 = vpop.permute.xlu1 %4406 }
 0x348   : > { %4443 = vst.msk [vmem:[#allocation3 + $0x88] sm:$0xff] %vm9011_vm9, %v4407_v46 }
 0x34b   : > { %v4668_v42 = vpop.permute.xlu1 %4667 }
 0x34c   : > { %4704 = vst.msk [vmem:[#allocation3 + $0x88] sm:$0xff] %vm9012_vm6, %v4668_v42 }
 0x34e   : > { %v5129_v2 = vld [vmem:[#allocation3 + $0x80] sm:$0xff] }
 0x34f   : > { %v4815_v10 = vpop.permute.xlu1 %4814  ;;  %5798 = vmatprep.mubr.msk.bf16.mxu1 %vm2647_vm5, %v5129_v2 }
 0x350   : > { %4851 = vst.msk [vmem:[#allocation3 + $0x88] sm:$0xff] %vm2304_vm14, %v4815_v10  ;;  %v5158_v10 = vld [vmem:[%s5896_s23 + $0xa8] sm:$0xff] }
 0x352   : > { %v5772_v37 = vpop.f32.mrb[4].mxu1 }
 0x353   : > { %v5326_v6 = vadd.f32 %v5772_v37, %v8675_v8  ;;  %v5317_v36 = vpop.f32.mrb[5].mxu1  ;;  %v5076_v17 = vpop.permute.xlu1 %5075 }
 0x354   : > { %v5318_v62 = vadd.f32 %v8675_v8, %v5317_v36  ;;  %v5773_v0 = vpop.f32.mrb[6].mxu1  ;;  %5112 = vst.msk [vmem:[#allocation3 + $0x88] sm:$0xff] %vm9013_vm10, %v5076_v17 }
 0x355   : > { %v5450_v58 = vadd.f32 %v5326_v6, %v5146_v13  ;;  %v5329_v43 = vadd.f32 %v5773_v0, %v8675_v8  ;;  %v5320_v52 = vpop.f32.mrb[7].mxu1  ;;  %v5156_v6 = vld [vmem:[%s5896_s23 + $0x98] sm:$0xff] }
 0x356   : > { %v5448_v29 = vadd.f32 %v5318_v62, %v5144_v30  ;;  %v5321_v55 = vadd.f32 %v8675_v8, %v5320_v52  ;;  %v5159_v62 = vld [vmem:[%s5896_s23 + $0xb0] sm:$0xff] }
 0x357   : > { %v5486_v4 = vmax.f32 %v5450_v58, 0.0  ;;  %v5451_v3 = vadd.f32 %v5329_v43, %v5147_v59  ;;  %v5157_v58 = vld [vmem:[%s5896_s23 + $0xa0] sm:$0xff] }
 0x358   : > { %v5484_v57 = vmax.f32 %v5448_v29, 0.0  ;;  %v5449_v31 = vadd.f32 %v5321_v55, %v5145_v28 }
 0x359   : > { %5522 = vst.msk [vmem:[%s8690_s9 + $0x30] sm:$0xff] %vm578_vm0, %v5486_v4  ;;  %v5487_v26 = vmax.f32 %v5451_v3, 0.0 }
 0x35a   : > { %5520 = vst.msk [vmem:[%s8690_s9 + $0x20] sm:$0xff] %vm578_vm0, %v5484_v57  ;;  %v5485_v47 = vmax.f32 %v5449_v31, 0.0 }
 0x35b   : > { %5523 = vst.msk [vmem:[%s8690_s9 + $0x38] sm:$0xff] %vm578_vm0, %v5487_v26  ;;  %v5130_v7 = vld [vmem:[#allocation3 + $0x88] sm:$0xff]  ;;  %v5162_v26 = vld [vmem:[%s5896_s23 + $0xc8] sm:$0xff] }
 0x35c   : > { %5521 = vst.msk [vmem:[%s8690_s9 + $0x28] sm:$0xff] %vm578_vm0, %v5485_v47  ;;  %5799 = vmatmul.mubr.msk.bf16.gmra.mrb[32].mxu1 %vm2647_vm5, %v5130_v7 }
 0x372   : > { %v5776_v39 = vpop.f32.mrb[8].mxu1 }
 0x373   : > { %v5342_v20 = vadd.f32 %v5776_v39, %v8675_v8  ;;  %v5333_v51 = vpop.f32.mrb[9].mxu1 }
 0x374   : > { %v5334_v27 = vadd.f32 %v8675_v8, %v5333_v51  ;;  %v5777_v32 = vpop.f32.mrb[10].mxu1 }
 0x375   : > { %v5454_v53 = vadd.f32 %v5342_v20, %v5150_v5  ;;  %v5345_v21 = vadd.f32 %v5777_v32, %v8675_v8  ;;  %v5336_v34 = vpop.f32.mrb[11].mxu1  ;;  %v5160_v5 = vld [vmem:[%s5896_s23 + $0xb8] sm:$0xff]  ;;  %v5161_v32 = vld [vmem:[%s5896_s23 + $0xc0] sm:$0xff] }
 0x376   : > { %v5452_v50 = vadd.f32 %v5334_v27, %v5148_v15  ;;  %v5337_v41 = vadd.f32 %v8675_v8, %v5336_v34  ;;  %v5163_v15 = vld [vmem:[%s5896_s23 + $0xd0] sm:$0xff] }
 0x377   : > { %v5490_v19 = vmax.f32 %v5454_v53, 0.0  ;;  %v5455_v1 = vadd.f32 %v5345_v21, %v5151_v18 }
 0x378   : > { %v5488_v48 = vmax.f32 %v5452_v50, 0.0  ;;  %v5453_v12 = vadd.f32 %v5337_v41, %v5149_v40 }
 0x379   : > { %5526 = vst.msk [vmem:[%s8690_s9 + $0x50] sm:$0xff] %vm578_vm0, %v5490_v19  ;;  %v5491_v24 = vmax.f32 %v5455_v1, 0.0 }
 0x37a   : > { %5524 = vst.msk [vmem:[%s8690_s9 + $0x40] sm:$0xff] %vm578_vm0, %v5488_v48  ;;  %v5489_v56 = vmax.f32 %v5453_v12, 0.0  ;;  %v5166_v12 = vld [vmem:[%s5896_s23 + $0xe8] sm:$0xff] }
 0x37b   : > { %5527 = vst.msk [vmem:[%s8690_s9 + $0x58] sm:$0xff] %vm578_vm0, %v5491_v24 }
 0x37c   : > { %5525 = vst.msk [vmem:[%s8690_s9 + $0x48] sm:$0xff] %vm578_vm0, %v5489_v56 }
 0x391   : > { %v5780_v38 = vpop.f32.mrb[12].mxu1 }
 0x392   : > { %v5358_v49 = vadd.f32 %v5780_v38, %v8675_v8  ;;  %v5349_v33 = vpop.f32.mrb[13].mxu1 }
 0x393   : > { %v5350_v44 = vadd.f32 %v8675_v8, %v5349_v33  ;;  %v5781_v54 = vpop.f32.mrb[14].mxu1 }
 0x394   : > { %v5458_v14 = vadd.f32 %v5358_v49, %v5154_v23  ;;  %v5361_v61 = vadd.f32 %v5781_v54, %v8675_v8  ;;  %v5352_v11 = vpop.f32.mrb[15].mxu1  ;;  %v5164_v23 = vld [vmem:[%s5896_s23 + $0xd8] sm:$0xff]  ;;  %v5165_v54 = vld [vmem:[%s5896_s23 + $0xe0] sm:$0xff] }
 0x395   : > { %v5456_v16 = vadd.f32 %v5350_v44, %v5152_v9  ;;  %v5353_v63 = vadd.f32 %v8675_v8, %v5352_v11  ;;  %v5167_v9 = vld [vmem:[%s5896_s23 + $0xf0] sm:$0xff] }
 0x396   : > { %v5494_v60 = vmax.f32 %v5458_v14, 0.0  ;;  %v5459_v22 = vadd.f32 %v5361_v61, %v5155_v35 }
 0x397   : > { %v5492_v45 = vmax.f32 %v5456_v16, 0.0  ;;  %v5457_v46 = vadd.f32 %v5353_v63, %v5153_v25 }
 0x398   : > { %5530 = vst.msk [vmem:[%s8690_s9 + $0x70] sm:$0xff] %vm578_vm0, %v5494_v60  ;;  %v5495_v42 = vmax.f32 %v5459_v22, 0.0 }
 0x399   : > { %5528 = vst.msk [vmem:[%s8690_s9 + $0x60] sm:$0xff] %vm578_vm0, %v5492_v45  ;;  %v5493_v2 = vmax.f32 %v5457_v46, 0.0  ;;  %v5170_v46 = vld [vmem:[%s5896_s23 + $0x108] sm:$0xff] }
 0x39a   : > { %5531 = vst.msk [vmem:[%s8690_s9 + $0x78] sm:$0xff] %vm578_vm0, %v5495_v42 }
 0x39b   : > { %5529 = vst.msk [vmem:[%s8690_s9 + $0x68] sm:$0xff] %vm578_vm0, %v5493_v2 }
 0x3a8   : > { %v5784_v13 = vpop.f32.mrb[16].mxu1 }
 0x3a9   : > { %v5374_v37 = vadd.f32 %v5784_v13, %v8675_v8  ;;  %v5365_v30 = vpop.f32.mrb[17].mxu1 }
 0x3aa   : > { %v5366_v36 = vadd.f32 %v8675_v8, %v5365_v30  ;;  %v5785_v17 = vpop.f32.mrb[18].mxu1 }
 0x3ab   : > { %v5462_v59 = vadd.f32 %v5374_v37, %v5158_v10  ;;  %v5377_v0 = vadd.f32 %v5785_v17, %v8675_v8  ;;  %v5368_v43 = vpop.f32.mrb[19].mxu1  ;;  %v5168_v10 = vld [vmem:[%s5896_s23 + $0xf8] sm:$0xff]  ;;  %v5169_v17 = vld [vmem:[%s5896_s23 + $0x100] sm:$0xff] }
 0x3ac   : > { %v5460_v28 = vadd.f32 %v5366_v36, %v5156_v6  ;;  %v5369_v52 = vadd.f32 %v8675_v8, %v5368_v43  ;;  %v5171_v6 = vld [vmem:[%s5896_s23 + $0x110] sm:$0xff] }
 0x3ad   : > { %v5498_v29 = vmax.f32 %v5462_v59, 0.0  ;;  %v5463_v55 = vadd.f32 %v5377_v0, %v5159_v62 }
 0x3ae   : > { %v5496_v4 = vmax.f32 %v5460_v28, 0.0  ;;  %v5461_v3 = vadd.f32 %v5369_v52, %v5157_v58 }
 0x3af   : > { %5534 = vst.msk [vmem:[%s8690_s9 + $0x90] sm:$0xff] %vm578_vm0, %v5498_v29  ;;  %v5499_v57 = vmax.f32 %v5463_v55, 0.0 }
 0x3b0   : > { %5532 = vst.msk [vmem:[%s8690_s9 + $0x80] sm:$0xff] %vm578_vm0, %v5496_v4  ;;  %v5497_v31 = vmax.f32 %v5461_v3, 0.0  ;;  %v5174_v3 = vld [vmem:[%s5896_s23 + $0x128] sm:$0xff] }
 0x3b1   : > { %5535 = vst.msk [vmem:[%s8690_s9 + $0x98] sm:$0xff] %vm578_vm0, %v5499_v57 }
 0x3b2   : > { %5533 = vst.msk [vmem:[%s8690_s9 + $0x88] sm:$0xff] %vm578_vm0, %v5497_v31 }
 0x3cb   : > { %v5788_v47 = vpop.f32.mrb[20].mxu1 }
 0x3cc   : > { %v5390_v7 = vadd.f32 %v5788_v47, %v8675_v8  ;;  %v5381_v39 = vpop.f32.mrb[21].mxu1 }
 0x3cd   : > { %v5382_v20 = vadd.f32 %v8675_v8, %v5381_v39  ;;  %v5789_v51 = vpop.f32.mrb[22].mxu1 }
 0x3ce   : > { %v5466_v27 = vadd.f32 %v5390_v7, %v5162_v26  ;;  %v5393_v18 = vadd.f32 %v5789_v51, %v8675_v8  ;;  %v5384_v53 = vpop.f32.mrb[23].mxu1  ;;  %v5172_v26 = vld [vmem:[%s5896_s23 + $0x118] sm:$0xff]  ;;  %v5173_v51 = vld [vmem:[%s5896_s23 + $0x120] sm:$0xff] }
 0x3cf   : > { %v5464_v21 = vadd.f32 %v5382_v20, %v5160_v5  ;;  %v5385_v40 = vadd.f32 %v8675_v8, %v5384_v53  ;;  %v5175_v5 = vld [vmem:[%s5896_s23 + $0x130] sm:$0xff] }
 0x3d0   : > { %v5502_v34 = vmax.f32 %v5466_v27, 0.0  ;;  %v5467_v50 = vadd.f32 %v5393_v18, %v5163_v15 }
 0x3d1   : > { %v5500_v41 = vmax.f32 %v5464_v21, 0.0  ;;  %v5465_v19 = vadd.f32 %v5385_v40, %v5161_v32 }
 0x3d2   : > { %5538 = vst.msk [vmem:[%s8690_s9 + $0xb0] sm:$0xff] %vm578_vm0, %v5502_v34  ;;  %v5503_v1 = vmax.f32 %v5467_v50, 0.0 }
 0x3d3   : > { %5536 = vst.msk [vmem:[%s8690_s9 + $0xa0] sm:$0xff] %vm578_vm0, %v5500_v41  ;;  %v5501_v48 = vmax.f32 %v5465_v19, 0.0 }
 0x3d4   : > { %5539 = vst.msk [vmem:[%s8690_s9 + $0xb8] sm:$0xff] %vm578_vm0, %v5503_v1 }
 0x3d5   : > { %5537 = vst.msk [vmem:[%s8690_s9 + $0xa8] sm:$0xff] %vm578_vm0, %v5501_v48 }
 0x3eb   : > { %v5792_v24 = vpop.f32.mrb[24].mxu1 }
 0x3ec   : > { %v5406_v56 = vadd.f32 %v5792_v24, %v8675_v8  ;;  %v5397_v38 = vpop.f32.mrb[25].mxu1 }
 0x3ed   : > { %v5398_v49 = vadd.f32 %v8675_v8, %v5397_v38  ;;  %v5793_v33 = vpop.f32.mrb[26].mxu1 }
 0x3ee   : > { %v5470_v44 = vadd.f32 %v5406_v56, %v5166_v12  ;;  %v5409_v35 = vadd.f32 %v5793_v33, %v8675_v8  ;;  %v5400_v14 = vpop.f32.mrb[27].mxu1 }
 0x3ef   : > { %v5468_v61 = vadd.f32 %v5398_v49, %v5164_v23  ;;  %v5401_v25 = vadd.f32 %v8675_v8, %v5400_v14 }
 0x3f0   : > { %v5506_v11 = vmax.f32 %v5470_v44, 0.0  ;;  %v5471_v16 = vadd.f32 %v5409_v35, %v5167_v9 }
 0x3f1   : > { %v5504_v63 = vmax.f32 %v5468_v61, 0.0  ;;  %v5469_v60 = vadd.f32 %v5401_v25, %v5165_v54 }
 0x3f2   : > { %5542 = vst.msk [vmem:[%s8690_s9 + $0xd0] sm:$0xff] %vm578_vm0, %v5506_v11  ;;  %v5507_v22 = vmax.f32 %v5471_v16, 0.0 }
 0x3f3   : > { %5540 = vst.msk [vmem:[%s8690_s9 + $0xc0] sm:$0xff] %vm578_vm0, %v5504_v63  ;;  %v5505_v45 = vmax.f32 %v5469_v60, 0.0 }
 0x3f4   : > { %5543 = vst.msk [vmem:[%s8690_s9 + $0xd8] sm:$0xff] %vm578_vm0, %v5507_v22 }
 0x3f5   : > { %5541 = vst.msk [vmem:[%s8690_s9 + $0xc8] sm:$0xff] %vm578_vm0, %v5505_v45 }
 0x40b   : > { %v5796_v42 = vpop.f32.mrb[28].mxu1 }
 0x40c   : > { %v5422_v2 = vadd.f32 %v5796_v42, %v8675_v8  ;;  %v5413_v13 = vpop.f32.mrb[29].mxu1 }
 0x40d   : > { %v5414_v37 = vadd.f32 %v8675_v8, %v5413_v13  ;;  %v5797_v30 = vpop.f32.mrb[30].mxu1 }
 0x40e   : > { %v5474_v36 = vadd.f32 %v5422_v2, %v5170_v46  ;;  %v5425_v62 = vadd.f32 %v5797_v30, %v8675_v8  ;;  %v5416_v59 = vpop.f32.mrb[31].mxu1 }
 0x40f   : > { %v5472_v0 = vadd.f32 %v5414_v37, %v5168_v10  ;;  %v5417_v58 = vadd.f32 %v8675_v8, %v5416_v59 }
 0x410   : > { %v5510_v43 = vmax.f32 %v5474_v36, 0.0  ;;  %v5475_v28 = vadd.f32 %v5425_v62, %v5171_v6 }
 0x411   : > { %v5508_v52 = vmax.f32 %v5472_v0, 0.0  ;;  %v5473_v29 = vadd.f32 %v5417_v58, %v5169_v17 }
 0x412   : > { %5546 = vst.msk [vmem:[%s8690_s9 + $0xf0] sm:$0xff] %vm578_vm0, %v5510_v43  ;;  %v5511_v55 = vmax.f32 %v5475_v28, 0.0 }
 0x413   : > { %5544 = vst.msk [vmem:[%s8690_s9 + $0xe0] sm:$0xff] %vm578_vm0, %v5508_v52  ;;  %v5509_v4 = vmax.f32 %v5473_v29, 0.0 }
 0x414   : > { %5547 = vst.msk [vmem:[%s8690_s9 + $0xf8] sm:$0xff] %vm578_vm0, %v5511_v55 }
 0x415   : > { %5545 = vst.msk [vmem:[%s8690_s9 + $0xe8] sm:$0xff] %vm578_vm0, %v5509_v4 }
 0x42f   : > { %v5800_v57 = vpop.f32.mrb[32].mxu1 }
 0x430   : > { %v5438_v31 = vadd.f32 %v5800_v57, %v8675_v8  ;;  %v5429_v47 = vpop.f32.mrb[33].mxu1 }
 0x431   : > { %v5430_v7 = vadd.f32 %v8675_v8, %v5429_v47  ;;  %v5801_v39 = vpop.f32.mrb[34].mxu1 }
 0x432   : > { %v5478_v20 = vadd.f32 %v5438_v31, %v5174_v3  ;;  %v5441_v15 = vadd.f32 %v5801_v39, %v8675_v8  ;;  %v5432_v27 = vpop.f32.mrb[35].mxu1 }
 0x433   : > { %v5476_v18 = vadd.f32 %v5430_v7, %v5172_v26  ;;  %v5433_v32 = vadd.f32 %v8675_v8, %v5432_v27 }
 0x434   : > { %v5514_v53 = vmax.f32 %v5478_v20, 0.0  ;;  %v5479_v21 = vadd.f32 %v5441_v15, %v5175_v5 }
 0x435   : > { %v5512_v40 = vmax.f32 %v5476_v18, 0.0  ;;  %v5477_v34 = vadd.f32 %v5433_v32, %v5173_v51 }
 0x436   : > { %5550 = vst.msk [vmem:[%s8690_s9 + $0x110] sm:$0xff] %vm578_vm0, %v5514_v53  ;;  %v5515_v50 = vmax.f32 %v5479_v21, 0.0 }
 0x437   : > { %5548 = vst.msk [vmem:[%s8690_s9 + $0x100] sm:$0xff] %vm578_vm0, %v5512_v40  ;;  %v5513_v41 = vmax.f32 %v5477_v34, 0.0 }
 0x438   : > { %5551 = vst.msk [vmem:[%s8690_s9 + $0x118] sm:$0xff] %vm578_vm0, %v5515_v50 }
 0x439   : > { %5549 = vst.msk [vmem:[%s8690_s9 + $0x108] sm:$0xff] %vm578_vm0, %v5513_v41 }
 0x43a PF: > { %s15_s18 = sadd.s32 1, %s5841_s18  }
 0x43b   : > { %p12_p4 = scmp.ge.s32.totalorder %s15_s18, 6  }
 0x43d   :  { %14 = sbr.rel (!%p12_p4) target bundleno = 1 (0x1), region = 70 }

</bundles_post_ra>
